<compile_context>
chip_gen: v6e
topology: v6e:2x2x1
jax: 0.10.0
libtpu: 0.0.40
codegen_flags: <defaults>
</compile_context>

<pallas_src>
import functools

import jax
import jax.numpy as jnp
from jax.experimental import pallas as pl
from jax.experimental.pallas import tpu as pltpu


# ------------------------------------------------------------------
# Pallas kernel 1: conv-as-matmul, bf16 MXU operands, fused bias+ReLU(+L2 norm)
# ------------------------------------------------------------------

def _conv_mm_kernel(x_ref, w_ref, b_ref, o_ref, *, normalize):
    # bf16 operands, f32 accumulation on the MXU; epilogue stays in f32.
    y = jnp.dot(x_ref[...], w_ref[...], preferred_element_type=jnp.float32)
    y = jnp.maximum(y + b_ref[...], 0.0)
    if normalize:
        # F.normalize(p=2, dim=channel): channels are the lane dim here, so the
        # per-position normalize is a row-wise rsqrt fused into the epilogue.
        y = y * jax.lax.rsqrt(
            jnp.maximum(jnp.sum(y * y, axis=-1, keepdims=True), 1e-24))
    o_ref[...] = y.astype(o_ref.dtype)


def conv_matmul(x, w, b, *, normalize, out_dtype=jnp.bfloat16, tm=512):
    """relu(x @ w + b), optionally row-L2-normalized.  x: [M, K], w: [K, N].

    Operands are cast to bf16 (f32 accumulation); output dtype is bf16 so the
    downstream fused kernel reads/writes half the bytes.
    """
    M, K = x.shape
    N = w.shape[1]
    x = x.astype(jnp.bfloat16)
    w = w.astype(jnp.bfloat16)
    b = b.astype(jnp.float32)
    # Pad K to a sublane-friendly multiple of 32 and M up to a tile multiple so
    # the grid is cdiv-clean (keeps double-buffered pipelining at any M).
    Kp = ((K + 31) // 32) * 32
    Mp = ((M + tm - 1) // tm) * tm
    if Kp != K:
        x = jnp.pad(x, ((0, 0), (0, Kp - K)))
        w = jnp.pad(w, ((0, Kp - K), (0, 0)))
    if Mp != M:
        x = jnp.pad(x, ((0, Mp - M), (0, 0)))
    y = pl.pallas_call(
        functools.partial(_conv_mm_kernel, normalize=normalize),
        out_shape=jax.ShapeDtypeStruct((Mp, N), out_dtype),
        grid=(Mp // tm,),
        in_specs=[
            pl.BlockSpec((tm, Kp), lambda i: (i, 0)),
            pl.BlockSpec((Kp, N), lambda i: (0, 0)),
            pl.BlockSpec((1, N), lambda i: (0, 0)),
        ],
        out_specs=pl.BlockSpec((tm, N), lambda i: (i, 0)),
        compiler_params=pltpu.CompilerParams(dimension_semantics=("parallel",)),
    )(x, w, b.reshape(1, N))
    return y[:M] if Mp != M else y


# ------------------------------------------------------------------
# Pallas kernel 2: fused align + affinity-softmax + transition chain (per b)
# ------------------------------------------------------------------

def _fused_post_kernel(feat_ref, idx_ref, wgt_ref, out_ref, *, T, inv_temp):
    HW = feat_ref.shape[2]

    def frame(k):                              # bf16 [HW, D], VMEM-resident
        return feat_ref[0, k]

    def dot(a, b):                             # a @ b,   bf16 in / f32 acc
        return jnp.dot(a, b, preferred_element_type=jnp.float32)

    def dot_bt(a, b):                          # a @ b.T  (contract last dims)
        return jax.lax.dot_general(a, b, (((1,), (1,)), ((), ())),
                                   preferred_element_type=jnp.float32)

    def dot_at(a, b):                          # a.T @ b  (contract first dims)
        return jax.lax.dot_general(a, b, (((0,), (0,)), ((), ())),
                                   preferred_element_type=jnp.float32)

    def softmax_rows(s):
        s = s - jnp.max(s, axis=-1, keepdims=True)
        e = jnp.exp(s)
        return e * pl.reciprocal(jnp.sum(e, axis=-1, keepdims=True), approx=True)

    def bf16(v):
        return v.astype(jnp.bfloat16)

    # AA[k] = softmax(feat[k] @ feat[k+1]^T / temp) — computed lazily at the
    # single point of use so at most one affinity (plus trans/tmp) is live.
    def AA(k):
        return bf16(softmax_rows(dot_bt(frame(k), frame(k + 1)) * inv_temp))

    sub_iota = jax.lax.broadcasted_iota(jnp.int32, (HW, HW), 0)

    # A_aligned[src] = softmax(normalize(grid_sample(feat[src])) @ feat[src+1]^T
    #                          / temp)
    # grid_sample is a 4-tap bilinear sampling operator rebuilt in-register
    # from the lane-dense [4, HW] taps (built transposed so no relayout is
    # needed) and applied on the MXU as samp @ feat[src] = sampT^T @ feat[src].
    def A_aligned(src):
        taps_i = idx_ref[0, src]               # [4, HW] int32, lane-dense
        taps_w = wgt_ref[0, src]               # [4, HW] f32,   lane-dense
        sampT = jnp.zeros((HW, HW), jnp.float32)   # sampT[q, p] = samp[p, q]
        for t in range(4):
            sampT = sampT + jnp.where(sub_iota == taps_i[t:t + 1, :],
                                      taps_w[t:t + 1, :], 0.0)
        aligned = dot_at(bf16(sampT), frame(src))          # grid_sample
        aligned = aligned * jax.lax.rsqrt(                  # F.normalize
            jnp.maximum(jnp.sum(aligned * aligned, axis=-1, keepdims=True),
                        1e-24))
        return bf16(softmax_rows(dot_bt(bf16(aligned), frame(src + 1))
                                 * inv_temp))

    # Sequential transition-matrix chain; outputs written directly in the
    # final (At_list) order.  AA[0], the dummy t_sub == 0 output, and the last
    # (never consumed) transition update are skipped.
    trans = AA(T - 1)
    for t_sub in range(T - 1):
        src = T - 2 - t_sub
        dst = T + t_sub
        tmp = bf16(dot(trans, AA(dst)))
        if t_sub > 0:
            out_ref[0, src] = dot(A_aligned(src), tmp)
        if t_sub < T - 2:                       # last update is never consumed
            trans = bf16(dot(AA(src), tmp))


def fused_post_encoder(feat, idx, wgt, T, temp):
    """feat: [B, 2T, HW, D] bf16 (already L2-normalized over D);
    idx/wgt: [B, T-2, 4, HW] bilinear taps for the consumed forward frames."""
    B, Ttot, HW, D = feat.shape
    if T < 3:
        return []
    Tm2 = T - 2

    def lane_pad(n):
        return ((n + 127) // 128) * 128

    # Explicit scoped-VMEM budget: double-buffered feat/taps/out blocks plus
    # the (small, lazy) live set of affinity temporaries, lane-padded.
    vmem_bytes = (
        2 * (Ttot * HW * lane_pad(D) * 2)                  # feat block (bf16)
        + 2 * 2 * (Tm2 * 8 * lane_pad(HW) * 4)             # idx + wgt blocks
        + 2 * (Tm2 * HW * lane_pad(HW) * 4)                # output block (f32)
        + 12 * HW * lane_pad(HW) * 4                       # live AA/A_al/samp
        + (4 << 20))                                       # headroom
    vmem_bytes = int(min(max(vmem_bytes, 8 << 20), 64 << 20))

    out = pl.pallas_call(
        functools.partial(_fused_post_kernel, T=T, inv_temp=1.0 / float(temp)),
        out_shape=jax.ShapeDtypeStruct((B, Tm2, HW, HW), jnp.float32),
        grid=(B,),
        in_specs=[
            pl.BlockSpec((1, Ttot, HW, D), lambda b: (b, 0, 0, 0)),
            pl.BlockSpec((1, Tm2, 4, HW), lambda b: (b, 0, 0, 0)),
            pl.BlockSpec((1, Tm2, 4, HW), lambda b: (b, 0, 0, 0)),
        ],
        out_specs=pl.BlockSpec((1, Tm2, HW, HW), lambda b: (b, 0, 0, 0)),
        compiler_params=pltpu.CompilerParams(
            dimension_semantics=("parallel",),
            vmem_limit_bytes=vmem_bytes),
    )(feat, idx, wgt)
    return [out[:, j] for j in range(Tm2)]


# ------------------------------------------------------------------
# JAX glue: im2col, affine_grid + grid_sample 4-tap weights
# ------------------------------------------------------------------

def im2col(x, ksize=3, stride=2, pad=1):
    """x: [N, H, W, C] (NHWC) -> patches [N*OH*OW, ksize*ksize*C]."""
    N, H, W, C = x.shape
    xp = jnp.pad(x, ((0, 0), (pad, pad), (pad, pad), (0, 0)))
    OH = (H + 2 * pad - ksize) // stride + 1
    OW = (W + 2 * pad - ksize) // stride + 1
    cols = []
    for kh in range(ksize):
        for kw in range(ksize):
            cols.append(xp[:, kh:kh + (OH - 1) * stride + 1:stride,
                           kw:kw + (OW - 1) * stride + 1:stride, :])
    patches = jnp.stack(cols, axis=3)              # [N, OH, OW, K*K, C]
    return patches.reshape(N * OH * OW, ksize * ksize * C), OH, OW


def build_sampling_taps(theta, H, W):
    """4-tap bilinear taps equivalent to affine_grid(align_corners=True) +
    grid_sample(bilinear, zeros, align_corners=True).
    Returns idx [N, 4, HW] int32 and wgt [N, 4, HW] float32 (lane-dense)."""
    xs = jnp.linspace(-1.0, 1.0, W)
    ys = jnp.linspace(-1.0, 1.0, H)
    gy, gx = jnp.meshgrid(ys, xs, indexing="ij")                    # [H, W]
    base = jnp.stack([gx, gy, jnp.ones_like(gx)], axis=-1).reshape(H * W, 3)
    g = jnp.einsum("nij,pj->npi", theta, base)                      # [N, HW, 2]
    ix = (g[..., 0] + 1.0) * 0.5 * (W - 1)
    iy = (g[..., 1] + 1.0) * 0.5 * (H - 1)
    x0 = jnp.floor(ix)
    y0 = jnp.floor(iy)
    x1 = x0 + 1.0
    y1 = y0 + 1.0
    wx1 = ix - x0
    wx0 = 1.0 - wx1
    wy1 = iy - y0
    wy0 = 1.0 - wy1
    idxs, wgts = [], []
    for xc, yc, wgt in [(x0, y0, wx0 * wy0), (x1, y0, wx1 * wy0),
                        (x0, y1, wx0 * wy1), (x1, y1, wx1 * wy1)]:
        inb = (xc >= 0) & (xc <= W - 1) & (yc >= 0) & (yc <= H - 1)
        xi = jnp.clip(xc, 0, W - 1).astype(jnp.int32)
        yi = jnp.clip(yc, 0, H - 1).astype(jnp.int32)
        idxs.append(yi * W + xi)
        wgts.append(jnp.where(inb, wgt, 0.0))
    return (jnp.stack(idxs, axis=1).astype(jnp.int32),     # [N, 4, HW]
            jnp.stack(wgts, axis=1).astype(jnp.float32))


# ------------------------------------------------------------------
# Model forward
# ------------------------------------------------------------------

def encoder_forward(frames_nhwc, params):
    """Stand-in fcn_encoder: conv3x3/s2 + ReLU, conv3x3/s2 + ReLU, with the
    model's F.normalize(p=2, dim=channel) fused into the second conv.
    Everything runs bf16-in / f32-accumulate / bf16-out."""
    N = frames_nhwc.shape[0]
    frames_bf16 = frames_nhwc.astype(jnp.bfloat16)
    p1, oh1, ow1 = im2col(frames_bf16, 3, 2, 1)
    y1 = conv_matmul(p1, params["w1"], params["b1"],
                     normalize=False).reshape(N, oh1, ow1, -1)
    p2, oh2, ow2 = im2col(y1, 3, 2, 1)
    y2 = conv_matmul(p2, params["w2"], params["b2"],
                     normalize=True).reshape(N, oh2, ow2, -1)
    return y2  # [N, fh, fw, D] bf16, L2-normalized over D


def stfc3net_forward(x_nchw, affine_mat_in, params, temp):
    B, Ttot, C, H, W = x_nchw.shape
    T = Ttot // 2

    if affine_mat_in.ndim == 3:
        affine_mat = jnp.broadcast_to(affine_mat_in[:, None], (B, T, 2, 3))
    else:
        affine_mat = affine_mat_in
    affine_mat = affine_mat.reshape(B * T, 2, 3)

    # NCHW -> NHWC
    frames = x_nchw.reshape(B * Ttot, C, H, W).transpose(0, 2, 3, 1)
    feat = encoder_forward(frames, params)                 # [B*2T, fh, fw, D]
    _, fh, fw, D = feat.shape
    HW = fh * fw
    feat = feat.reshape(B, Ttot, HW, D)                    # bf16

    # 4-tap grid_sample weights, lane-dense [*, 4, HW]; only the T-2 forward
    # frames the chain actually consumes are passed to the kernel.
    idx, wgt = build_sampling_taps(affine_mat, fh, fw)
    idx = idx.reshape(B, T, 4, HW)[:, :max(T - 2, 0)]
    wgt = wgt.reshape(B, T, 4, HW)[:, :max(T - 2, 0)]

    # One fused Pallas call per batch element: align+normalize, affinity
    # softmaxes, and the transition-matrix chain, all VMEM-resident.
    return fused_post_encoder(feat, idx, wgt, T, temp)


stfc3net_forward_jit = jax.jit(stfc3net_forward, static_argnames=("temp",))


# ------------------------------------------------------------------
# Main
# ------------------------------------------------------------------

if __name__ == "__main__":
    key = jax.random.PRNGKey(0)
    B, T, C, H, W = 2, 3, 3, 16, 16          # x: [B, 2T, C, H, W]
    OC = 32                                  # encoder feature dim

    k1, k2, k3, k4, k5, k6 = jax.random.split(key, 6)
    x = jax.random.normal(k1, (B, 2 * T, C, H, W), jnp.float32)
    base_theta = jnp.array([[1.0, 0.05, 0.1], [-0.05, 1.0, -0.1]], jnp.float32)
    affine_mat_in = base_theta[None] + 0.02 * jax.random.normal(
        k2, (B, 2, 3), jnp.float32)

    params = {
        "w1": 0.2 * jax.random.normal(k3, (9 * C, OC), jnp.float32),
        "b1": 0.1 * jax.random.normal(k4, (OC,), jnp.float32),
        "w2": (0.2 / jnp.sqrt(9.0 * OC)) * jax.random.normal(
            k5, (9 * OC, OC), jnp.float32),
        "b2": 0.1 * jax.random.normal(k6, (OC,), jnp.float32),
    }

    temperature = 0.07
    out_list = stfc3net_forward_jit(x, affine_mat_in, params, temp=temperature)
    out_list = jax.block_until_ready(out_list)

    assert len(out_list) == T - 2
    for at in out_list:
        assert at.shape == (B, (H // 4) * (W // 4), (H // 4) * (W // 4))
        assert bool(jnp.all(jnp.isfinite(at)))
        # Products of row-stochastic (softmax) matrices stay row-stochastic:
        # loose sanity check on the bf16 / approx-reciprocal pipeline.
        row_err = float(jnp.max(jnp.abs(jnp.sum(at, axis=-1) - 1.0)))
        assert row_err < 0.1, f"row-sum drift {row_err}"
    print("KERNEL_OK")
</pallas_src>

<mosaic_0001>
module attributes {stable_mosaic.version = 11 : i64} {
  func.func @_conv_mm_kernel(%arg0: i32, %arg1: memref<512x32xbf16, #tpu.memory_space<vmem>>, %arg2: memref<32x32xbf16, #tpu.memory_space<vmem>>, %arg3: memref<1x32xf32, #tpu.memory_space<vmem>>, %arg4: memref<512x32xbf16, #tpu.memory_space<vmem>>) attributes {dimension_semantics = [#tpu.dimension_semantics<parallel>], iteration_bounds = array<i64: 2>, scalar_prefetch = 0 : i64, scratch_operands = 0 : i64, tpu.core_type = #tpu.core_type<tc>, window_params = [{transform_indices = @transform_0, window_bounds = array<i64: 512, 32>}, {pipeline_mode = #tpu.pipeline_mode<synchronous>, transform_indices = @transform_1, window_bounds = array<i64: 32, 32>}, {pipeline_mode = #tpu.pipeline_mode<synchronous>, transform_indices = @transform_2, window_bounds = array<i64: 1, 32>}, {transform_indices = @transform_3, window_bounds = array<i64: 512, 32>}]} {
    %c0 = arith.constant 0 : index
    %c0_0 = arith.constant 0 : index
    %0 = vector.load %arg1[%c0, %c0_0] : memref<512x32xbf16, #tpu.memory_space<vmem>>, vector<512x32xbf16>
    %c0_1 = arith.constant 0 : index
    %c0_2 = arith.constant 0 : index
    %1 = vector.load %arg2[%c0_1, %c0_2] : memref<32x32xbf16, #tpu.memory_space<vmem>>, vector<32x32xbf16>
    %cst = arith.constant dense<0.000000e+00> : vector<512x32xf32>
    %2 = tpu.matmul %0, %1, %cst {dimension_numbers = #tpu.dot_dimension_numbers<[1], [0], [0], [1], [0, 0, 1, 1], [], []>} : vector<512x32xbf16>, vector<32x32xbf16>, vector<512x32xf32> -> vector<512x32xf32>
    %c0_3 = arith.constant 0 : index
    %c0_4 = arith.constant 0 : index
    %3 = vector.load %arg3[%c0_3, %c0_4] : memref<1x32xf32, #tpu.memory_space<vmem>>, vector<1x32xf32>
    %4 = vector.broadcast %3 : vector<1x32xf32> to vector<512x32xf32>
    %5 = arith.addf %2, %4 : vector<512x32xf32>
    %cst_5 = arith.constant 0.000000e+00 : f32
    %6 = vector.broadcast %cst_5 : f32 to vector<512x32xf32>
    %7 = arith.maximumf %5, %6 : vector<512x32xf32>
    %8 = arith.truncf %7 : vector<512x32xf32> to vector<512x32xbf16>
    %c0_6 = arith.constant 0 : index
    %c0_7 = arith.constant 0 : index
    %9 = vector.load %arg4[%c0_6, %c0_7] : memref<512x32xbf16, #tpu.memory_space<vmem>>, vector<512x32xbf16>
    tpu.vector_store %arg4[%c0_6, %c0_7], %8 {strides = array<i32>} : memref<512x32xbf16, #tpu.memory_space<vmem>>, vector<512x32xbf16>,
    return
  }
  func.func @transform_0(%arg0: i32) -> (i32, i32) {
    %c0_i32 = arith.constant 0 : i32
    %c0_i32_0 = arith.constant 0 : i32
    return %arg0, %c0_i32 : i32, i32
  }
  func.func @transform_1(%arg0: i32) -> (i32, i32) {
    %c0_i32 = arith.constant 0 : i32
    %c0_i32_0 = arith.constant 0 : i32
    %c0_i32_1 = arith.constant 0 : i32
    return %c0_i32, %c0_i32_0 : i32, i32
  }
  func.func @transform_2(%arg0: i32) -> (i32, i32) {
    %c0_i32 = arith.constant 0 : i32
    %c0_i32_0 = arith.constant 0 : i32
    %c0_i32_1 = arith.constant 0 : i32
    return %c0_i32, %c0_i32_0 : i32, i32
  }
  func.func @transform_3(%arg0: i32) -> (i32, i32) {
    %c0_i32 = arith.constant 0 : i32
    %c0_i32_0 = arith.constant 0 : i32
    return %arg0, %c0_i32 : i32, i32
  }
}

module attributes {stable_mosaic.version = 11 : i64} {
  func.func @_conv_mm_kernel(%arg0: i32, %arg1: memref<512x288xbf16, #tpu.memory_space<vmem>>, %arg2: memref<288x32xbf16, #tpu.memory_space<vmem>>, %arg3: memref<1x32xf32, #tpu.memory_space<vmem>>, %arg4: memref<512x32xbf16, #tpu.memory_space<vmem>>) attributes {dimension_semantics = [#tpu.dimension_semantics<parallel>], iteration_bounds = array<i64: 1>, scalar_prefetch = 0 : i64, scratch_operands = 0 : i64, tpu.core_type = #tpu.core_type<tc>, window_params = [{transform_indices = @transform_0, window_bounds = array<i64: 512, 288>}, {pipeline_mode = #tpu.pipeline_mode<synchronous>, transform_indices = @transform_1, window_bounds = array<i64: 288, 32>}, {pipeline_mode = #tpu.pipeline_mode<synchronous>, transform_indices = @transform_2, window_bounds = array<i64: 1, 32>}, {transform_indices = @transform_3, window_bounds = array<i64: 512, 32>}]} {
    %c0 = arith.constant 0 : index
    %c0_0 = arith.constant 0 : index
    %0 = vector.load %arg1[%c0, %c0_0] : memref<512x288xbf16, #tpu.memory_space<vmem>>, vector<512x288xbf16>
    %c0_1 = arith.constant 0 : index
    %c0_2 = arith.constant 0 : index
    %1 = vector.load %arg2[%c0_1, %c0_2] : memref<288x32xbf16, #tpu.memory_space<vmem>>, vector<288x32xbf16>
    %cst = arith.constant dense<0.000000e+00> : vector<512x32xf32>
    %2 = tpu.matmul %0, %1, %cst {dimension_numbers = #tpu.dot_dimension_numbers<[1], [0], [0], [1], [0, 0, 1, 1], [], []>} : vector<512x288xbf16>, vector<288x32xbf16>, vector<512x32xf32> -> vector<512x32xf32>
    %c0_3 = arith.constant 0 : index
    %c0_4 = arith.constant 0 : index
    %3 = vector.load %arg3[%c0_3, %c0_4] : memref<1x32xf32, #tpu.memory_space<vmem>>, vector<1x32xf32>
    %4 = vector.broadcast %3 : vector<1x32xf32> to vector<512x32xf32>
    %5 = arith.addf %2, %4 : vector<512x32xf32>
    %cst_5 = arith.constant 0.000000e+00 : f32
    %6 = vector.broadcast %cst_5 : f32 to vector<512x32xf32>
    %7 = arith.maximumf %5, %6 : vector<512x32xf32>
    %8 = arith.mulf %7, %7 : vector<512x32xf32>
    %cst_6 = arith.constant dense<0.000000e+00> : vector<512xf32>
    %9 = vector.multi_reduction <add>, %8, %cst_6 [1] : vector<512x32xf32> to vector<512xf32>
    %10 = vector.shape_cast %9 : vector<512xf32> to vector<512x1xf32>
    %cst_7 = arith.constant 1.000000e-24 : f32
    %11 = vector.broadcast %cst_7 : f32 to vector<512x1xf32>
    %12 = arith.maximumf %10, %11 : vector<512x1xf32>
    %13 = math.rsqrt %12 : vector<512x1xf32>
    %14 = vector.broadcast %13 : vector<512x1xf32> to vector<512x32xf32>
    %15 = arith.mulf %7, %14 : vector<512x32xf32>
    %16 = arith.truncf %15 : vector<512x32xf32> to vector<512x32xbf16>
    %c0_8 = arith.constant 0 : index
    %c0_9 = arith.constant 0 : index
    %17 = vector.load %arg4[%c0_8, %c0_9] : memref<512x32xbf16, #tpu.memory_space<vmem>>, vector<512x32xbf16>
    tpu.vector_store %arg4[%c0_8, %c0_9], %16 {strides = array<i32>} : memref<512x32xbf16, #tpu.memory_space<vmem>>, vector<512x32xbf16>,
    return
  }
  func.func @transform_0(%arg0: i32) -> (i32, i32) {
    %c0_i32 = arith.constant 0 : i32
    %c0_i32_0 = arith.constant 0 : i32
    return %arg0, %c0_i32 : i32, i32
  }
  func.func @transform_1(%arg0: i32) -> (i32, i32) {
    %c0_i32 = arith.constant 0 : i32
    %c0_i32_0 = arith.constant 0 : i32
    %c0_i32_1 = arith.constant 0 : i32
    return %c0_i32, %c0_i32_0 : i32, i32
  }
  func.func @transform_2(%arg0: i32) -> (i32, i32) {
    %c0_i32 = arith.constant 0 : i32
    %c0_i32_0 = arith.constant 0 : i32
    %c0_i32_1 = arith.constant 0 : i32
    return %c0_i32, %c0_i32_0 : i32, i32
  }
  func.func @transform_3(%arg0: i32) -> (i32, i32) {
    %c0_i32 = arith.constant 0 : i32
    %c0_i32_0 = arith.constant 0 : i32
    return %arg0, %c0_i32 : i32, i32
  }
}

module attributes {stable_mosaic.version = 11 : i64} {
  func.func @_fused_post_kernel(%arg0: i32, %arg1: memref<1x6x16x32xbf16, #tpu.memory_space<vmem>>, %arg2: memref<1x1x4x16xi32, #tpu.memory_space<vmem>>, %arg3: memref<1x1x4x16xf32, #tpu.memory_space<vmem>>, %arg4: memref<1x1x16x16xf32, #tpu.memory_space<vmem>>) attributes {dimension_semantics = [#tpu.dimension_semantics<parallel>], iteration_bounds = array<i64: 2>, scalar_prefetch = 0 : i64, scratch_operands = 0 : i64, tpu.core_type = #tpu.core_type<tc>, window_params = [{transform_indices = @transform_0, window_bounds = array<i64: 1, 6, 16, 32>}, {transform_indices = @transform_1, window_bounds = array<i64: 1, 1, 4, 16>}, {transform_indices = @transform_2, window_bounds = array<i64: 1, 1, 4, 16>}, {transform_indices = @transform_3, window_bounds = array<i64: 1, 1, 16, 16>}]} {
    %0 = tpu.iota {dimensions = array<i32: 0>} : vector<16x16xi32>
    %c0 = arith.constant 0 : index
    %c2 = arith.constant 2 : index
    %c0_0 = arith.constant 0 : index
    %c0_1 = arith.constant 0 : index
    %1 = vector.load %arg1[%c0, %c2, %c0_0, %c0_1] : memref<1x6x16x32xbf16, #tpu.memory_space<vmem>>, vector<1x1x16x32xbf16>
    %2 = vector.shape_cast %1 : vector<1x1x16x32xbf16> to vector<16x32xbf16>
    %c0_2 = arith.constant 0 : index
    %c3 = arith.constant 3 : index
    %c0_3 = arith.constant 0 : index
    %c0_4 = arith.constant 0 : index
    %3 = vector.load %arg1[%c0_2, %c3, %c0_3, %c0_4] : memref<1x6x16x32xbf16, #tpu.memory_space<vmem>>, vector<1x1x16x32xbf16>
    %4 = vector.shape_cast %3 : vector<1x1x16x32xbf16> to vector<16x32xbf16>
    %cst = arith.constant dense<0.000000e+00> : vector<16x16xf32>
    %5 = tpu.matmul %2, %4, %cst {dimension_numbers = #tpu.dot_dimension_numbers<[1], [1], [0], [0], [0, 0, 1, 0], [], []>} : vector<16x32xbf16>, vector<16x32xbf16>, vector<16x16xf32> -> vector<16x16xf32>
    %cst_5 = arith.constant 14.2857141 : f32
    %6 = vector.broadcast %cst_5 : f32 to vector<16x16xf32>
    %7 = arith.mulf %5, %6 : vector<16x16xf32>
    %cst_6 = arith.constant dense<0xFF800000> : vector<16xf32>
    %8 = vector.multi_reduction <maximumf>, %7, %cst_6 [1] : vector<16x16xf32> to vector<16xf32>
    %9 = vector.shape_cast %8 : vector<16xf32> to vector<16x1xf32>
    %10 = vector.broadcast %9 : vector<16x1xf32> to vector<16x16xf32>
    %11 = arith.subf %7, %10 : vector<16x16xf32>
    %12 = math.exp %11 : vector<16x16xf32>
    %cst_7 = arith.constant dense<0.000000e+00> : vector<16xf32>
    %13 = vector.multi_reduction <add>, %12, %cst_7 [1] : vector<16x16xf32> to vector<16xf32>
    %14 = vector.shape_cast %13 : vector<16xf32> to vector<16x1xf32>
    %15 = tpu.reciprocal %14 {approx = true} : vector<16x1xf32> -> vector<16x1xf32>
    %16 = vector.broadcast %15 : vector<16x1xf32> to vector<16x16xf32>
    %17 = arith.mulf %12, %16 : vector<16x16xf32>
    %18 = arith.truncf %17 : vector<16x16xf32> to vector<16x16xbf16>
    %c0_8 = arith.constant 0 : index
    %c3_9 = arith.constant 3 : index
    %c0_10 = arith.constant 0 : index
    %c0_11 = arith.constant 0 : index
    %19 = vector.load %arg1[%c0_8, %c3_9, %c0_10, %c0_11] : memref<1x6x16x32xbf16, #tpu.memory_space<vmem>>, vector<1x1x16x32xbf16>
    %20 = vector.shape_cast %19 : vector<1x1x16x32xbf16> to vector<16x32xbf16>
    %c0_12 = arith.constant 0 : index
    %c4 = arith.constant 4 : index
    %c0_13 = arith.constant 0 : index
    %c0_14 = arith.constant 0 : index
    %21 = vector.load %arg1[%c0_12, %c4, %c0_13, %c0_14] : memref<1x6x16x32xbf16, #tpu.memory_space<vmem>>, vector<1x1x16x32xbf16>
    %22 = vector.shape_cast %21 : vector<1x1x16x32xbf16> to vector<16x32xbf16>
    %cst_15 = arith.constant dense<0.000000e+00> : vector<16x16xf32>
    %23 = tpu.matmul %20, %22, %cst_15 {dimension_numbers = #tpu.dot_dimension_numbers<[1], [1], [0], [0], [0, 0, 1, 0], [], []>} : vector<16x32xbf16>, vector<16x32xbf16>, vector<16x16xf32> -> vector<16x16xf32>
    %cst_16 = arith.constant 14.2857141 : f32
    %24 = vector.broadcast %cst_16 : f32 to vector<16x16xf32>
    %25 = arith.mulf %23, %24 : vector<16x16xf32>
    %cst_17 = arith.constant dense<0xFF800000> : vector<16xf32>
    %26 = vector.multi_reduction <maximumf>, %25, %cst_17 [1] : vector<16x16xf32> to vector<16xf32>
    %27 = vector.shape_cast %26 : vector<16xf32> to vector<16x1xf32>
    %28 = vector.broadcast %27 : vector<16x1xf32> to vector<16x16xf32>
    %29 = arith.subf %25, %28 : vector<16x16xf32>
    %30 = math.exp %29 : vector<16x16xf32>
    %cst_18 = arith.constant dense<0.000000e+00> : vector<16xf32>
    %31 = vector.multi_reduction <add>, %30, %cst_18 [1] : vector<16x16xf32> to vector<16xf32>
    %32 = vector.shape_cast %31 : vector<16xf32> to vector<16x1xf32>
    %33 = tpu.reciprocal %32 {approx = true} : vector<16x1xf32> -> vector<16x1xf32>
    %34 = vector.broadcast %33 : vector<16x1xf32> to vector<16x16xf32>
    %35 = arith.mulf %30, %34 : vector<16x16xf32>
    %36 = arith.truncf %35 : vector<16x16xf32> to vector<16x16xbf16>
    %cst_19 = arith.constant dense<0.000000e+00> : vector<16x16xf32>
    %37 = tpu.matmul %18, %36, %cst_19 {dimension_numbers = #tpu.dot_dimension_numbers<[1], [0], [0], [1], [0, 0, 1, 1], [], []>} : vector<16x16xbf16>, vector<16x16xbf16>, vector<16x16xf32> -> vector<16x16xf32>
    %38 = arith.truncf %37 : vector<16x16xf32> to vector<16x16xbf16>
    %c0_20 = arith.constant 0 : index
    %c1 = arith.constant 1 : index
    %c0_21 = arith.constant 0 : index
    %c0_22 = arith.constant 0 : index
    %39 = vector.load %arg1[%c0_20, %c1, %c0_21, %c0_22] : memref<1x6x16x32xbf16, #tpu.memory_space<vmem>>, vector<1x1x16x32xbf16>
    %40 = vector.shape_cast %39 : vector<1x1x16x32xbf16> to vector<16x32xbf16>
    %c0_23 = arith.constant 0 : index
    %c2_24 = arith.constant 2 : index
    %c0_25 = arith.constant 0 : index
    %c0_26 = arith.constant 0 : index
    %41 = vector.load %arg1[%c0_23, %c2_24, %c0_25, %c0_26] : memref<1x6x16x32xbf16, #tpu.memory_space<vmem>>, vector<1x1x16x32xbf16>
    %42 = vector.shape_cast %41 : vector<1x1x16x32xbf16> to vector<16x32xbf16>
    %cst_27 = arith.constant dense<0.000000e+00> : vector<16x16xf32>
    %43 = tpu.matmul %40, %42, %cst_27 {dimension_numbers = #tpu.dot_dimension_numbers<[1], [1], [0], [0], [0, 0, 1, 0], [], []>} : vector<16x32xbf16>, vector<16x32xbf16>, vector<16x16xf32> -> vector<16x16xf32>
    %cst_28 = arith.constant 14.2857141 : f32
    %44 = vector.broadcast %cst_28 : f32 to vector<16x16xf32>
    %45 = arith.mulf %43, %44 : vector<16x16xf32>
    %cst_29 = arith.constant dense<0xFF800000> : vector<16xf32>
    %46 = vector.multi_reduction <maximumf>, %45, %cst_29 [1] : vector<16x16xf32> to vector<16xf32>
    %47 = vector.shape_cast %46 : vector<16xf32> to vector<16x1xf32>
    %48 = vector.broadcast %47 : vector<16x1xf32> to vector<16x16xf32>
    %49 = arith.subf %45, %48 : vector<16x16xf32>
    %50 = math.exp %49 : vector<16x16xf32>
    %cst_30 = arith.constant dense<0.000000e+00> : vector<16xf32>
    %51 = vector.multi_reduction <add>, %50, %cst_30 [1] : vector<16x16xf32> to vector<16xf32>
    %52 = vector.shape_cast %51 : vector<16xf32> to vector<16x1xf32>
    %53 = tpu.reciprocal %52 {approx = true} : vector<16x1xf32> -> vector<16x1xf32>
    %54 = vector.broadcast %53 : vector<16x1xf32> to vector<16x16xf32>
    %55 = arith.mulf %50, %54 : vector<16x16xf32>
    %56 = arith.truncf %55 : vector<16x16xf32> to vector<16x16xbf16>
    %cst_31 = arith.constant dense<0.000000e+00> : vector<16x16xf32>
    %57 = tpu.matmul %56, %38, %cst_31 {dimension_numbers = #tpu.dot_dimension_numbers<[1], [0], [0], [1], [0, 0, 1, 1], [], []>} : vector<16x16xbf16>, vector<16x16xbf16>, vector<16x16xf32> -> vector<16x16xf32>
    %58 = arith.truncf %57 : vector<16x16xf32> to vector<16x16xbf16>
    %c0_32 = arith.constant 0 : index
    %c4_33 = arith.constant 4 : index
    %c0_34 = arith.constant 0 : index
    %c0_35 = arith.constant 0 : index
    %59 = vector.load %arg1[%c0_32, %c4_33, %c0_34, %c0_35] : memref<1x6x16x32xbf16, #tpu.memory_space<vmem>>, vector<1x1x16x32xbf16>
    %60 = vector.shape_cast %59 : vector<1x1x16x32xbf16> to vector<16x32xbf16>
    %c0_36 = arith.constant 0 : index
    %c5 = arith.constant 5 : index
    %c0_37 = arith.constant 0 : index
    %c0_38 = arith.constant 0 : index
    %61 = vector.load %arg1[%c0_36, %c5, %c0_37, %c0_38] : memref<1x6x16x32xbf16, #tpu.memory_space<vmem>>, vector<1x1x16x32xbf16>
    %62 = vector.shape_cast %61 : vector<1x1x16x32xbf16> to vector<16x32xbf16>
    %cst_39 = arith.constant dense<0.000000e+00> : vector<16x16xf32>
    %63 = tpu.matmul %60, %62, %cst_39 {dimension_numbers = #tpu.dot_dimension_numbers<[1], [1], [0], [0], [0, 0, 1, 0], [], []>} : vector<16x32xbf16>, vector<16x32xbf16>, vector<16x16xf32> -> vector<16x16xf32>
    %cst_40 = arith.constant 14.2857141 : f32
    %64 = vector.broadcast %cst_40 : f32 to vector<16x16xf32>
    %65 = arith.mulf %63, %64 : vector<16x16xf32>
    %cst_41 = arith.constant dense<0xFF800000> : vector<16xf32>
    %66 = vector.multi_reduction <maximumf>, %65, %cst_41 [1] : vector<16x16xf32> to vector<16xf32>
    %67 = vector.shape_cast %66 : vector<16xf32> to vector<16x1xf32>
    %68 = vector.broadcast %67 : vector<16x1xf32> to vector<16x16xf32>
    %69 = arith.subf %65, %68 : vector<16x16xf32>
    %70 = math.exp %69 : vector<16x16xf32>
    %cst_42 = arith.constant dense<0.000000e+00> : vector<16xf32>
    %71 = vector.multi_reduction <add>, %70, %cst_42 [1] : vector<16x16xf32> to vector<16xf32>
    %72 = vector.shape_cast %71 : vector<16xf32> to vector<16x1xf32>
    %73 = tpu.reciprocal %72 {approx = true} : vector<16x1xf32> -> vector<16x1xf32>
    %74 = vector.broadcast %73 : vector<16x1xf32> to vector<16x16xf32>
    %75 = arith.mulf %70, %74 : vector<16x16xf32>
    %76 = arith.truncf %75 : vector<16x16xf32> to vector<16x16xbf16>
    %cst_43 = arith.constant dense<0.000000e+00> : vector<16x16xf32>
    %77 = tpu.matmul %58, %76, %cst_43 {dimension_numbers = #tpu.dot_dimension_numbers<[1], [0], [0], [1], [0, 0, 1, 1], [], []>} : vector<16x16xbf16>, vector<16x16xbf16>, vector<16x16xf32> -> vector<16x16xf32>
    %78 = arith.truncf %77 : vector<16x16xf32> to vector<16x16xbf16>
    %c0_44 = arith.constant 0 : index
    %c0_45 = arith.constant 0 : index
    %c0_46 = arith.constant 0 : index
    %c0_47 = arith.constant 0 : index
    %79 = vector.load %arg2[%c0_44, %c0_45, %c0_46, %c0_47] : memref<1x1x4x16xi32, #tpu.memory_space<vmem>>, vector<1x1x4x16xi32>
    %80 = vector.shape_cast %79 : vector<1x1x4x16xi32> to vector<4x16xi32>
    %c0_48 = arith.constant 0 : index
    %c0_49 = arith.constant 0 : index
    %c0_50 = arith.constant 0 : index
    %c0_51 = arith.constant 0 : index
    %81 = vector.load %arg3[%c0_48, %c0_49, %c0_50, %c0_51] : memref<1x1x4x16xf32, #tpu.memory_space<vmem>>, vector<1x1x4x16xf32>
    %82 = vector.shape_cast %81 : vector<1x1x4x16xf32> to vector<4x16xf32>
    %cst_52 = arith.constant 0.000000e+00 : f32
    %83 = vector.broadcast %cst_52 : f32 to vector<16x16xf32>
    %84 = vector.extract_strided_slice %80 {offsets = [0, 0], sizes = [1, 16], strides = [1, 1]} : vector<4x16xi32> to vector<1x16xi32>
    %85 = vector.broadcast %84 : vector<1x16xi32> to vector<16x16xi32>
    %86 = arith.cmpi eq, %0, %85 : vector<16x16xi32>
    %87 = vector.extract_strided_slice %82 {offsets = [0, 0], sizes = [1, 16], strides = [1, 1]} : vector<4x16xf32> to vector<1x16xf32>
    %cst_53 = arith.constant 0.000000e+00 : f32
    %88 = vector.shape_cast %87 : vector<1x16xf32> to vector<1x16xf32>
    %89 = vector.broadcast %88 : vector<1x16xf32> to vector<16x16xf32>
    %90 = vector.broadcast %cst_53 : f32 to vector<16x16xf32>
    %91 = arith.select %86, %89, %90 : vector<16x16xi1>, vector<16x16xf32>
    %92 = arith.addf %83, %91 : vector<16x16xf32>
    %93 = vector.extract_strided_slice %80 {offsets = [1, 0], sizes = [1, 16], strides = [1, 1]} : vector<4x16xi32> to vector<1x16xi32>
    %94 = vector.broadcast %93 : vector<1x16xi32> to vector<16x16xi32>
    %95 = arith.cmpi eq, %0, %94 : vector<16x16xi32>
    %96 = vector.extract_strided_slice %82 {offsets = [1, 0], sizes = [1, 16], strides = [1, 1]} : vector<4x16xf32> to vector<1x16xf32>
    %cst_54 = arith.constant 0.000000e+00 : f32
    %97 = vector.shape_cast %96 : vector<1x16xf32> to vector<1x16xf32>
    %98 = vector.broadcast %97 : vector<1x16xf32> to vector<16x16xf32>
    %99 = vector.broadcast %cst_54 : f32 to vector<16x16xf32>
    %100 = arith.select %95, %98, %99 : vector<16x16xi1>, vector<16x16xf32>
    %101 = arith.addf %92, %100 : vector<16x16xf32>
    %102 = vector.extract_strided_slice %80 {offsets = [2, 0], sizes = [1, 16], strides = [1, 1]} : vector<4x16xi32> to vector<1x16xi32>
    %103 = vector.broadcast %102 : vector<1x16xi32> to vector<16x16xi32>
    %104 = arith.cmpi eq, %0, %103 : vector<16x16xi32>
    %105 = vector.extract_strided_slice %82 {offsets = [2, 0], sizes = [1, 16], strides = [1, 1]} : vector<4x16xf32> to vector<1x16xf32>
    %cst_55 = arith.constant 0.000000e+00 : f32
    %106 = vector.shape_cast %105 : vector<1x16xf32> to vector<1x16xf32>
    %107 = vector.broadcast %106 : vector<1x16xf32> to vector<16x16xf32>
    %108 = vector.broadcast %cst_55 : f32 to vector<16x16xf32>
    %109 = arith.select %104, %107, %108 : vector<16x16xi1>, vector<16x16xf32>
    %110 = arith.addf %101, %109 : vector<16x16xf32>
    %111 = vector.extract_strided_slice %80 {offsets = [3, 0], sizes = [1, 16], strides = [1, 1]} : vector<4x16xi32> to vector<1x16xi32>
    %112 = vector.broadcast %111 : vector<1x16xi32> to vector<16x16xi32>
    %113 = arith.cmpi eq, %0, %112 : vector<16x16xi32>
    %114 = vector.extract_strided_slice %82 {offsets = [3, 0], sizes = [1, 16], strides = [1, 1]} : vector<4x16xf32> to vector<1x16xf32>
    %cst_56 = arith.constant 0.000000e+00 : f32
    %115 = vector.shape_cast %114 : vector<1x16xf32> to vector<1x16xf32>
    %116 = vector.broadcast %115 : vector<1x16xf32> to vector<16x16xf32>
    %117 = vector.broadcast %cst_56 : f32 to vector<16x16xf32>
    %118 = arith.select %113, %116, %117 : vector<16x16xi1>, vector<16x16xf32>
    %119 = arith.addf %110, %118 : vector<16x16xf32>
    %120 = arith.truncf %119 : vector<16x16xf32> to vector<16x16xbf16>
    %c0_57 = arith.constant 0 : index
    %c0_58 = arith.constant 0 : index
    %c0_59 = arith.constant 0 : index
    %c0_60 = arith.constant 0 : index
    %121 = vector.load %arg1[%c0_57, %c0_58, %c0_59, %c0_60] : memref<1x6x16x32xbf16, #tpu.memory_space<vmem>>, vector<1x1x16x32xbf16>
    %122 = vector.shape_cast %121 : vector<1x1x16x32xbf16> to vector<16x32xbf16>
    %cst_61 = arith.constant dense<0.000000e+00> : vector<16x32xf32>
    %123 = tpu.matmul %120, %122, %cst_61 {dimension_numbers = #tpu.dot_dimension_numbers<[0], [0], [1], [1], [0, 1, 1, 1], [], []>} : vector<16x16xbf16>, vector<16x32xbf16>, vector<16x32xf32> -> vector<16x32xf32>
    %124 = arith.mulf %123, %123 : vector<16x32xf32>
    %cst_62 = arith.constant dense<0.000000e+00> : vector<16xf32>
    %125 = vector.multi_reduction <add>, %124, %cst_62 [1] : vector<16x32xf32> to vector<16xf32>
    %126 = vector.shape_cast %125 : vector<16xf32> to vector<16x1xf32>
    %cst_63 = arith.constant 1.000000e-24 : f32
    %127 = vector.broadcast %cst_63 : f32 to vector<16x1xf32>
    %128 = arith.maximumf %126, %127 : vector<16x1xf32>
    %129 = math.rsqrt %128 : vector<16x1xf32>
    %130 = vector.broadcast %129 : vector<16x1xf32> to vector<16x32xf32>
    %131 = arith.mulf %123, %130 : vector<16x32xf32>
    %132 = arith.truncf %131 : vector<16x32xf32> to vector<16x32xbf16>
    %c0_64 = arith.constant 0 : index
    %c1_65 = arith.constant 1 : index
    %c0_66 = arith.constant 0 : index
    %c0_67 = arith.constant 0 : index
    %133 = vector.load %arg1[%c0_64, %c1_65, %c0_66, %c0_67] : memref<1x6x16x32xbf16, #tpu.memory_space<vmem>>, vector<1x1x16x32xbf16>
    %134 = vector.shape_cast %133 : vector<1x1x16x32xbf16> to vector<16x32xbf16>
    %cst_68 = arith.constant dense<0.000000e+00> : vector<16x16xf32>
    %135 = tpu.matmul %132, %134, %cst_68 {dimension_numbers = #tpu.dot_dimension_numbers<[1], [1], [0], [0], [0, 0, 1, 0], [], []>} : vector<16x32xbf16>, vector<16x32xbf16>, vector<16x16xf32> -> vector<16x16xf32>
    %cst_69 = arith.constant 14.2857141 : f32
    %136 = vector.broadcast %cst_69 : f32 to vector<16x16xf32>
    %137 = arith.mulf %135, %136 : vector<16x16xf32>
    %cst_70 = arith.constant dense<0xFF800000> : vector<16xf32>
    %138 = vector.multi_reduction <maximumf>, %137, %cst_70 [1] : vector<16x16xf32> to vector<16xf32>
    %139 = vector.shape_cast %138 : vector<16xf32> to vector<16x1xf32>
    %140 = vector.broadcast %139 : vector<16x1xf32> to vector<16x16xf32>
    %141 = arith.subf %137, %140 : vector<16x16xf32>
    %142 = math.exp %141 : vector<16x16xf32>
    %cst_71 = arith.constant dense<0.000000e+00> : vector<16xf32>
    %143 = vector.multi_reduction <add>, %142, %cst_71 [1] : vector<16x16xf32> to vector<16xf32>
    %144 = vector.shape_cast %143 : vector<16xf32> to vector<16x1xf32>
    %145 = tpu.reciprocal %144 {approx = true} : vector<16x1xf32> -> vector<16x1xf32>
    %146 = vector.broadcast %145 : vector<16x1xf32> to vector<16x16xf32>
    %147 = arith.mulf %142, %146 : vector<16x16xf32>
    %148 = arith.truncf %147 : vector<16x16xf32> to vector<16x16xbf16>
    %cst_72 = arith.constant dense<0.000000e+00> : vector<16x16xf32>
    %149 = tpu.matmul %148, %78, %cst_72 {dimension_numbers = #tpu.dot_dimension_numbers<[1], [0], [0], [1], [0, 0, 1, 1], [], []>} : vector<16x16xbf16>, vector<16x16xbf16>, vector<16x16xf32> -> vector<16x16xf32>
    %c0_73 = arith.constant 0 : index
    %c0_74 = arith.constant 0 : index
    %c0_75 = arith.constant 0 : index
    %c0_76 = arith.constant 0 : index
    %150 = vector.load %arg4[%c0_73, %c0_74, %c0_75, %c0_76] : memref<1x1x16x16xf32, #tpu.memory_space<vmem>>, vector<1x1x16x16xf32>
    %151 = vector.shape_cast %150 : vector<1x1x16x16xf32> to vector<16x16xf32>
    %152 = vector.shape_cast %149 : vector<16x16xf32> to vector<1x1x16x16xf32>
    tpu.vector_store %arg4[%c0_73, %c0_74, %c0_75, %c0_76], %152 {strides = array<i32>} : memref<1x1x16x16xf32, #tpu.memory_space<vmem>>, vector<1x1x16x16xf32>,
    return
  }
  func.func @transform_0(%arg0: i32) -> (i32, i32, i32, i32) {
    %c0_i32 = arith.constant 0 : i32
    %c0_i32_0 = arith.constant 0 : i32
    %c0_i32_1 = arith.constant 0 : i32
    %c0_i32_2 = arith.constant 0 : i32
    return %arg0, %c0_i32, %c0_i32_0, %c0_i32_1 : i32, i32, i32, i32
  }
  func.func @transform_1(%arg0: i32) -> (i32, i32, i32, i32) {
    %c0_i32 = arith.constant 0 : i32
    %c0_i32_0 = arith.constant 0 : i32
    %c0_i32_1 = arith.constant 0 : i32
    %c0_i32_2 = arith.constant 0 : i32
    return %arg0, %c0_i32, %c0_i32_0, %c0_i32_1 : i32, i32, i32, i32
  }
  func.func @transform_2(%arg0: i32) -> (i32, i32, i32, i32) {
    %c0_i32 = arith.constant 0 : i32
    %c0_i32_0 = arith.constant 0 : i32
    %c0_i32_1 = arith.constant 0 : i32
    %c0_i32_2 = arith.constant 0 : i32
    return %arg0, %c0_i32, %c0_i32_0, %c0_i32_1 : i32, i32, i32, i32
  }
  func.func @transform_3(%arg0: i32) -> (i32, i32, i32, i32) {
    %c0_i32 = arith.constant 0 : i32
    %c0_i32_0 = arith.constant 0 : i32
    %c0_i32_1 = arith.constant 0 : i32
    %c0_i32_2 = arith.constant 0 : i32
    return %arg0, %c0_i32, %c0_i32_0, %c0_i32_1 : i32, i32, i32, i32
  }
}

</mosaic_0001>

<bundles_post_ra>
// kernel: stfc3net_forward.3
= control target key start
LH: loop header
LB: loop body
LE: loop exit
PB: predicated region body
PF: predicated region fallthrough
CT: control target
= control target key end

     0   :  { %s1631_s12 = smov 0   ;;  %s1926_s0 = inlined_call_operand.vmem [shape: bf16[1024,32], index: 0, kind: input, shape index: {}]   ;;  %s1927_s1 = inlined_call_operand.vmem [shape: bf16[32,32], index: 1, kind: input, shape index: {}]   ;;  %s1928_s2 = inlined_call_operand.vmem [shape: f32[1,32], index: 2, kind: input, shape index: {}]   ;;  %s1929_s3 = inlined_call_operand.vmem [shape: bf16[1024,32], index: 3, kind: output, shape index: {}]  }
   0x1 LB: > { %s1249_s13 = sadd.s32 4294967295, %s1609_s12   ;;  %p1253_p0 = scmp.ge.s32.totalorder %s1609_s12, 1  ;;  %s1609_s12 = sphi %s1631_s12, %s13_s12  }
   0x2   : > { %p138_p1 = scmp.lt.s32.totalorder %s1609_s12, 3 }
   0x4   : > { %p139_p2 = pnand %p1253_p0, %p138_p1 }
   0x5   : > { %s1254_s16 = sshll.u32 (!%p139_p2), %s1249_s13, 6 }
   0x6   : > { %142 = sbr.rel (%p139_p2) target bundleno = 283 (0x11b), region = 32  ;;  %p163_p3 = scmp.lt.s32.totalorder (!%p139_p2), %s1254_s16, 127 }
   0xb   : > { %v1569_v0 = vld [vmem:[%s1927_s1 + $0x8] sm:$0xff]   ;;  %v1570_v1 = vld [vmem:[%s1927_s1] sm:$0xff]   ;;  %s1931_s16 = smov (!%p163_p3, %s1254_s16), 127  ;;  %vm422_vm0 = vcmask 261120   ;;  %vm1128_vm1 = vcmask 257024  }
   0xc   : > { %1489 = vmatprep.subr.bf16.mxu0 %v1569_v0  ;;  %1557 = vmatprep.subr.bf16.mxu1 %v1569_v0  ;;  %s1255_s19 = sshll.u32 %s1931_s16, 2  ;;  %v1722_v34 = vld [vmem:[%s1928_s2] ss:$0 sm:$0xff] }
   0xd   : > { %1490 = vmatpush3.bf16.msra.mxu0 %v1569_v0  ;;  %1559 = vmatpush3.bf16.msra.mxu1 %v1569_v0  ;;  %s1653_s22 = scalar_lea.vmem %s1926_s0, %s1255_s19  ;;  %s1732_s27 = scalar_lea.vmem %s1929_s3, %s1255_s19 }
   0xe   : > { %1491 = vmatprep.subr.bf16.mxu0 %v1570_v1  ;;  %1558 = vmatprep.subr.bf16.mxu1 %v1570_v1  ;;  %v1571_v2 = vld [vmem:[%s1653_s22] sm:$0xff]   ;;  %v1573_v4 = vld [vmem:[%s1653_s22 + $0x8] sm:$0xff]   ;;  %v1575_v6 = vld [vmem:[%s1653_s22 + $0x10] sm:$0xff]  }
   0xf   : > { %v1572_v3 = vld [vmem:[%s1653_s22 + $0x80] sm:$0xff]   ;;  %1493 = vmatprep.mubr.msk.bf16.mxu0 %vm422_vm0, %v1571_v2  ;;  %v1574_v5 = vld [vmem:[%s1653_s22 + $0x88] sm:$0xff]   ;;  %v1576_v7 = vld [vmem:[%s1653_s22 + $0x90] sm:$0xff]  }
  0x10   : > { %1525 = vmatprep.mubr.msk.bf16.mxu1 %vm422_vm0, %v1572_v3  ;;  %v1577_v8 = vld [vmem:[%s1653_s22 + $0x18] sm:$0xff]   ;;  %v1579_v10 = vld [vmem:[%s1653_s22 + $0x20] sm:$0xff]   ;;  %v1581_v12 = vld [vmem:[%s1653_s22 + $0x28] sm:$0xff]  }
  0x11   : > { %1492 = vmatpush3.bf16.msra.mxu0 %v1570_v1  ;;  %1560 = vmatpush3.bf16.msra.mxu1 %v1570_v1  ;;  %v1578_v9 = vld [vmem:[%s1653_s22 + $0x98] sm:$0xff]   ;;  %v1580_v11 = vld [vmem:[%s1653_s22 + $0xa0] sm:$0xff]   ;;  %v1582_v13 = vld [vmem:[%s1653_s22 + $0xa8] sm:$0xff]  }
  0x12   : > { %v1583_v14 = vld [vmem:[%s1653_s22 + $0x30] sm:$0xff]   ;;  %v1585_v16 = vld [vmem:[%s1653_s22 + $0x38] sm:$0xff]   ;;  %v1587_v18 = vld [vmem:[%s1653_s22 + $0x40] sm:$0xff]  }
  0x13   : > { %v1584_v15 = vld [vmem:[%s1653_s22 + $0xb0] sm:$0xff]   ;;  %v1586_v17 = vld [vmem:[%s1653_s22 + $0xb8] sm:$0xff]   ;;  %v1588_v19 = vld [vmem:[%s1653_s22 + $0xc0] sm:$0xff]  }
  0x14   : > { %1494 = vmatmul.mubr.msk.bf16.vlgmr.msra.gmra.mxu0 %vm422_vm0, %v1573_v4  ;;  %1526 = vmatmul.mubr.msk.bf16.vlgmr.msra.gmra.mxu1 %vm422_vm0, %v1574_v5  ;;  %v1589_v20 = vld [vmem:[%s1653_s22 + $0x48] sm:$0xff]   ;;  %v1591_v22 = vld [vmem:[%s1653_s22 + $0x50] sm:$0xff]   ;;  %v1593_v24 = vld [vmem:[%s1653_s22 + $0x58] sm:$0xff]  }
  0x15   : > { %1497 = vmatprep.mubr.msk.bf16.mxu0 %vm422_vm0, %v1575_v6  ;;  %1529 = vmatprep.mubr.msk.bf16.mxu1 %vm422_vm0, %v1576_v7  ;;  %v1590_v21 = vld [vmem:[%s1653_s22 + $0xc8] sm:$0xff]   ;;  %v1592_v23 = vld [vmem:[%s1653_s22 + $0xd0] sm:$0xff]   ;;  %v1594_v25 = vld [vmem:[%s1653_s22 + $0xd8] sm:$0xff]  }
  0x16   : > { %v1595_v26 = vld [vmem:[%s1653_s22 + $0x60] sm:$0xff]   ;;  %v1597_v28 = vld [vmem:[%s1653_s22 + $0x68] sm:$0xff]   ;;  %v1599_v30 = vld [vmem:[%s1653_s22 + $0x70] sm:$0xff]  }
  0x17   : > { %v1596_v27 = vld [vmem:[%s1653_s22 + $0xe0] sm:$0xff]   ;;  %v1598_v29 = vld [vmem:[%s1653_s22 + $0xe8] sm:$0xff]   ;;  %v1600_v31 = vld [vmem:[%s1653_s22 + $0xf0] sm:$0xff]  }
  0x18   : > { %v1601_v32 = vld [vmem:[%s1653_s22 + $0x78] sm:$0xff]  }
  0x19   : > { %v1602_v33 = vld [vmem:[%s1653_s22 + $0xf8] sm:$0xff]  }
  0x1c   : > { %1498 = vmatmul.mubr.msk.bf16.gmra.mxu0 %vm422_vm0, %v1577_v8  ;;  %1530 = vmatmul.mubr.msk.bf16.gmra.mxu1 %vm422_vm0, %v1578_v9 }
  0x1d   : > { %1501 = vmatprep.mubr.msk.bf16.mxu0 %vm422_vm0, %v1579_v10  ;;  %1533 = vmatprep.mubr.msk.bf16.mxu1 %vm422_vm0, %v1580_v11 }
  0x24   : > { %1502 = vmatmul.mubr.msk.bf16.gmra.mxu0 %vm422_vm0, %v1581_v12  ;;  %1534 = vmatmul.mubr.msk.bf16.gmra.mxu1 %vm422_vm0, %v1582_v13 }
  0x25   : > { %1505 = vmatprep.mubr.msk.bf16.mxu0 %vm422_vm0, %v1583_v14  ;;  %1537 = vmatprep.mubr.msk.bf16.mxu1 %vm422_vm0, %v1584_v15 }
  0x2c   : > { %1506 = vmatmul.mubr.msk.bf16.gmra.mxu0 %vm422_vm0, %v1585_v16  ;;  %1538 = vmatmul.mubr.msk.bf16.gmra.mxu1 %vm422_vm0, %v1586_v17 }
  0x2d   : > { %1509 = vmatprep.mubr.msk.bf16.mxu0 %vm422_vm0, %v1587_v18  ;;  %1541 = vmatprep.mubr.msk.bf16.mxu1 %vm422_vm0, %v1588_v19 }
  0x34   : > { %1510 = vmatmul.mubr.msk.bf16.gmra.mxu0 %vm422_vm0, %v1589_v20  ;;  %1542 = vmatmul.mubr.msk.bf16.gmra.mxu1 %vm422_vm0, %v1590_v21 }
  0x35   : > { %1513 = vmatprep.mubr.msk.bf16.mxu0 %vm422_vm0, %v1591_v22  ;;  %1545 = vmatprep.mubr.msk.bf16.mxu1 %vm422_vm0, %v1592_v23 }
  0x3c   : > { %1514 = vmatmul.mubr.msk.bf16.gmra.mxu0 %vm422_vm0, %v1593_v24  ;;  %1546 = vmatmul.mubr.msk.bf16.gmra.mxu1 %vm422_vm0, %v1594_v25 }
  0x3d   : > { %1517 = vmatprep.mubr.msk.bf16.mxu0 %vm422_vm0, %v1595_v26  ;;  %1549 = vmatprep.mubr.msk.bf16.mxu1 %vm422_vm0, %v1596_v27 }
  0x44   : > { %1518 = vmatmul.mubr.msk.bf16.gmra.mxu0 %vm422_vm0, %v1597_v28  ;;  %1550 = vmatmul.mubr.msk.bf16.gmra.mxu1 %vm422_vm0, %v1598_v29 }
  0x45   : > { %1521 = vmatprep.mubr.msk.bf16.mxu0 %vm422_vm0, %v1599_v30  ;;  %1553 = vmatprep.mubr.msk.bf16.mxu1 %vm422_vm0, %v1600_v31 }
  0x4c   : > { %1522 = vmatmul.mubr.msk.bf16.gmra.mxu0 %vm422_vm0, %v1601_v32  ;;  %1554 = vmatmul.mubr.msk.bf16.gmra.mxu1 %vm422_vm0, %v1602_v33 }
  0xd4   : > { %v1495_v35 = vpop.f32.mrf.mxu0  ;;  %v1527_v37 = vpop.f32.mrf.mxu1 }
  0xd5   : > { %v562_v36 = vadd.f32 %v1495_v35, %v1722_v34  ;;  %v690_v38 = vadd.f32 %v1527_v37, %v1722_v34 }
  0xd6   : > { %v553_v39 = vpop.f32.mrf.mxu0  ;;  %v681_v42 = vpop.f32.mrf.mxu1 }
  0xd7   : > { %v810_v40 = vmax.f32 %v562_v36, 0.0  ;;  %v554_v41 = vadd.f32 %v1722_v34, %v553_v39  ;;  %v842_v43 = vmax.f32 %v690_v38, 0.0  ;;  %v682_v44 = vadd.f32 %v1722_v34, %v681_v42 }
  0xd8   : > { %v1496_v45 = vpop.f32.mrf.mxu0  ;;  %v1528_v49 = vpop.f32.mrf.mxu1 }
  0xd9   : > { %v1393_v46 = vpack.c.bf16 %v810_v40, %v810_v40  ;;  %v808_v47 = vmax.f32 %v554_v41, 0.0  ;;  %v565_v48 = vadd.f32 %v1496_v45, %v1722_v34  ;;  %v1425_v50 = vpack.c.bf16 %v842_v43, %v842_v43 }
  0xda   : > { %v840_v51 = vmax.f32 %v682_v44, 0.0  ;;  %v693_v52 = vadd.f32 %v1528_v49, %v1722_v34  ;;  %v556_v53 = vpop.f32.mrf.mxu0  ;;  %v684_v57 = vpop.f32.mrf.mxu1 }
  0xdb   : > { %1131 = vst.msk [vmem:[%s1732_s27 + $0x8] sm:$0xf] %vm1128_vm1, %v1393_v46  ;;  %v1391_v54 = vpack.c.bf16 %v808_v47, %v808_v47  ;;  %v811_v55 = vmax.f32 %v565_v48, 0.0  ;;  %v557_v56 = vadd.f32 %v1722_v34, %v556_v53  ;;  %1163 = vst.msk [vmem:[%s1732_s27 + $0x88] sm:$0xf] %vm1128_vm1, %v1425_v50  ;;  %v685_v60 = vadd.f32 %v1722_v34, %v684_v57 }
  0xdc   : > { %v1423_v58 = vpack.c.bf16 %v840_v51, %v840_v51  ;;  %v843_v59 = vmax.f32 %v693_v52, 0.0  ;;  %v1499_v61 = vpop.f32.mrf.mxu0  ;;  %v1531_v1 = vpop.f32.mrf.mxu1 }
  0xdd   : > { %1129 = vst.msk [vmem:[%s1732_s27] sm:$0xf] %vm1128_vm1, %v1391_v54  ;;  %v1394_v62 = vpack.c.bf16 %v811_v55, %v811_v55  ;;  %v809_v63 = vmax.f32 %v557_v56, 0.0  ;;  %v578_v0 = vadd.f32 %v1499_v61, %v1722_v34  ;;  %v841_v3 = vmax.f32 %v685_v60, 0.0 }
  0xde   : > { %1161 = vst.msk [vmem:[%s1732_s27 + $0x80] sm:$0xf] %vm1128_vm1, %v1423_v58  ;;  %v1426_v2 = vpack.c.bf16 %v843_v59, %v843_v59  ;;  %v706_v4 = vadd.f32 %v1531_v1, %v1722_v34  ;;  %v569_v5 = vpop.f32.mrf.mxu0  ;;  %v697_v9 = vpop.f32.mrf.mxu1 }
  0xdf   : > { %1132 = vst.msk [vmem:[%s1732_s27 + $0xc] sm:$0xf] %vm1128_vm1, %v1394_v62  ;;  %v1392_v6 = vpack.c.bf16 %v809_v63, %v809_v63  ;;  %v814_v7 = vmax.f32 %v578_v0, 0.0  ;;  %v570_v8 = vadd.f32 %v1722_v34, %v569_v5  ;;  %v1424_v10 = vpack.c.bf16 %v841_v3, %v841_v3 }
  0xe0   : > { %1164 = vst.msk [vmem:[%s1732_s27 + $0x8c] sm:$0xf] %vm1128_vm1, %v1426_v2  ;;  %v846_v11 = vmax.f32 %v706_v4, 0.0  ;;  %v698_v12 = vadd.f32 %v1722_v34, %v697_v9  ;;  %v1500_v13 = vpop.f32.mrf.mxu0  ;;  %v1532_v17 = vpop.f32.mrf.mxu1 }
  0xe1   : > { %1130 = vst.msk [vmem:[%s1732_s27 + $0x4] sm:$0xf] %vm1128_vm1, %v1392_v6  ;;  %v1397_v14 = vpack.c.bf16 %v814_v7, %v814_v7  ;;  %v812_v15 = vmax.f32 %v570_v8, 0.0  ;;  %v581_v16 = vadd.f32 %v1500_v13, %v1722_v34  ;;  %1162 = vst.msk [vmem:[%s1732_s27 + $0x84] sm:$0xf] %vm1128_vm1, %v1424_v10  ;;  %v709_v20 = vadd.f32 %v1532_v17, %v1722_v34 }
  0xe2   : > { %v1429_v18 = vpack.c.bf16 %v846_v11, %v846_v11  ;;  %v844_v19 = vmax.f32 %v698_v12, 0.0  ;;  %v572_v21 = vpop.f32.mrf.mxu0  ;;  %v700_v25 = vpop.f32.mrf.mxu1 }
  0xe3   : > { %1135 = vst.msk [vmem:[%s1732_s27 + $0x18] sm:$0xf] %vm1128_vm1, %v1397_v14  ;;  %v1395_v22 = vpack.c.bf16 %v812_v15, %v812_v15  ;;  %v815_v23 = vmax.f32 %v581_v16, 0.0  ;;  %v573_v24 = vadd.f32 %v1722_v34, %v572_v21  ;;  %v847_v27 = vmax.f32 %v709_v20, 0.0 }
  0xe4   : > { %1167 = vst.msk [vmem:[%s1732_s27 + $0x98] sm:$0xf] %vm1128_vm1, %v1429_v18  ;;  %v1427_v26 = vpack.c.bf16 %v844_v19, %v844_v19  ;;  %v701_v28 = vadd.f32 %v1722_v34, %v700_v25  ;;  %v1503_v29 = vpop.f32.mrf.mxu0  ;;  %v1535_v33 = vpop.f32.mrf.mxu1 }
  0xe5   : > { %1133 = vst.msk [vmem:[%s1732_s27 + $0x10] sm:$0xf] %vm1128_vm1, %v1395_v22  ;;  %v1398_v30 = vpack.c.bf16 %v815_v23, %v815_v23  ;;  %v813_v31 = vmax.f32 %v573_v24, 0.0  ;;  %v594_v32 = vadd.f32 %v1503_v29, %v1722_v34  ;;  %v1430_v35 = vpack.c.bf16 %v847_v27, %v847_v27 }
  0xe6   : > { %1165 = vst.msk [vmem:[%s1732_s27 + $0x90] sm:$0xf] %vm1128_vm1, %v1427_v26  ;;  %v845_v36 = vmax.f32 %v701_v28, 0.0  ;;  %v722_v37 = vadd.f32 %v1535_v33, %v1722_v34  ;;  %v585_v38 = vpop.f32.mrf.mxu0  ;;  %v713_v42 = vpop.f32.mrf.mxu1 }
  0xe7   : > { %1136 = vst.msk [vmem:[%s1732_s27 + $0x1c] sm:$0xf] %vm1128_vm1, %v1398_v30  ;;  %v1396_v39 = vpack.c.bf16 %v813_v31, %v813_v31  ;;  %v818_v40 = vmax.f32 %v594_v32, 0.0  ;;  %v586_v41 = vadd.f32 %v1722_v34, %v585_v38  ;;  %1168 = vst.msk [vmem:[%s1732_s27 + $0x9c] sm:$0xf] %vm1128_vm1, %v1430_v35  ;;  %v714_v45 = vadd.f32 %v1722_v34, %v713_v42 }
  0xe8   : > { %v1428_v43 = vpack.c.bf16 %v845_v36, %v845_v36  ;;  %v850_v44 = vmax.f32 %v722_v37, 0.0  ;;  %v1504_v46 = vpop.f32.mrf.mxu0  ;;  %v1536_v50 = vpop.f32.mrf.mxu1 }
  0xe9   : > { %1134 = vst.msk [vmem:[%s1732_s27 + $0x14] sm:$0xf] %vm1128_vm1, %v1396_v39  ;;  %v1401_v47 = vpack.c.bf16 %v818_v40, %v818_v40  ;;  %v816_v48 = vmax.f32 %v586_v41, 0.0  ;;  %v597_v49 = vadd.f32 %v1504_v46, %v1722_v34  ;;  %v848_v52 = vmax.f32 %v714_v45, 0.0 }
  0xea   : > { %1166 = vst.msk [vmem:[%s1732_s27 + $0x94] sm:$0xf] %vm1128_vm1, %v1428_v43  ;;  %v1433_v51 = vpack.c.bf16 %v850_v44, %v850_v44  ;;  %v725_v53 = vadd.f32 %v1536_v50, %v1722_v34  ;;  %v588_v54 = vpop.f32.mrf.mxu0  ;;  %v716_v58 = vpop.f32.mrf.mxu1 }
  0xeb   : > { %1139 = vst.msk [vmem:[%s1732_s27 + $0x28] sm:$0xf] %vm1128_vm1, %v1401_v47  ;;  %v1399_v55 = vpack.c.bf16 %v816_v48, %v816_v48  ;;  %v819_v56 = vmax.f32 %v597_v49, 0.0  ;;  %v589_v57 = vadd.f32 %v1722_v34, %v588_v54  ;;  %v1431_v59 = vpack.c.bf16 %v848_v52, %v848_v52 }
  0xec   : > { %1171 = vst.msk [vmem:[%s1732_s27 + $0xa8] sm:$0xf] %vm1128_vm1, %v1433_v51  ;;  %v851_v60 = vmax.f32 %v725_v53, 0.0  ;;  %v717_v61 = vadd.f32 %v1722_v34, %v716_v58  ;;  %v1507_v62 = vpop.f32.mrf.mxu0  ;;  %v1539_v2 = vpop.f32.mrf.mxu1 }
  0xed   : > { %1137 = vst.msk [vmem:[%s1732_s27 + $0x20] sm:$0xf] %vm1128_vm1, %v1399_v55  ;;  %v1402_v63 = vpack.c.bf16 %v819_v56, %v819_v56  ;;  %v817_v0 = vmax.f32 %v589_v57, 0.0  ;;  %v610_v1 = vadd.f32 %v1507_v62, %v1722_v34  ;;  %1169 = vst.msk [vmem:[%s1732_s27 + $0xa0] sm:$0xf] %vm1128_vm1, %v1431_v59  ;;  %v738_v5 = vadd.f32 %v1539_v2, %v1722_v34 }
  0xee   : > { %v1434_v3 = vpack.c.bf16 %v851_v60, %v851_v60  ;;  %v849_v4 = vmax.f32 %v717_v61, 0.0  ;;  %v601_v6 = vpop.f32.mrf.mxu0  ;;  %v729_v10 = vpop.f32.mrf.mxu1 }
  0xef   : > { %1140 = vst.msk [vmem:[%s1732_s27 + $0x2c] sm:$0xf] %vm1128_vm1, %v1402_v63  ;;  %v1400_v7 = vpack.c.bf16 %v817_v0, %v817_v0  ;;  %v822_v8 = vmax.f32 %v610_v1, 0.0  ;;  %v602_v9 = vadd.f32 %v1722_v34, %v601_v6  ;;  %v854_v12 = vmax.f32 %v738_v5, 0.0 }
  0xf0   : > { %1172 = vst.msk [vmem:[%s1732_s27 + $0xac] sm:$0xf] %vm1128_vm1, %v1434_v3  ;;  %v1432_v11 = vpack.c.bf16 %v849_v4, %v849_v4  ;;  %v730_v13 = vadd.f32 %v1722_v34, %v729_v10  ;;  %v1508_v14 = vpop.f32.mrf.mxu0  ;;  %v1540_v18 = vpop.f32.mrf.mxu1 }
  0xf1   : > { %1138 = vst.msk [vmem:[%s1732_s27 + $0x24] sm:$0xf] %vm1128_vm1, %v1400_v7  ;;  %v1405_v15 = vpack.c.bf16 %v822_v8, %v822_v8  ;;  %v820_v16 = vmax.f32 %v602_v9, 0.0  ;;  %v613_v17 = vadd.f32 %v1508_v14, %v1722_v34  ;;  %v1437_v19 = vpack.c.bf16 %v854_v12, %v854_v12 }
  0xf2   : > { %1170 = vst.msk [vmem:[%s1732_s27 + $0xa4] sm:$0xf] %vm1128_vm1, %v1432_v11  ;;  %v852_v20 = vmax.f32 %v730_v13, 0.0  ;;  %v741_v21 = vadd.f32 %v1540_v18, %v1722_v34  ;;  %v604_v22 = vpop.f32.mrf.mxu0  ;;  %v732_v26 = vpop.f32.mrf.mxu1 }
  0xf3   : > { %1143 = vst.msk [vmem:[%s1732_s27 + $0x38] sm:$0xf] %vm1128_vm1, %v1405_v15  ;;  %v1403_v23 = vpack.c.bf16 %v820_v16, %v820_v16  ;;  %v823_v24 = vmax.f32 %v613_v17, 0.0  ;;  %v605_v25 = vadd.f32 %v1722_v34, %v604_v22  ;;  %1175 = vst.msk [vmem:[%s1732_s27 + $0xb8] sm:$0xf] %vm1128_vm1, %v1437_v19  ;;  %v733_v29 = vadd.f32 %v1722_v34, %v732_v26 }
  0xf4   : > { %v1435_v27 = vpack.c.bf16 %v852_v20, %v852_v20  ;;  %v855_v28 = vmax.f32 %v741_v21, 0.0  ;;  %v1511_v30 = vpop.f32.mrf.mxu0  ;;  %v1543_v35 = vpop.f32.mrf.mxu1 }
  0xf5   : > { %1141 = vst.msk [vmem:[%s1732_s27 + $0x30] sm:$0xf] %vm1128_vm1, %v1403_v23  ;;  %v1406_v31 = vpack.c.bf16 %v823_v24, %v823_v24  ;;  %v821_v32 = vmax.f32 %v605_v25, 0.0  ;;  %v626_v33 = vadd.f32 %v1511_v30, %v1722_v34  ;;  %v853_v37 = vmax.f32 %v733_v29, 0.0 }
  0xf6   : > { %1173 = vst.msk [vmem:[%s1732_s27 + $0xb0] sm:$0xf] %vm1128_vm1, %v1435_v27  ;;  %v1438_v36 = vpack.c.bf16 %v855_v28, %v855_v28  ;;  %v754_v38 = vadd.f32 %v1543_v35, %v1722_v34  ;;  %v617_v39 = vpop.f32.mrf.mxu0  ;;  %v745_v43 = vpop.f32.mrf.mxu1 }
  0xf7   : > { %1144 = vst.msk [vmem:[%s1732_s27 + $0x3c] sm:$0xf] %vm1128_vm1, %v1406_v31  ;;  %v1404_v40 = vpack.c.bf16 %v821_v32, %v821_v32  ;;  %v826_v41 = vmax.f32 %v626_v33, 0.0  ;;  %v618_v42 = vadd.f32 %v1722_v34, %v617_v39  ;;  %v1436_v44 = vpack.c.bf16 %v853_v37, %v853_v37 }
  0xf8   : > { %1176 = vst.msk [vmem:[%s1732_s27 + $0xbc] sm:$0xf] %vm1128_vm1, %v1438_v36  ;;  %v858_v45 = vmax.f32 %v754_v38, 0.0  ;;  %v746_v46 = vadd.f32 %v1722_v34, %v745_v43  ;;  %v1512_v47 = vpop.f32.mrf.mxu0  ;;  %v1544_v51 = vpop.f32.mrf.mxu1 }
  0xf9   : > { %1142 = vst.msk [vmem:[%s1732_s27 + $0x34] sm:$0xf] %vm1128_vm1, %v1404_v40  ;;  %v1409_v48 = vpack.c.bf16 %v826_v41, %v826_v41  ;;  %v824_v49 = vmax.f32 %v618_v42, 0.0  ;;  %v629_v50 = vadd.f32 %v1512_v47, %v1722_v34  ;;  %1174 = vst.msk [vmem:[%s1732_s27 + $0xb4] sm:$0xf] %vm1128_vm1, %v1436_v44  ;;  %v757_v54 = vadd.f32 %v1544_v51, %v1722_v34 }
  0xfa   : > { %v1441_v52 = vpack.c.bf16 %v858_v45, %v858_v45  ;;  %v856_v53 = vmax.f32 %v746_v46, 0.0  ;;  %v620_v55 = vpop.f32.mrf.mxu0  ;;  %v748_v59 = vpop.f32.mrf.mxu1 }
  0xfb   : > { %1147 = vst.msk [vmem:[%s1732_s27 + $0x48] sm:$0xf] %vm1128_vm1, %v1409_v48  ;;  %v1407_v56 = vpack.c.bf16 %v824_v49, %v824_v49  ;;  %v827_v57 = vmax.f32 %v629_v50, 0.0  ;;  %v621_v58 = vadd.f32 %v1722_v34, %v620_v55  ;;  %v859_v61 = vmax.f32 %v757_v54, 0.0 }
  0xfc   : > { %1179 = vst.msk [vmem:[%s1732_s27 + $0xc8] sm:$0xf] %vm1128_vm1, %v1441_v52  ;;  %v1439_v60 = vpack.c.bf16 %v856_v53, %v856_v53  ;;  %v749_v62 = vadd.f32 %v1722_v34, %v748_v59  ;;  %v1515_v63 = vpop.f32.mrf.mxu0  ;;  %v1547_v3 = vpop.f32.mrf.mxu1 }
  0xfd   : > { %1145 = vst.msk [vmem:[%s1732_s27 + $0x40] sm:$0xf] %vm1128_vm1, %v1407_v56  ;;  %v1410_v0 = vpack.c.bf16 %v827_v57, %v827_v57  ;;  %v825_v1 = vmax.f32 %v621_v58, 0.0  ;;  %v642_v2 = vadd.f32 %v1515_v63, %v1722_v34  ;;  %v1442_v4 = vpack.c.bf16 %v859_v61, %v859_v61 }
  0xfe   : > { %1177 = vst.msk [vmem:[%s1732_s27 + $0xc0] sm:$0xf] %vm1128_vm1, %v1439_v60  ;;  %v857_v5 = vmax.f32 %v749_v62, 0.0  ;;  %v770_v6 = vadd.f32 %v1547_v3, %v1722_v34  ;;  %v633_v7 = vpop.f32.mrf.mxu0  ;;  %v761_v11 = vpop.f32.mrf.mxu1 }
  0xff   : > { %1148 = vst.msk [vmem:[%s1732_s27 + $0x4c] sm:$0xf] %vm1128_vm1, %v1410_v0  ;;  %v1408_v8 = vpack.c.bf16 %v825_v1, %v825_v1  ;;  %v830_v9 = vmax.f32 %v642_v2, 0.0  ;;  %v634_v10 = vadd.f32 %v1722_v34, %v633_v7  ;;  %1180 = vst.msk [vmem:[%s1732_s27 + $0xcc] sm:$0xf] %vm1128_vm1, %v1442_v4  ;;  %v762_v14 = vadd.f32 %v1722_v34, %v761_v11 }
 0x100   : > { %v1440_v12 = vpack.c.bf16 %v857_v5, %v857_v5  ;;  %v862_v13 = vmax.f32 %v770_v6, 0.0  ;;  %v1516_v15 = vpop.f32.mrf.mxu0  ;;  %v1548_v19 = vpop.f32.mrf.mxu1 }
 0x101   : > { %1146 = vst.msk [vmem:[%s1732_s27 + $0x44] sm:$0xf] %vm1128_vm1, %v1408_v8  ;;  %v1413_v16 = vpack.c.bf16 %v830_v9, %v830_v9  ;;  %v828_v17 = vmax.f32 %v634_v10, 0.0  ;;  %v645_v18 = vadd.f32 %v1516_v15, %v1722_v34  ;;  %v860_v21 = vmax.f32 %v762_v14, 0.0 }
 0x102   : > { %1178 = vst.msk [vmem:[%s1732_s27 + $0xc4] sm:$0xf] %vm1128_vm1, %v1440_v12  ;;  %v1445_v20 = vpack.c.bf16 %v862_v13, %v862_v13  ;;  %v773_v22 = vadd.f32 %v1548_v19, %v1722_v34  ;;  %v636_v23 = vpop.f32.mrf.mxu0  ;;  %v764_v27 = vpop.f32.mrf.mxu1 }
 0x103   : > { %1151 = vst.msk [vmem:[%s1732_s27 + $0x58] sm:$0xf] %vm1128_vm1, %v1413_v16  ;;  %v1411_v24 = vpack.c.bf16 %v828_v17, %v828_v17  ;;  %v831_v25 = vmax.f32 %v645_v18, 0.0  ;;  %v637_v26 = vadd.f32 %v1722_v34, %v636_v23  ;;  %v1443_v28 = vpack.c.bf16 %v860_v21, %v860_v21 }
 0x104   : > { %1183 = vst.msk [vmem:[%s1732_s27 + $0xd8] sm:$0xf] %vm1128_vm1, %v1445_v20  ;;  %v863_v29 = vmax.f32 %v773_v22, 0.0  ;;  %v765_v30 = vadd.f32 %v1722_v34, %v764_v27  ;;  %v1519_v31 = vpop.f32.mrf.mxu0  ;;  %v1551_v36 = vpop.f32.mrf.mxu1 }
 0x105   : > { %1149 = vst.msk [vmem:[%s1732_s27 + $0x50] sm:$0xf] %vm1128_vm1, %v1411_v24  ;;  %v1414_v32 = vpack.c.bf16 %v831_v25, %v831_v25  ;;  %v829_v33 = vmax.f32 %v637_v26, 0.0  ;;  %v658_v35 = vadd.f32 %v1519_v31, %v1722_v34  ;;  %1181 = vst.msk [vmem:[%s1732_s27 + $0xd0] sm:$0xf] %vm1128_vm1, %v1443_v28  ;;  %v786_v39 = vadd.f32 %v1551_v36, %v1722_v34 }
 0x106   : > { %v1446_v37 = vpack.c.bf16 %v863_v29, %v863_v29  ;;  %v861_v38 = vmax.f32 %v765_v30, 0.0  ;;  %v649_v40 = vpop.f32.mrf.mxu0  ;;  %v777_v44 = vpop.f32.mrf.mxu1 }
 0x107   : > { %1152 = vst.msk [vmem:[%s1732_s27 + $0x5c] sm:$0xf] %vm1128_vm1, %v1414_v32  ;;  %v1412_v41 = vpack.c.bf16 %v829_v33, %v829_v33  ;;  %v834_v42 = vmax.f32 %v658_v35, 0.0  ;;  %v650_v43 = vadd.f32 %v1722_v34, %v649_v40  ;;  %v866_v46 = vmax.f32 %v786_v39, 0.0 }
 0x108   : > { %1184 = vst.msk [vmem:[%s1732_s27 + $0xdc] sm:$0xf] %vm1128_vm1, %v1446_v37  ;;  %v1444_v45 = vpack.c.bf16 %v861_v38, %v861_v38  ;;  %v778_v47 = vadd.f32 %v1722_v34, %v777_v44  ;;  %v1520_v48 = vpop.f32.mrf.mxu0  ;;  %v1552_v52 = vpop.f32.mrf.mxu1 }
 0x109   : > { %1150 = vst.msk [vmem:[%s1732_s27 + $0x54] sm:$0xf] %vm1128_vm1, %v1412_v41  ;;  %v1417_v49 = vpack.c.bf16 %v834_v42, %v834_v42  ;;  %v832_v50 = vmax.f32 %v650_v43, 0.0  ;;  %v661_v51 = vadd.f32 %v1520_v48, %v1722_v34  ;;  %v1449_v53 = vpack.c.bf16 %v866_v46, %v866_v46 }
 0x10a   : > { %1182 = vst.msk [vmem:[%s1732_s27 + $0xd4] sm:$0xf] %vm1128_vm1, %v1444_v45  ;;  %v864_v54 = vmax.f32 %v778_v47, 0.0  ;;  %v789_v55 = vadd.f32 %v1552_v52, %v1722_v34  ;;  %v652_v56 = vpop.f32.mrf.mxu0  ;;  %v780_v60 = vpop.f32.mrf.mxu1 }
 0x10b   : > { %1155 = vst.msk [vmem:[%s1732_s27 + $0x68] sm:$0xf] %vm1128_vm1, %v1417_v49  ;;  %v1415_v57 = vpack.c.bf16 %v832_v50, %v832_v50  ;;  %v835_v58 = vmax.f32 %v661_v51, 0.0  ;;  %v653_v59 = vadd.f32 %v1722_v34, %v652_v56  ;;  %1187 = vst.msk [vmem:[%s1732_s27 + $0xe8] sm:$0xf] %vm1128_vm1, %v1449_v53  ;;  %v781_v63 = vadd.f32 %v1722_v34, %v780_v60 }
 0x10c   : > { %v1447_v61 = vpack.c.bf16 %v864_v54, %v864_v54  ;;  %v867_v62 = vmax.f32 %v789_v55, 0.0  ;;  %v1523_v0 = vpop.f32.mrf.mxu0  ;;  %v1555_v4 = vpop.f32.mrf.mxu1 }
 0x10d   : > { %1153 = vst.msk [vmem:[%s1732_s27 + $0x60] sm:$0xf] %vm1128_vm1, %v1415_v57  ;;  %v1418_v1 = vpack.c.bf16 %v835_v58, %v835_v58  ;;  %v833_v2 = vmax.f32 %v653_v59, 0.0  ;;  %v674_v3 = vadd.f32 %v1523_v0, %v1722_v34  ;;  %v865_v6 = vmax.f32 %v781_v63, 0.0 }
 0x10e   : > { %1185 = vst.msk [vmem:[%s1732_s27 + $0xe0] sm:$0xf] %vm1128_vm1, %v1447_v61  ;;  %v1450_v5 = vpack.c.bf16 %v867_v62, %v867_v62  ;;  %v802_v7 = vadd.f32 %v1555_v4, %v1722_v34  ;;  %v665_v8 = vpop.f32.mrf.mxu0  ;;  %v793_v12 = vpop.f32.mrf.mxu1 }
 0x10f   : > { %1156 = vst.msk [vmem:[%s1732_s27 + $0x6c] sm:$0xf] %vm1128_vm1, %v1418_v1  ;;  %v1416_v9 = vpack.c.bf16 %v833_v2, %v833_v2  ;;  %v838_v10 = vmax.f32 %v674_v3, 0.0  ;;  %v666_v11 = vadd.f32 %v1722_v34, %v665_v8  ;;  %v1448_v13 = vpack.c.bf16 %v865_v6, %v865_v6 }
 0x110   : > { %1188 = vst.msk [vmem:[%s1732_s27 + $0xec] sm:$0xf] %vm1128_vm1, %v1450_v5  ;;  %v870_v14 = vmax.f32 %v802_v7, 0.0  ;;  %v794_v15 = vadd.f32 %v1722_v34, %v793_v12  ;;  %v1524_v16 = vpop.f32.mrf.mxu0  ;;  %v1556_v20 = vpop.f32.mrf.mxu1 }
 0x111   : > { %1154 = vst.msk [vmem:[%s1732_s27 + $0x64] sm:$0xf] %vm1128_vm1, %v1416_v9  ;;  %v1421_v17 = vpack.c.bf16 %v838_v10, %v838_v10  ;;  %v836_v18 = vmax.f32 %v666_v11, 0.0  ;;  %v677_v19 = vadd.f32 %v1524_v16, %v1722_v34  ;;  %1186 = vst.msk [vmem:[%s1732_s27 + $0xe4] sm:$0xf] %vm1128_vm1, %v1448_v13  ;;  %v805_v23 = vadd.f32 %v1556_v20, %v1722_v34 }
 0x112   : > { %v1453_v21 = vpack.c.bf16 %v870_v14, %v870_v14  ;;  %v868_v22 = vmax.f32 %v794_v15, 0.0  ;;  %v668_v24 = vpop.f32.mrf.mxu0  ;;  %v796_v28 = vpop.f32.mrf.mxu1 }
 0x113   : > { %1159 = vst.msk [vmem:[%s1732_s27 + $0x78] sm:$0xf] %vm1128_vm1, %v1421_v17  ;;  %v1419_v25 = vpack.c.bf16 %v836_v18, %v836_v18  ;;  %v839_v26 = vmax.f32 %v677_v19, 0.0  ;;  %v669_v27 = vadd.f32 %v1722_v34, %v668_v24  ;;  %v871_v30 = vmax.f32 %v805_v23, 0.0 }
 0x114   : > { %1191 = vst.msk [vmem:[%s1732_s27 + $0xf8] sm:$0xf] %vm1128_vm1, %v1453_v21  ;;  %v1451_v29 = vpack.c.bf16 %v868_v22, %v868_v22  ;;  %v797_v31 = vadd.f32 %v1722_v34, %v796_v28 }
 0x115   : > { %1157 = vst.msk [vmem:[%s1732_s27 + $0x70] sm:$0xf] %vm1128_vm1, %v1419_v25  ;;  %v1422_v32 = vpack.c.bf16 %v839_v26, %v839_v26  ;;  %v837_v33 = vmax.f32 %v669_v27, 0.0  ;;  %v1454_v35 = vpack.c.bf16 %v871_v30, %v871_v30 }
 0x116   : > { %1189 = vst.msk [vmem:[%s1732_s27 + $0xf0] sm:$0xf] %vm1128_vm1, %v1451_v29  ;;  %v869_v36 = vmax.f32 %v797_v31, 0.0 }
 0x117   : > { %1160 = vst.msk [vmem:[%s1732_s27 + $0x7c] sm:$0xf] %vm1128_vm1, %v1422_v32  ;;  %v1420_v37 = vpack.c.bf16 %v837_v33, %v837_v33  ;;  %1192 = vst.msk [vmem:[%s1732_s27 + $0xfc] sm:$0xf] %vm1128_vm1, %v1454_v35 }
 0x118   : > { %v1452_v38 = vpack.c.bf16 %v869_v36, %v869_v36 }
 0x119   : > { %1158 = vst.msk [vmem:[%s1732_s27 + $0x74] sm:$0xf] %vm1128_vm1, %v1420_v37 }
 0x11a   : > { %1190 = vst.msk [vmem:[%s1732_s27 + $0xf4] sm:$0xf] %vm1128_vm1, %v1452_v38 }
 0x11b PF: > { %s13_s12 = sadd.s32 1, %s1609_s12  }
 0x11c   : > { %p10_p4 = scmp.ge.s32.totalorder %s13_s12, 4  }
 0x11e   :  { %12 = sbr.rel (!%p10_p4) target bundleno = 1 (0x1), region = 62 }

// kernel: stfc3net_forward.4
= control target key start
LH: loop header
LB: loop body
LE: loop exit
PB: predicated region body
PF: predicated region fallthrough
CT: control target
= control target key end

     0   :  { %v2970_v0 = vmov 0   ;;  %vm774_vm0 = vcmask 261120   ;;  %vm2217_vm1 = vcmask 257024   ;;  %s4235_s1 = inlined_call_operand.vmem [shape: bf16[288,32], index: 1, kind: input, shape index: {}]   ;;  %s4236_s0 = inlined_call_operand.vmem [shape: bf16[512,288], index: 0, kind: input, shape index: {}]   ;;  %s4237_s2 = inlined_call_operand.vmem [shape: f32[1,32], index: 2, kind: input, shape index: {}]   ;;  %s4238_s3 = inlined_call_operand.vmem [shape: bf16[512,32], index: 3, kind: output, shape index: {}]  }
   0x1   :  { %871 = vmatprep.subr.bf16.mxu0 %v2970_v0  ;;  %2663 = vmatprep.subr.bf16.mxu1 %v2970_v0  ;;  %v2696_v1 = vld [vmem:[%s4235_s1 + $0x38] sm:$0xff]   ;;  %v2697_v2 = vld [vmem:[%s4235_s1 + $0x30] sm:$0xff]   ;;  %v2698_v3 = vld [vmem:[%s4235_s1 + $0x28] sm:$0xff]  }
   0x2   :  { %872 = vmatpush1.bf16.msra.mxu0 %v2696_v1  ;;  %2679 = vmatpush1.bf16.msra.mxu1 %v2696_v1  ;;  %v2699_v4 = vld [vmem:[%s4235_s1 + $0x20] sm:$0xff]   ;;  %v2700_v5 = vld [vmem:[%s4235_s1 + $0x18] sm:$0xff]   ;;  %v2701_v7 = vld [vmem:[%s4235_s1 + $0x10] sm:$0xff]  }
   0x3   :  { %873 = vmatprep.subr.bf16.mxu0 %v2970_v0  ;;  %2664 = vmatprep.subr.bf16.mxu1 %v2970_v0  ;;  %v2714_v6 = vld [vmem:[%s4236_s0 + $0x4] ss:$12 sps:$4 sm:$0xff]   ;;  %v2702_v9 = vld [vmem:[%s4235_s1 + $0x8] sm:$0xff]   ;;  %v2704_v11 = vld [vmem:[%s4235_s1 + $0x78] sm:$0xff]  }
   0x4   :  { %v2717_v8 = vld [vmem:[%s4236_s0 + $0x244] ss:$12 sps:$4 sm:$0xff]   ;;  %903 = vmatprep.mubr.bf16.mxu0 %v2714_v6  ;;  %v2706_v13 = vld [vmem:[%s4235_s1 + $0x68] sm:$0xff]   ;;  %v2708_v15 = vld [vmem:[%s4235_s1 + $0x58] sm:$0xff]  }
   0x5   :  { %1095 = vmatprep.mubr.bf16.mxu1 %v2717_v8  ;;  %v2703_v10 = vld [vmem:[%s4235_s1] sm:$0xff]   ;;  %v2705_v12 = vld [vmem:[%s4235_s1 + $0x70] sm:$0xff]   ;;  %v2710_v17 = vld [vmem:[%s4235_s1 + $0x48] sm:$0xff]  }
   0x6   :  { %874 = vmatpush1.bf16.msra.mxu0 %v2697_v2  ;;  %2680 = vmatpush1.bf16.msra.mxu1 %v2697_v2  ;;  %v2707_v14 = vld [vmem:[%s4235_s1 + $0x60] sm:$0xff]   ;;  %v2709_v16 = vld [vmem:[%s4235_s1 + $0x50] sm:$0xff]   ;;  %v2718_v19 = vld [vmem:[%s4235_s1 + $0x88] sm:$0xff]  }
   0x7   :  { %875 = vmatprep.subr.bf16.mxu0 %v2970_v0  ;;  %2665 = vmatprep.subr.bf16.mxu1 %v2970_v0  ;;  %v2711_v18 = vld [vmem:[%s4235_s1 + $0x40] sm:$0xff]   ;;  %v2719_v22 = vld [vmem:[%s4236_s0 + $0x1c] ss:$12 sps:$4 sm:$0xff]   ;;  %v2731_v31 = vld [vmem:[%s4236_s0 + $0x4c] ss:$12 sps:$4 sm:$0xff]  }
   0x8   :  { %v2712_v20 = vld [vmem:[%s4236_s0] ss:$12 sps:$4 sm:$0xff]   ;;  %v2721_v23 = vld [vmem:[%s4236_s0 + $0x25c] ss:$12 sps:$4 sm:$0xff]   ;;  %v2723_v25 = vld [vmem:[%s4236_s0 + $0x18] ss:$12 sps:$4 sm:$0xff]  }
   0x9   :  { %v2715_v21 = vld [vmem:[%s4236_s0 + $0x240] ss:$12 sps:$4 sm:$0xff]   ;;  %v2724_v26 = vld [vmem:[%s4236_s0 + $0x258] ss:$12 sps:$4 sm:$0xff]   ;;  %v2729_v29 = vld [vmem:[%s4236_s0 + $0x30] ss:$12 sps:$4 sm:$0xff]  }
   0xa   :  { %876 = vmatpush1.bf16.msra.mxu0 %v2698_v3  ;;  %2681 = vmatpush1.bf16.msra.mxu1 %v2698_v3  ;;  %v2743_v24 = vld [vmem:[%s4235_s1 + $0x80] sm:$0xff]   ;;  %v2730_v30 = vld [vmem:[%s4236_s0 + $0x270] ss:$12 sps:$4 sm:$0xff]   ;;  %v2733_v32 = vld [vmem:[%s4236_s0 + $0x28c] ss:$12 sps:$4 sm:$0xff]  }
   0xb   :  { %877 = vmatprep.subr.bf16.mxu0 %v2970_v0  ;;  %2666 = vmatprep.subr.bf16.mxu1 %v2970_v0  ;;  %v2725_v27 = vld [vmem:[%s4236_s0 + $0x34] ss:$12 sps:$4 sm:$0xff]   ;;  %v2737_v35 = vld [vmem:[%s4236_s0 + $0x64] ss:$12 sps:$4 sm:$0xff]   ;;  %v2744_v39 = vld [vmem:[%s4236_s0 + $0x7c] ss:$12 sps:$4 sm:$0xff]  }
   0xc   :  { %v2727_v28 = vld [vmem:[%s4236_s0 + $0x274] ss:$12 sps:$4 sm:$0xff]   ;;  %v2739_v36 = vld [vmem:[%s4236_s0 + $0x2a4] ss:$12 sps:$4 sm:$0xff]   ;;  %v2746_v40 = vld [vmem:[%s4236_s0 + $0x2bc] ss:$12 sps:$4 sm:$0xff]  }
   0xd   :  { %v2735_v33 = vld [vmem:[%s4236_s0 + $0x48] ss:$12 sps:$4 sm:$0xff]   ;;  %v2741_v37 = vld [vmem:[%s4236_s0 + $0x60] ss:$12 sps:$4 sm:$0xff]   ;;  %v2748_v41 = vld [vmem:[%s4236_s0 + $0x78] ss:$12 sps:$4 sm:$0xff]  }
   0xe   :  { %878 = vmatpush1.bf16.msra.mxu0 %v2699_v4  ;;  %2682 = vmatpush1.bf16.msra.mxu1 %v2699_v4  ;;  %v2736_v34 = vld [vmem:[%s4236_s0 + $0x288] ss:$12 sps:$4 sm:$0xff]   ;;  %v2742_v38 = vld [vmem:[%s4236_s0 + $0x2a0] ss:$12 sps:$4 sm:$0xff]   ;;  %v2749_v42 = vld [vmem:[%s4236_s0 + $0x2b8] ss:$12 sps:$4 sm:$0xff]  }
   0xf   :  { %879 = vmatprep.subr.bf16.mxu0 %v2970_v0  ;;  %2667 = vmatprep.subr.bf16.mxu1 %v2970_v0  ;;  %v2750_v43 = vld [vmem:[%s4236_s0 + $0x94] ss:$12 sps:$4 sm:$0xff]   ;;  %v2754_v45 = vld [vmem:[%s4236_s0 + $0x90] ss:$12 sps:$4 sm:$0xff]   ;;  %v2756_v47 = vld [vmem:[%s4236_s0 + $0xac] ss:$12 sps:$4 sm:$0xff]  }
  0x10   :  { %v2752_v44 = vld [vmem:[%s4236_s0 + $0x2d4] ss:$12 sps:$4 sm:$0xff]   ;;  %v2755_v46 = vld [vmem:[%s4236_s0 + $0x2d0] ss:$12 sps:$4 sm:$0xff]   ;;  %v2758_v48 = vld [vmem:[%s4236_s0 + $0x2ec] ss:$12 sps:$4 sm:$0xff]  }
  0x11   :  { %v2760_v49 = vld [vmem:[%s4236_s0 + $0xa8] ss:$12 sps:$4 sm:$0xff]   ;;  %v2762_v51 = vld [vmem:[%s4236_s0 + $0xc4] ss:$12 sps:$4 sm:$0xff]   ;;  %v2765_v53 = vld [vmem:[%s4236_s0 + $0xc0] ss:$12 sps:$4 sm:$0xff]  }
  0x12   :  { %880 = vmatpush1.bf16.msra.mxu0 %v2700_v5  ;;  %2683 = vmatpush1.bf16.msra.mxu1 %v2700_v5  ;;  %v2761_v50 = vld [vmem:[%s4236_s0 + $0x2e8] ss:$12 sps:$4 sm:$0xff]   ;;  %v2766_v54 = vld [vmem:[%s4236_s0 + $0x20] ss:$12 sps:$4 sm:$0xff]   ;;  %v2769_v56 = vld [vmem:[%s4236_s0 + $0x38] ss:$12 sps:$4 sm:$0xff]  }
  0x13   :  { %881 = vmatprep.subr.bf16.mxu0 %v2970_v0  ;;  %2668 = vmatprep.subr.bf16.mxu1 %v2970_v0  ;;  %v2764_v52 = vld [vmem:[%s4236_s0 + $0x8] ss:$12 sps:$4 sm:$0xff]   ;;  %v2770_v57 = vld [vmem:[%s4236_s0 + $0xd8] ss:$12 sps:$4 sm:$0xff]   ;;  %v2771_v58 = vld [vmem:[%s4236_s0 + $0x50] ss:$12 sps:$4 sm:$0xff]  }
  0x14   :  { %v2767_v55 = vld [vmem:[%s4236_s0 + $0xdc] ss:$12 sps:$4 sm:$0xff]   ;;  %v2772_v59 = vld [vmem:[%s4236_s0 + $0xf4] ss:$12 sps:$4 sm:$0xff]   ;;  %v2777_v63 = vld [vmem:[%s4236_s0 + $0x10c] ss:$12 sps:$4 sm:$0xff]  }
  0x15   :  { %v2774_v60 = vld [vmem:[%s4236_s0 + $0x68] ss:$12 sps:$4 sm:$0xff]   ;;  %v2775_v61 = vld [vmem:[%s4236_s0 + $0xf0] ss:$12 sps:$4 sm:$0xff]   ;;  %v2776_v62 = vld [vmem:[%s4236_s0 + $0x80] ss:$12 sps:$4 sm:$0xff]  }
  0x16   :  { %882 = vmatpush1.bf16.msra.mxu0 %v2701_v7  ;;  %2684 = vmatpush1.bf16.msra.mxu1 %v2701_v7  ;;  %v2780_v1 = vld [vmem:[%s4236_s0 + $0x108] ss:$12 sps:$4 sm:$0xff]   ;;  %v2781_v2 = vld [vmem:[%s4236_s0 + $0xb0] ss:$12 sps:$4 sm:$0xff]   ;;  %v2785_v5 = vld [vmem:[%s4236_s0 + $0x120] ss:$12 sps:$4 sm:$0xff]  }
  0x17   :  { %883 = vmatprep.subr.bf16.mxu0 %v2970_v0  ;;  %2669 = vmatprep.subr.bf16.mxu1 %v2970_v0  ;;  %v2782_v3 = vld [vmem:[%s4236_s0 + $0x124] ss:$12 sps:$4 sm:$0xff]   ;;  %v2784_v4 = vld [vmem:[%s4236_s0 + $0xc8] ss:$12 sps:$4 sm:$0xff]   ;;  %v2786_v6 = vld [vmem:[%s4236_s0 + $0xe0] ss:$12 sps:$4 sm:$0xff]  }
  0x18   :  { %v2787_v7 = vld [vmem:[%s4236_s0 + $0x13c] ss:$12 sps:$4 sm:$0xff]   ;;  %v2789_v8 = vld [vmem:[%s4236_s0 + $0xf8] ss:$12 sps:$4 sm:$0xff]  }
  0x1a   :  { %884 = vmatpush1.bf16.msra.mxu0 %v2702_v9  ;;  %2685 = vmatpush1.bf16.msra.mxu1 %v2702_v9  ;;  %v2790_v9 = vld [vmem:[%s4236_s0 + $0x138] ss:$12 sps:$4 sm:$0xff]  }
  0x1b   :  { %885 = vmatprep.subr.bf16.mxu0 %v2970_v0  ;;  %2670 = vmatprep.subr.bf16.mxu1 %v2970_v0 }
  0x1e   :  { %886 = vmatpush1.bf16.msra.mxu0 %v2703_v10  ;;  %2686 = vmatpush1.bf16.msra.mxu1 %v2703_v10  ;;  %v2791_v10 = vld [vmem:[%s4236_s0 + $0x110] ss:$12 sps:$4 sm:$0xff]  }
  0x1f   :  { %887 = vmatprep.subr.bf16.mxu0 %v2970_v0  ;;  %2671 = vmatprep.subr.bf16.mxu1 %v2970_v0 }
  0x22   :  { %888 = vmatpush2.bf16.msra.mxu0 %v2704_v11  ;;  %2687 = vmatpush2.bf16.msra.mxu1 %v2704_v11  ;;  %v2792_v11 = vld [vmem:[%s4236_s0 + $0x154] ss:$12 sps:$4 sm:$0xff]  }
  0x23   :  { %889 = vmatprep.subr.bf16.mxu0 %v2970_v0  ;;  %2672 = vmatprep.subr.bf16.mxu1 %v2970_v0 }
  0x26   :  { %890 = vmatpush2.bf16.msra.mxu0 %v2705_v12  ;;  %2688 = vmatpush2.bf16.msra.mxu1 %v2705_v12  ;;  %v2794_v12 = vld [vmem:[%s4236_s0 + $0x128] ss:$12 sps:$4 sm:$0xff]  }
  0x27   :  { %891 = vmatprep.subr.bf16.mxu0 %v2970_v0  ;;  %2673 = vmatprep.subr.bf16.mxu1 %v2970_v0 }
  0x2a   :  { %892 = vmatpush2.bf16.msra.mxu0 %v2706_v13  ;;  %2689 = vmatpush2.bf16.msra.mxu1 %v2706_v13  ;;  %v2795_v13 = vld [vmem:[%s4236_s0 + $0x150] ss:$12 sps:$4 sm:$0xff]  }
  0x2b   :  { %893 = vmatprep.subr.bf16.mxu0 %v2970_v0  ;;  %2674 = vmatprep.subr.bf16.mxu1 %v2970_v0 }
  0x2e   :  { %894 = vmatpush2.bf16.msra.mxu0 %v2707_v14  ;;  %2690 = vmatpush2.bf16.msra.mxu1 %v2707_v14  ;;  %v2796_v14 = vld [vmem:[%s4236_s0 + $0x140] ss:$12 sps:$4 sm:$0xff]  }
  0x2f   :  { %895 = vmatprep.subr.bf16.mxu0 %v2970_v0  ;;  %2675 = vmatprep.subr.bf16.mxu1 %v2970_v0 }
  0x32   :  { %896 = vmatpush2.bf16.msra.mxu0 %v2708_v15  ;;  %2691 = vmatpush2.bf16.msra.mxu1 %v2708_v15  ;;  %v2797_v15 = vld [vmem:[%s4236_s0 + $0x16c] ss:$12 sps:$4 sm:$0xff]  }
  0x33   :  { %897 = vmatprep.subr.bf16.mxu0 %v2970_v0  ;;  %2676 = vmatprep.subr.bf16.mxu1 %v2970_v0 }
  0x36   :  { %898 = vmatpush2.bf16.msra.mxu0 %v2709_v16  ;;  %2692 = vmatpush2.bf16.msra.mxu1 %v2709_v16  ;;  %v2799_v16 = vld [vmem:[%s4236_s0 + $0x158] ss:$12 sps:$4 sm:$0xff]  }
  0x37   :  { %899 = vmatprep.subr.bf16.mxu0 %v2970_v0  ;;  %2677 = vmatprep.subr.bf16.mxu1 %v2970_v0 }
  0x3a   :  { %900 = vmatpush2.bf16.msra.mxu0 %v2710_v17  ;;  %2693 = vmatpush2.bf16.msra.mxu1 %v2710_v17  ;;  %v2800_v17 = vld [vmem:[%s4236_s0 + $0x168] ss:$12 sps:$4 sm:$0xff]  }
  0x3b   :  { %901 = vmatprep.subr.bf16.mxu0 %v2970_v0  ;;  %2678 = vmatprep.subr.bf16.mxu1 %v2970_v0  ;;  %v2779_v0 = vld [vmem:[%s4236_s0 + $0x98] ss:$12 sps:$4 sm:$0xff]  }
  0x3e   :  { %902 = vmatpush2.bf16.msra.mxu0 %v2711_v18  ;;  %2694 = vmatpush2.bf16.msra.mxu1 %v2711_v18  ;;  %v2801_v18 = vld [vmem:[%s4236_s0 + $0x170] ss:$12 sps:$4 sm:$0xff]  }
  0x3f   :  { %2595 = vmatprep.subr.bf16.mxu1 %v2718_v19 }
  0x41   :  { %904 = vmatmul.mubr.bf16.vlgmr.msra.gmra.mxu0 %v2712_v20  ;;  %1096 = vmatmul.mubr.bf16.vlgmr.msra.gmra.mxu1 %v2715_v21  ;;  %v2804_v20 = vld [vmem:[%s4236_s0 + $0x188] ss:$12 sps:$4 sm:$0xff]   ;;  %v2805_v21 = vld [vmem:[%s4236_s0 + $0x180] ss:$12 sps:$4 sm:$0xff]  }
  0x42   :  { %2596 = vmatpush3.bf16.msra.mxu1 %v2718_v19  ;;  %911 = vmatprep.mubr.bf16.mxu0 %v2719_v22  ;;  %v2802_v19 = vld [vmem:[%s4236_s0 + $0x184] ss:$12 sps:$4 sm:$0xff]   ;;  %v2806_v22 = vld [vmem:[%s4236_s0 + $0x1a0] ss:$12 sps:$4 sm:$0xff]  }
  0x43   :  { %1103 = vmatprep.mubr.bf16.mxu1 %v2721_v23  ;;  %2597 = vmatprep.subr.bf16.mxu1 %v2743_v24  ;;  %v2807_v23 = vld [vmem:[%s4236_s0 + $0x19c] ss:$12 sps:$4 sm:$0xff]  }
  0x46   :  { %2598 = vmatpush3.bf16.msra.mxu1 %v2743_v24  ;;  %v2809_v24 = vld [vmem:[%s4236_s0 + $0x1b8] ss:$12 sps:$4 sm:$0xff]  }
  0x49   :  { %912 = vmatmul.mubr.bf16.gmra.mxu0 %v2723_v25  ;;  %1104 = vmatmul.mubr.bf16.gmra.mxu1 %v2724_v26  ;;  %v2810_v25 = vld [vmem:[%s4236_s0 + $0x198] ss:$12 sps:$4 sm:$0xff]   ;;  %v2811_v26 = vld [vmem:[%s4236_s0 + $0x1d0] ss:$12 sps:$4 sm:$0xff]  }
  0x4a   :  { %919 = vmatprep.mubr.bf16.mxu0 %v2725_v27  ;;  %1111 = vmatprep.mubr.bf16.mxu1 %v2727_v28  ;;  %v2812_v27 = vld [vmem:[%s4236_s0 + $0x1b4] ss:$12 sps:$4 sm:$0xff]  }
  0x4b   :  { %v2814_v28 = vld [vmem:[%s4236_s0 + $0x1e8] ss:$12 sps:$4 sm:$0xff]  }
  0x51   :  { %920 = vmatmul.mubr.bf16.gmra.mxu0 %v2729_v29  ;;  %1112 = vmatmul.mubr.bf16.gmra.mxu1 %v2730_v30  ;;  %v2815_v29 = vld [vmem:[%s4236_s0 + $0x1b0] ss:$12 sps:$4 sm:$0xff]   ;;  %v2816_v30 = vld [vmem:[%s4236_s0 + $0x200] ss:$12 sps:$4 sm:$0xff]  }
  0x52   :  { %927 = vmatprep.mubr.bf16.mxu0 %v2731_v31  ;;  %1119 = vmatprep.mubr.bf16.mxu1 %v2733_v32  ;;  %v2817_v31 = vld [vmem:[%s4236_s0 + $0x1cc] ss:$12 sps:$4 sm:$0xff]  }
  0x53   :  { %v2819_v32 = vld [vmem:[%s4236_s0 + $0x218] ss:$12 sps:$4 sm:$0xff]  }
  0x59   :  { %928 = vmatmul.mubr.bf16.gmra.mxu0 %v2735_v33  ;;  %1120 = vmatmul.mubr.bf16.gmra.mxu1 %v2736_v34  ;;  %v2820_v33 = vld [vmem:[%s4236_s0 + $0x1c8] ss:$12 sps:$4 sm:$0xff]   ;;  %v2821_v34 = vld [vmem:[%s4236_s0 + $0x230] ss:$12 sps:$4 sm:$0xff]  }
  0x5a   :  { %935 = vmatprep.mubr.bf16.mxu0 %v2737_v35  ;;  %1127 = vmatprep.mubr.bf16.mxu1 %v2739_v36  ;;  %v2822_v35 = vld [vmem:[%s4236_s0 + $0x1e4] ss:$12 sps:$4 sm:$0xff]   ;;  %v2824_v36 = vld [vmem:[%s4236_s0 + $0x248] ss:$12 sps:$4 sm:$0xff]  }
  0x61   :  { %936 = vmatmul.mubr.bf16.gmra.mxu0 %v2741_v37  ;;  %1128 = vmatmul.mubr.bf16.gmra.mxu1 %v2742_v38  ;;  %v2825_v37 = vld [vmem:[%s4236_s0 + $0x1e0] ss:$12 sps:$4 sm:$0xff]  }
  0x62   :  { %943 = vmatprep.mubr.bf16.mxu0 %v2744_v39  ;;  %1135 = vmatprep.mubr.bf16.mxu1 %v2746_v40  ;;  %v2826_v38 = vld [vmem:[%s4236_s0 + $0x260] ss:$12 sps:$4 sm:$0xff]   ;;  %v2827_v39 = vld [vmem:[%s4236_s0 + $0x1fc] ss:$12 sps:$4 sm:$0xff]   ;;  %v2829_v40 = vld [vmem:[%s4236_s0 + $0x278] ss:$12 sps:$4 sm:$0xff]  }
  0x69   :  { %944 = vmatmul.mubr.bf16.gmra.mxu0 %v2748_v41  ;;  %1136 = vmatmul.mubr.bf16.gmra.mxu1 %v2749_v42  ;;  %v2830_v41 = vld [vmem:[%s4236_s0 + $0x1f8] ss:$12 sps:$4 sm:$0xff]   ;;  %v2831_v42 = vld [vmem:[%s4236_s0 + $0x290] ss:$12 sps:$4 sm:$0xff]  }
  0x6a   :  { %951 = vmatprep.mubr.bf16.mxu0 %v2750_v43  ;;  %1143 = vmatprep.mubr.bf16.mxu1 %v2752_v44  ;;  %v2832_v43 = vld [vmem:[%s4236_s0 + $0x214] ss:$12 sps:$4 sm:$0xff]  }
  0x6b   :  { %v2834_v44 = vld [vmem:[%s4236_s0 + $0x2a8] ss:$12 sps:$4 sm:$0xff]  }
  0x71   :  { %952 = vmatmul.mubr.bf16.gmra.mxu0 %v2754_v45  ;;  %1144 = vmatmul.mubr.bf16.gmra.mxu1 %v2755_v46  ;;  %v2835_v45 = vld [vmem:[%s4236_s0 + $0x210] ss:$12 sps:$4 sm:$0xff]   ;;  %v2836_v46 = vld [vmem:[%s4236_s0 + $0x2c0] ss:$12 sps:$4 sm:$0xff]  }
  0x72   :  { %959 = vmatprep.mubr.bf16.mxu0 %v2756_v47  ;;  %1151 = vmatprep.mubr.bf16.mxu1 %v2758_v48  ;;  %v2837_v47 = vld [vmem:[%s4236_s0 + $0x22c] ss:$12 sps:$4 sm:$0xff]  }
  0x73   :  { %v2839_v48 = vld [vmem:[%s4236_s0 + $0x2d8] ss:$12 sps:$4 sm:$0xff]  }
  0x79   :  { %960 = vmatmul.mubr.bf16.gmra.mxu0 %v2760_v49  ;;  %1152 = vmatmul.mubr.bf16.gmra.mxu1 %v2761_v50  ;;  %v2840_v49 = vld [vmem:[%s4236_s0 + $0x228] ss:$12 sps:$4 sm:$0xff]   ;;  %v2841_v50 = vld [vmem:[%s4236_s0 + $0x2f0] ss:$12 sps:$4 sm:$0xff]  }
  0x7a   :  { %967 = vmatprep.mubr.bf16.mxu0 %v2762_v51  ;;  %2599 = vmatprep.mubr.msk.bf16.mxu1 %vm774_vm0, %v2764_v52 }
  0x81   :  { %968 = vmatmul.mubr.bf16.gmra.mxu0 %v2765_v53  ;;  %2600 = vmatmul.mubr.msk.bf16.vlgmr.msra.gmra.mxu1 %vm774_vm0, %v2766_v54 }
  0x82   :  { %975 = vmatprep.mubr.bf16.mxu0 %v2767_v55  ;;  %2603 = vmatprep.mubr.msk.bf16.mxu1 %vm774_vm0, %v2769_v56 }
  0x89   :  { %976 = vmatmul.mubr.bf16.gmra.mxu0 %v2770_v57  ;;  %2604 = vmatmul.mubr.msk.bf16.gmra.mxu1 %vm774_vm0, %v2771_v58 }
  0x8a   :  { %983 = vmatprep.mubr.bf16.mxu0 %v2772_v59  ;;  %2607 = vmatprep.mubr.msk.bf16.mxu1 %vm774_vm0, %v2774_v60 }
  0x91   :  { %984 = vmatmul.mubr.bf16.gmra.mxu0 %v2775_v61  ;;  %2608 = vmatmul.mubr.msk.bf16.gmra.mxu1 %vm774_vm0, %v2776_v62 }
  0x92   :  { %991 = vmatprep.mubr.bf16.mxu0 %v2777_v63  ;;  %2611 = vmatprep.mubr.msk.bf16.mxu1 %vm774_vm0, %v2779_v0 }
  0x99   :  { %992 = vmatmul.mubr.bf16.gmra.mxu0 %v2780_v1  ;;  %2612 = vmatmul.mubr.msk.bf16.gmra.mxu1 %vm774_vm0, %v2781_v2 }
  0x9a   :  { %999 = vmatprep.mubr.bf16.mxu0 %v2782_v3  ;;  %2615 = vmatprep.mubr.msk.bf16.mxu1 %vm774_vm0, %v2784_v4 }
  0xa1   :  { %1000 = vmatmul.mubr.bf16.gmra.mxu0 %v2785_v5  ;;  %2616 = vmatmul.mubr.msk.bf16.gmra.mxu1 %vm774_vm0, %v2786_v6 }
  0xa2   :  { %1007 = vmatprep.mubr.bf16.mxu0 %v2787_v7  ;;  %2619 = vmatprep.mubr.msk.bf16.mxu1 %vm774_vm0, %v2789_v8 }
  0xa9   :  { %1008 = vmatmul.mubr.bf16.gmra.mxu0 %v2790_v9  ;;  %2620 = vmatmul.mubr.msk.bf16.gmra.mxu1 %vm774_vm0, %v2791_v10 }
  0xaa   :  { %1015 = vmatprep.mubr.bf16.mxu0 %v2792_v11  ;;  %2623 = vmatprep.mubr.msk.bf16.mxu1 %vm774_vm0, %v2794_v12 }
  0xb1   :  { %1016 = vmatmul.mubr.bf16.gmra.mxu0 %v2795_v13  ;;  %2624 = vmatmul.mubr.msk.bf16.gmra.mxu1 %vm774_vm0, %v2796_v14 }
  0xb2   :  { %1023 = vmatprep.mubr.bf16.mxu0 %v2797_v15  ;;  %2627 = vmatprep.mubr.msk.bf16.mxu1 %vm774_vm0, %v2799_v16 }
  0xb9   :  { %1024 = vmatmul.mubr.bf16.gmra.mxu0 %v2800_v17  ;;  %2628 = vmatmul.mubr.msk.bf16.gmra.mxu1 %vm774_vm0, %v2801_v18 }
  0xba   :  { %1031 = vmatprep.mubr.bf16.mxu0 %v2802_v19  ;;  %2631 = vmatprep.mubr.msk.bf16.mxu1 %vm774_vm0, %v2804_v20 }
  0xc1   :  { %1032 = vmatmul.mubr.bf16.gmra.mxu0 %v2805_v21  ;;  %2632 = vmatmul.mubr.msk.bf16.gmra.mxu1 %vm774_vm0, %v2806_v22 }
  0xc2   :  { %1039 = vmatprep.mubr.bf16.mxu0 %v2807_v23  ;;  %2635 = vmatprep.mubr.msk.bf16.mxu1 %vm774_vm0, %v2809_v24 }
  0xc9   :  { %1040 = vmatmul.mubr.bf16.gmra.mxu0 %v2810_v25  ;;  %2636 = vmatmul.mubr.msk.bf16.gmra.mxu1 %vm774_vm0, %v2811_v26 }
  0xca   :  { %1047 = vmatprep.mubr.bf16.mxu0 %v2812_v27  ;;  %2639 = vmatprep.mubr.msk.bf16.mxu1 %vm774_vm0, %v2814_v28 }
  0xd1   :  { %1048 = vmatmul.mubr.bf16.gmra.mxu0 %v2815_v29  ;;  %2640 = vmatmul.mubr.msk.bf16.gmra.mxu1 %vm774_vm0, %v2816_v30 }
  0xd2   :  { %1055 = vmatprep.mubr.bf16.mxu0 %v2817_v31  ;;  %2643 = vmatprep.mubr.msk.bf16.mxu1 %vm774_vm0, %v2819_v32 }
  0xd9   :  { %1056 = vmatmul.mubr.bf16.gmra.mxu0 %v2820_v33  ;;  %2644 = vmatmul.mubr.msk.bf16.gmra.mxu1 %vm774_vm0, %v2821_v34 }
  0xda   :  { %1063 = vmatprep.mubr.bf16.mxu0 %v2822_v35  ;;  %2647 = vmatprep.mubr.msk.bf16.mxu1 %vm774_vm0, %v2824_v36 }
  0xe1   :  { %1064 = vmatmul.mubr.bf16.gmra.mxu0 %v2825_v37  ;;  %2648 = vmatmul.mubr.msk.bf16.gmra.mxu1 %vm774_vm0, %v2826_v38 }
  0xe2   :  { %1071 = vmatprep.mubr.bf16.mxu0 %v2827_v39  ;;  %2651 = vmatprep.mubr.msk.bf16.mxu1 %vm774_vm0, %v2829_v40 }
  0xe9   :  { %1072 = vmatmul.mubr.bf16.gmra.mxu0 %v2830_v41  ;;  %2652 = vmatmul.mubr.msk.bf16.gmra.mxu1 %vm774_vm0, %v2831_v42 }
  0xea   :  { %1079 = vmatprep.mubr.bf16.mxu0 %v2832_v43  ;;  %2655 = vmatprep.mubr.msk.bf16.mxu1 %vm774_vm0, %v2834_v44 }
  0xf1   :  { %1080 = vmatmul.mubr.bf16.gmra.mxu0 %v2835_v45  ;;  %2656 = vmatmul.mubr.msk.bf16.gmra.mxu1 %vm774_vm0, %v2836_v46 }
  0xf2   :  { %1087 = vmatprep.mubr.bf16.mxu0 %v2837_v47  ;;  %2659 = vmatprep.mubr.msk.bf16.mxu1 %vm774_vm0, %v2839_v48 }
  0xf9   :  { %1088 = vmatmul.mubr.bf16.gmra.mxu0 %v2840_v49  ;;  %2660 = vmatmul.mubr.msk.bf16.gmra.mxu1 %vm774_vm0, %v2841_v50  ;;  %v3458_v49 = vld [vmem:[%s4237_s2] ss:$0 sm:$0xff] }
 0x101   :  { %v3397_v51 = vpop.f32.mrf.mxu0  ;;  %v3399_v52 = vpop.f32.mrf.mxu1 }
 0x103   :  { %v907_v53 = vpop.f32.mrf.mxu0  ;;  %v1099_v54 = vpop.f32.mrf.mxu1 }
 0x105   :  { %v3401_v55 = vpop.f32.mrf.mxu0  ;;  %v3403_v56 = vpop.f32.mrf.mxu1 }
 0x107   :  { %v910_v57 = vpop.f32.mrf.mxu0  ;;  %v1102_v58 = vpop.f32.mrf.mxu1 }
 0x109   :  { %v913_v59 = vpop.f32.mrf.mxu0  ;;  %v3405_v60 = vpop.f32.mrf.mxu1 }
 0x10a   :  { %v914_v54 = vadd.f32 %v3458_v49, %v913_v59  ;;  %v909_v59 = vadd.f32 %v3458_v49, %v3401_v55 }
 0x10b   :  { %v915_v61 = vpop.f32.mrf.mxu0  ;;  %v1107_v62 = vpop.f32.mrf.mxu1 }
 0x10c   :  { %v906_v61 = vadd.f32 %v3458_v49, %v3397_v51 }
 0x10d   :  { %v916_v63 = vpop.f32.mrf.mxu0  ;;  %v3407_v0 = vpop.f32.mrf.mxu1 }
 0x10f   :  { %v918_v1 = vpop.f32.mrf.mxu0  ;;  %v1110_v2 = vpop.f32.mrf.mxu1 }
 0x111   :  { %v3409_v3 = vpop.f32.mrf.mxu0  ;;  %v3411_v4 = vpop.f32.mrf.mxu1 }
 0x113   :  { %v923_v5 = vpop.f32.mrf.mxu0  ;;  %v1115_v6 = vpop.f32.mrf.mxu1 }
 0x114   :  { %v917_v5 = vadd.f32 %v3458_v49, %v916_v63 }
 0x115   :  { %v3413_v7 = vpop.f32.mrf.mxu0  ;;  %v3415_v8 = vpop.f32.mrf.mxu1 }
 0x117   :  { %v926_v9 = vpop.f32.mrf.mxu0  ;;  %v1118_v10 = vpop.f32.mrf.mxu1 }
 0x119   :  { %v929_v11 = vpop.f32.mrf.mxu0  ;;  %v3417_v12 = vpop.f32.mrf.mxu1 }
 0x11b   :  { %v931_v13 = vpop.f32.mrf.mxu0  ;;  %v1123_v14 = vpop.f32.mrf.mxu1 }
 0x11d   :  { %v3419_v15 = vpop.f32.mrf.mxu0  ;;  %v3421_v16 = vpop.f32.mrf.mxu1 }
 0x11f   :  { %v934_v17 = vpop.f32.mrf.mxu0  ;;  %v1126_v18 = vpop.f32.mrf.mxu1 }
 0x120   :  { %v930_v18 = vadd.f32 %v3458_v49, %v929_v11 }
 0x121   :  { %v3423_v19 = vpop.f32.mrf.mxu0  ;;  %v3425_v20 = vpop.f32.mrf.mxu1 }
 0x123   :  { %v939_v21 = vpop.f32.mrf.mxu0  ;;  %v1131_v22 = vpop.f32.mrf.mxu1 }
 0x125   :  { %v3427_v23 = vpop.f32.mrf.mxu0  ;;  %v3429_v24 = vpop.f32.mrf.mxu1 }
 0x127   :  { %v942_v25 = vpop.f32.mrf.mxu0  ;;  %v1134_v26 = vpop.f32.mrf.mxu1 }
 0x129   :  { %v3431_v27 = vpop.f32.mrf.mxu0  ;;  %v3433_v28 = vpop.f32.mrf.mxu1 }
 0x12b   :  { %v947_v29 = vpop.f32.mrf.mxu0  ;;  %v1139_v30 = vpop.f32.mrf.mxu1 }
 0x12d   :  { %v3435_v31 = vpop.f32.mrf.mxu0  ;;  %v3437_v32 = vpop.f32.mrf.mxu1 }
 0x12f   :  { %v950_v33 = vpop.f32.mrf.mxu0  ;;  %v1142_v34 = vpop.f32.mrf.mxu1 }
 0x130   :  { %v922_v33 = vadd.f32 %v3458_v49, %v3409_v3 }
 0x131   :  { %v3439_v35 = vpop.f32.mrf.mxu0  ;;  %v3441_v36 = vpop.f32.mrf.mxu1 }
 0x133   :  { %v955_v37 = vpop.f32.mrf.mxu0  ;;  %v1147_v38 = vpop.f32.mrf.mxu1 }
 0x135   :  { %v3443_v39 = vpop.f32.mrf.mxu0  ;;  %v3445_v40 = vpop.f32.mrf.mxu1 }
 0x137   :  { %v958_v41 = vpop.f32.mrf.mxu0  ;;  %v1150_v42 = vpop.f32.mrf.mxu1 }
 0x139   :  { %v3447_v43 = vpop.f32.mrf.mxu0  ;;  %v3449_v44 = vpop.f32.mrf.mxu1 }
 0x13b   :  { %v963_v45 = vpop.f32.mrf.mxu0  ;;  %v1155_v46 = vpop.f32.mrf.mxu1 }
 0x13c   :  { %v933_v45 = vadd.f32 %v3458_v49, %v3419_v15 }
 0x13d   :  { %v3451_v47 = vpop.f32.mrf.mxu0  ;;  %v3453_v48 = vpop.f32.mrf.mxu1 }
 0x13f   :  { %v966_v50 = vpop.f32.mrf.mxu0  ;;  %v1158_v53 = vpop.f32.mrf.mxu1 }
 0x141   :  { %v3461_v57 = vpop.f32.mrf.mxu0  ;;  %v2601_v58 = vpop.f32.mrf.mxu1 }
 0x142   :  { %v1203_v62 = vadd.f32 %v2601_v58, %v914_v54 }
 0x143   :  { %v971_v1 = vpop.f32.mrf.mxu0  ;;  %v1194_v2 = vpop.f32.mrf.mxu1 }
 0x144   :  { %v3466_v6 = vmax.f32 %v1203_v62, 0.0  ;;  %v1195_v9 = vadd.f32 %v1194_v2, %v906_v61  ;;  %v925_v61 = vadd.f32 %v3458_v49, %v3413_v7  ;;  %v938_v7 = vadd.f32 %v3458_v49, %v3423_v19 }
 0x145   :  { %v3468_v10 = vpop.f32.mrf.mxu0  ;;  %v2602_v13 = vpop.f32.mrf.mxu1 }
 0x146   :  { %v3472_v14 = vmax.f32 %v1195_v9, 0.0  ;;  %v1206_v17 = vadd.f32 %v2602_v13, %v917_v5  ;;  %v1515_v51 = vmul.f32 %v3466_v6, %v3466_v6  ;;  %v946_v13 = vadd.f32 %v3458_v49, %v3431_v27 }
 0x147   :  { %v974_v21 = vpop.f32.mrf.mxu0  ;;  %v1197_v22 = vpop.f32.mrf.mxu1 }
 0x148   :  { %v3477_v63 = vmax.f32 %v1206_v17, 0.0  ;;  %v1198_v25 = vadd.f32 %v1197_v22, %v909_v59  ;;  %v1583_v26 = vsel %vm774_vm0, %v1515_v51, 0.0  ;;  %v1513_v29 = vmul.f32 %v3472_v14, %v3472_v14 }
 0x149   :  { %v3482_v30 = vpop.f32.mrf.mxu0  ;;  %v2605_v55 = vpop.f32.mrf.mxu1  ;;  %1584 = vadd.xlane.f32.xlu1 %v1583_v26 }
 0x14a   :  { %v3486_v34 = vmax.f32 %v1198_v25, 0.0  ;;  %v1219_v11 = vadd.f32 %v2605_v55, %v930_v18  ;;  %v1577_v37 = vsel %vm774_vm0, %v1513_v29, 0.0  ;;  %v1516_v42 = vmul.f32 %v3477_v63, %v3477_v63 }
 0x14b   :  { %v979_v38 = vpop.f32.mrf.mxu0  ;;  %v1210_v41 = vpop.f32.mrf.mxu1  ;;  %1578 = vadd.xlane.f32.xlu0 %v1577_v37  ;;  %v949_v29 = vadd.f32 %v3458_v49, %v3435_v31 }
 0x14c   :  { %v3493_v46 = vmax.f32 %v1219_v11, 0.0  ;;  %v1211_v50 = vadd.f32 %v1210_v41, %v922_v33  ;;  %v1514_v3 = vmul.f32 %v3486_v34, %v3486_v34  ;;  %v1586_v58 = vsel %vm774_vm0, %v1516_v42, 0.0 }
 0x14d   :  { %v3497_v53 = vpop.f32.mrf.mxu0  ;;  %v2606_v54 = vpop.f32.mrf.mxu1  ;;  %1587 = vadd.xlane.f32.xlu1 %v1586_v58 }
 0x14e   :  { %v3502_v62 = vmax.f32 %v1211_v50, 0.0  ;;  %v1222_v1 = vadd.f32 %v2606_v54, %v933_v45  ;;  %v1580_v15 = vsel %vm774_vm0, %v1514_v3, 0.0  ;;  %v1519_v9 = vmul.f32 %v3493_v46, %v3493_v46 }
 0x14f   :  { %v982_v2 = vpop.f32.mrf.mxu0  ;;  %v1213_v5 = vpop.f32.mrf.mxu1  ;;  %1581 = vadd.xlane.f32.xlu0 %v1580_v15  ;;  %v941_v45 = vadd.f32 %v3458_v49, %v3427_v23  ;;  %v954_v23 = vadd.f32 %v3458_v49, %v3439_v35 }
 0x150   :  { %v3509_v59 = vmax.f32 %v1222_v1, 0.0  ;;  %v1214_v17 = vadd.f32 %v1213_v5, %v925_v61  ;;  %v1517_v21 = vmul.f32 %v3502_v62, %v3502_v62  ;;  %v1595_v26 = vsel %vm774_vm0, %v1519_v9, 0.0 }
 0x151   :  { %v3513_v51 = vpop.f32.mrf.mxu0  ;;  %v2609_v18 = vpop.f32.mrf.mxu1  ;;  %v962_v1 = vadd.f32 %v3458_v49, %v3447_v43 }
 0x152   :  { %v3517_v22 = vmax.f32 %v1214_v17, 0.0  ;;  %v1235_v25 = vadd.f32 %v2609_v18, %v946_v13  ;;  %v1520_v27 = vmul.f32 %v3509_v59, %v3509_v59  ;;  %v1589_v3 = vsel %vm774_vm0, %v1517_v21, 0.0 }
 0x153   :  { %v987_v55 = vpop.f32.mrf.mxu0  ;;  %v1226_v33 = vpop.f32.mrf.mxu1  ;;  %1596 = vadd.xlane.f32.xlu0 %v1595_v26 }
 0x154   :  { %v3524_v19 = vmax.f32 %v1235_v25, 0.0  ;;  %v1227_v11 = vadd.f32 %v1226_v33, %v938_v7  ;;  %v1598_v37 = vsel %vm774_vm0, %v1520_v27, 0.0  ;;  %v1518_v38 = vmul.f32 %v3517_v22, %v3517_v22 }
 0x155   :  { %v3529_v41 = vpop.f32.mrf.mxu0  ;;  %v2610_v42 = vpop.f32.mrf.mxu1  ;;  %1599 = vadd.xlane.f32.xlu1 %v1598_v37  ;;  %v965_v25 = vadd.f32 %v3458_v49, %v3451_v47 }
 0x156   :  { %v3533_v50 = vmax.f32 %v1227_v11, 0.0  ;;  %v1238_v31 = vadd.f32 %v2610_v42, %v949_v29  ;;  %v1523_v61 = vmul.f32 %v3524_v19, %v3524_v19  ;;  %v1592_v5 = vsel %vm774_vm0, %v1518_v38, 0.0 }
 0x157   :  { %v990_v54 = vpop.f32.mrf.mxu0  ;;  %v1229_v58 = vpop.f32.mrf.mxu1  ;;  %1590 = vadd.xlane.f32.xlu0 %v1589_v3  ;;  %v957_v38 = vadd.f32 %v3458_v49, %v3443_v39  ;;  %v970_v39 = vadd.f32 %v3458_v49, %v3461_v57 }
 0x158   :  { %v3540_v15 = vmax.f32 %v1238_v31, 0.0  ;;  %v1230_v2 = vadd.f32 %v1229_v58, %v941_v45  ;;  %v1521_v17 = vmul.f32 %v3533_v50, %v3533_v50  ;;  %v1607_v21 = vsel %vm774_vm0, %v1523_v61, 0.0 }
 0x159   :  { %v993_v9 = vpop.f32.mrf.mxu0  ;;  %v2613_v13 = vpop.f32.mrf.mxu1  ;;  %1593 = vadd.xlane.f32.xlu1 %v1592_v5  ;;  %v978_v58 = vadd.f32 %v3458_v49, %v3482_v30 }
 0x15a   :  { %v3547_v7 = vmax.f32 %v1230_v2, 0.0  ;;  %v1251_v18 = vadd.f32 %v2613_v13, %v962_v1  ;;  %v1524_v43 = vmul.f32 %v3540_v15, %v3540_v15  ;;  %v1601_v45 = vsel %vm774_vm0, %v1521_v17, 0.0 }
 0x15b   :  { %v995_v26 = vpop.f32.mrf.mxu0  ;;  %v1242_v27 = vpop.f32.mrf.mxu1  ;;  %1608 = vadd.xlane.f32.xlu0 %v1607_v21 }
 0x15c   :  { %v3554_v35 = vmax.f32 %v1251_v18, 0.0  ;;  %v1243_v29 = vadd.f32 %v1242_v27, %v954_v23  ;;  %v1610_v55 = vsel %vm774_vm0, %v1524_v43, 0.0  ;;  %v1522_v33 = vmul.f32 %v3547_v7, %v3547_v7 }
 0x15d   :  { %v996_v11 = vpop.f32.mrf.mxu0  ;;  %v2614_v37 = vpop.f32.mrf.mxu1  ;;  %1611 = vadd.xlane.f32.xlu1 %v1610_v55  ;;  %v981_v43 = vadd.f32 %v3458_v49, %v3497_v53 }
 0x15e   :  { %v3561_v42 = vmax.f32 %v1243_v29, 0.0  ;;  %v1254_v47 = vadd.f32 %v2614_v37, %v965_v25  ;;  %v1527_v54 = vmul.f32 %v3554_v35, %v3554_v35  ;;  %v1604_v2 = vsel %vm774_vm0, %v1522_v33, 0.0 }
 0x15f   :  { %v998_v31 = vpop.f32.mrf.mxu0  ;;  %v1245_v3 = vpop.f32.mrf.mxu1  ;;  %1602 = vadd.xlane.f32.xlu0 %v1601_v45 }
 0x160   :  { %v3568_v61 = vmax.f32 %v1254_v47, 0.0  ;;  %v1246_v1 = vadd.f32 %v1245_v3, %v957_v38  ;;  %v1525_v13 = vmul.f32 %v3561_v42, %v3561_v42  ;;  %v1619_v30 = vsel %vm774_vm0, %v1527_v54, 0.0 }
 0x161   :  { %v3573_v5 = vpop.f32.mrf.mxu0  ;;  %v2617_v23 = vpop.f32.mrf.mxu1  ;;  %1605 = vadd.xlane.f32.xlu1 %v1604_v2  ;;  %v973_v38 = vadd.f32 %v3458_v49, %v3468_v10  ;;  %v986_v10 = vadd.f32 %v3458_v49, %v3513_v51 }
 0x162   :  { %v3577_v17 = vmax.f32 %v1246_v1, 0.0  ;;  %v1267_v18 = vadd.f32 %v2617_v23, %v978_v58  ;;  %v1528_v21 = vmul.f32 %v3568_v61, %v3568_v61  ;;  %v1613_v45 = vsel %vm774_vm0, %v1525_v13, 0.0 }
 0x163   :  { %v1003_v25 = vpop.f32.mrf.mxu0  ;;  %v1258_v57 = vpop.f32.mrf.mxu1  ;;  %1620 = vadd.xlane.f32.xlu0 %v1619_v30  ;;  %v994_v58 = vadd.f32 %v3458_v49, %v993_v9 }
 0x164   :  { %v3584_v26 = vmax.f32 %v1267_v18, 0.0  ;;  %v1259_v27 = vadd.f32 %v1258_v57, %v970_v39  ;;  %v1622_v29 = vsel %vm774_vm0, %v1528_v21, 0.0  ;;  %v1526_v55 = vmul.f32 %v3577_v17, %v3577_v17 }
 0x165   :  { %v3589_v33 = vpop.f32.mrf.mxu0  ;;  %v2618_v37 = vpop.f32.mrf.mxu1  ;;  %1623 = vadd.xlane.f32.xlu1 %v1622_v29  ;;  %v997_v25 = vadd.f32 %v3458_v49, %v996_v11 }
 0x166   :  { %v3593_v47 = vmax.f32 %v1259_v27, 0.0  ;;  %v1270_v53 = vadd.f32 %v2618_v37, %v981_v43  ;;  %v1531_v54 = vmul.f32 %v3584_v26, %v3584_v26  ;;  %v1616_v39 = vsel %vm774_vm0, %v1526_v55, 0.0 }
 0x167   :  { %v1006_v31 = vpop.f32.mrf.mxu0  ;;  %v1261_v3 = vpop.f32.mrf.mxu1  ;;  %1614 = vadd.xlane.f32.xlu0 %v1613_v45  ;;  %v989_v45 = vadd.f32 %v3458_v49, %v3529_v41  ;;  %v1002_v41 = vadd.f32 %v3458_v49, %v3573_v5 }
 0x168   :  { %v3599_v1 = vmax.f32 %v1270_v53, 0.0  ;;  %v1262_v2 = vadd.f32 %v1261_v3, %v973_v38  ;;  %v1529_v13 = vmul.f32 %v3593_v47, %v3593_v47  ;;  %v1631_v43 = vsel %vm774_vm0, %v1531_v54, 0.0 }
 0x169   :  { %v1009_v23 = vpop.f32.mrf.mxu0  ;;  %v2621_v18 = vpop.f32.mrf.mxu1  ;;  %1617 = vadd.xlane.f32.xlu1 %v1616_v39 }
 0x16a   :  { %v3606_v30 = vmax.f32 %v1262_v2, 0.0  ;;  %v1283_v21 = vadd.f32 %v2621_v18, %v994_v58  ;;  %v1532_v9 = vmul.f32 %v3599_v1, %v3599_v1  ;;  %v1625_v3 = vsel %vm774_vm0, %v1529_v13, 0.0 }
 0x16b   :  { %v1011_v57 = vpop.f32.mrf.mxu0  ;;  %v1274_v27 = vpop.f32.mrf.mxu1  ;;  %1632 = vadd.xlane.f32.xlu0 %v1631_v43  ;;  %v1010_v39 = vadd.f32 %v3458_v49, %v1009_v23 }
 0x16c   :  { %v3612_v51 = vmax.f32 %v1283_v21, 0.0  ;;  %v1275_v29 = vadd.f32 %v1274_v27, %v986_v10  ;;  %v1634_v55 = vsel %vm774_vm0, %v1532_v9, 0.0  ;;  %v1530_v37 = vmul.f32 %v3606_v30, %v3606_v30 }
 0x16d   :  { %v1012_v38 = vpop.f32.mrf.mxu0  ;;  %v2622_v53 = vpop.f32.mrf.mxu1  ;;  %1635 = vadd.xlane.f32.xlu1 %v1634_v55 }
 0x16e   :  { %v3619_v31 = vmax.f32 %v1275_v29, 0.0  ;;  %v1286_v11 = vadd.f32 %v2622_v53, %v997_v25  ;;  %v1535_v2 = vmul.f32 %v3612_v51, %v3612_v51  ;;  %v1628_v21 = vsel %vm774_vm0, %v1530_v37, 0.0 }
 0x16f   :  { %v1014_v54 = vpop.f32.mrf.mxu0  ;;  %v1277_v58 = vpop.f32.mrf.mxu1  ;;  %1626 = vadd.xlane.f32.xlu0 %v1625_v3  ;;  %v1013_v29 = vadd.f32 %v3458_v49, %v1012_v38 }
 0x170   :  { %v3625_v10 = vmax.f32 %v1286_v11, 0.0  ;;  %v1278_v18 = vadd.f32 %v1277_v58, %v989_v45  ;;  %v1533_v13 = vmul.f32 %v3619_v31, %v3619_v31  ;;  %v1643_v27 = vsel %vm774_vm0, %v1535_v2, 0.0 }
 0x171   :  { %v1017_v43 = vpop.f32.mrf.mxu0  ;;  %v2625_v9 = vpop.f32.mrf.mxu1  ;;  %1629 = vadd.xlane.f32.xlu1 %v1628_v21  ;;  %v1005_v58 = vadd.f32 %v3458_v49, %v3589_v33 }
 0x172   :  { %v3632_v25 = vmax.f32 %v1278_v18, 0.0  ;;  %v1299_v57 = vadd.f32 %v2625_v9, %v1010_v39  ;;  %v1536_v23 = vmul.f32 %v3625_v10, %v3625_v10  ;;  %v1637_v39 = vsel %vm774_vm0, %v1533_v13, 0.0 }
 0x173   :  { %v1019_v55 = vpop.f32.mrf.mxu0  ;;  %v1290_v37 = vpop.f32.mrf.mxu1  ;;  %1644 = vadd.xlane.f32.xlu0 %v1643_v27 }
 0x174   :  { %4260 = vst [vmem:[#allocation2_spill] sm:$0xff] %v3632_v25  ;;  %v3638_v5 = vmax.f32 %v1299_v57, 0.0  ;;  %v1291_v53 = vadd.f32 %v1290_v37, %v1002_v41  ;;  %v1646_v45 = vsel %vm774_vm0, %v1536_v23, 0.0  ;;  %v1534_v11 = vmul.f32 %v3632_v25, %v3632_v25 }
 0x175   :  { %v1020_v3 = vpop.f32.mrf.mxu0  ;;  %v2626_v54 = vpop.f32.mrf.mxu1  ;;  %1647 = vadd.xlane.f32.xlu1 %v1646_v45  ;;  %v1018_v23 = vadd.f32 %v3458_v49, %v1017_v43 }
 0x176   :  { %4261 = vst [vmem:[#allocation3_spill] sm:$0xff] %v3638_v5  ;;  %v3645_v2 = vmax.f32 %v1291_v53, 0.0  ;;  %v1302_v38 = vadd.f32 %v2626_v54, %v1013_v29  ;;  %v1539_v41 = vmul.f32 %v3638_v5, %v3638_v5  ;;  %v1640_v27 = vsel %vm774_vm0, %v1534_v11, 0.0 }
 0x177   :  { %v1022_v18 = vpop.f32.mrf.mxu0  ;;  %v1293_v21 = vpop.f32.mrf.mxu1  ;;  %1638 = vadd.xlane.f32.xlu0 %v1637_v39 }
 0x178   :  { %4262 = vst [vmem:[#allocation4_spill] sm:$0xff] %v3645_v2  ;;  %v3650_v9 = vmax.f32 %v1302_v38, 0.0  ;;  %v1294_v57 = vadd.f32 %v1293_v21, %v1005_v58  ;;  %v1537_v29 = vmul.f32 %v3645_v2, %v3645_v2  ;;  %v1655_v53 = vsel %vm774_vm0, %v1539_v41, 0.0 }
 0x179   :  { %v1025_v55 = vpop.f32.mrf.mxu0  ;;  %v2629_v33 = vpop.f32.mrf.mxu1  ;;  %1641 = vadd.xlane.f32.xlu1 %v1640_v27  ;;  %v1021_v18 = vadd.f32 %v3458_v49, %v1020_v3 }
 0x17a   :  { %4263 = vst [vmem:[#allocation5_spill] sm:$0xff] %v3650_v9  ;;  %v3656_v13 = vmax.f32 %v1294_v57, 0.0  ;;  %v1026_v37 = vadd.f32 %v3458_v49, %v1025_v55  ;;  %v1540_v45 = vmul.f32 %v3650_v9, %v3650_v9 }
 0x17b   :  { %v1027_v54 = vpop.f32.mrf.mxu0  ;;  %v1306_v58 = vpop.f32.mrf.mxu1  ;;  %1656 = vadd.xlane.f32.xlu0 %v1655_v53  ;;  %v1649_v53 = vsel %vm774_vm0, %v1537_v29, 0.0 }
 0x17c   :  { %4264 = vst [vmem:[#allocation6_spill] sm:$0xff] %v3656_v13  ;;  %v1315_v11 = vadd.f32 %v2629_v33, %v1026_v37  ;;  %v1307_v43 = vadd.f32 %v1306_v58, %v1018_v23  ;;  %v1658_v38 = vsel %vm774_vm0, %v1540_v45, 0.0  ;;  %v1538_v39 = vmul.f32 %v3656_v13, %v3656_v13 }
 0x17d   :  { %v1028_v21 = vpop.f32.mrf.mxu0  ;;  %v2630_v57 = vpop.f32.mrf.mxu1  ;;  %1659 = vadd.xlane.f32.xlu1 %v1658_v38 }
 0x17e   :  { %v3666_v27 = vmax.f32 %v1315_v11, 0.0  ;;  %v3668_v41 = vmax.f32 %v1307_v43, 0.0  ;;  %v1029_v55 = vadd.f32 %v3458_v49, %v1028_v21  ;;  %v1652_v54 = vsel %vm774_vm0, %v1538_v39, 0.0 }
 0x17f   :  { %v1030_v33 = vpop.f32.mrf.mxu0  ;;  %v1309_v23 = vpop.f32.mrf.mxu1  ;;  %1650 = vadd.xlane.f32.xlu0 %v1649_v53 }
 0x180   :  { %4265 = vst [vmem:[#allocation7_spill] sm:$0xff] %v3666_v27  ;;  %4266 = vst [vmem:[#allocation8_spill] sm:$0xff] %v3668_v41  ;;  %v1318_v37 = vadd.f32 %v2630_v57, %v1029_v55  ;;  %v1310_v45 = vadd.f32 %v1309_v23, %v1021_v18  ;;  %v1541_v3 = vmul.f32 %v3668_v41, %v3668_v41 }
 0x181   :  { %v1033_v58 = vpop.f32.mrf.mxu0  ;;  %v2633_v38 = vpop.f32.mrf.mxu1  ;;  %1653 = vadd.xlane.f32.xlu1 %v1652_v54  ;;  %v1543_v11 = vmul.f32 %v3666_v27, %v3666_v27 }
 0x182   :  { %v3677_v43 = vmax.f32 %v1318_v37, 0.0  ;;  %v3679_v21 = vmax.f32 %v1310_v45, 0.0  ;;  %v1034_v29 = vadd.f32 %v3458_v49, %v1033_v58  ;;  %v1661_v57 = vsel %vm774_vm0, %v1541_v3, 0.0 }
 0x183   :  { %v1035_v18 = vpop.f32.mrf.mxu0  ;;  %v1322_v55 = vpop.f32.mrf.mxu1  ;;  %1662 = vadd.xlane.f32.xlu0 %v1661_v57  ;;  %v1667_v54 = vsel %vm774_vm0, %v1543_v11, 0.0 }
 0x184   :  { %4267 = vst [vmem:[#allocation9_spill] sm:$0xff] %v3677_v43  ;;  %4268 = vst [vmem:[#allocation10_spill] sm:$0xff] %v3679_v21  ;;  %v1323_v39 = vadd.f32 %v1322_v55, %v1034_v29  ;;  %v1542_v53 = vmul.f32 %v3679_v21, %v3679_v21  ;;  %v1544_v3 = vmul.f32 %v3677_v43, %v3677_v43 }
 0x185   :  { %v1036_v33 = vpop.f32.mrf.mxu0  ;;  %v2634_v23 = vpop.f32.mrf.mxu1 }
 0x186   :  { %v3686_v27 = vmax.f32 %v1323_v39, 0.0  ;;  %v1037_v37 = vadd.f32 %v3458_v49, %v1036_v33  ;;  %v1664_v45 = vsel %vm774_vm0, %v1542_v53, 0.0  ;;  %v1670_v33 = vsel %vm774_vm0, %v1544_v3, 0.0 }
 0x187   :  { %v1038_v58 = vpop.f32.mrf.mxu0  ;;  %v1325_v18 = vpop.f32.mrf.mxu1  ;;  %1665 = vadd.xlane.f32.xlu1 %v1664_v45  ;;  %1668 = vadd.xlane.f32.xlu0 %v1667_v54 }
 0x188   :  { %4269 = vst [vmem:[#allocation11_spill] sm:$0xff] %v3686_v27  ;;  %v1326_v29 = vadd.f32 %v1325_v18, %v1037_v37  ;;  %v1545_v57 = vmul.f32 %v3686_v27, %v3686_v27 }
 0x189   :  { %v1041_v55 = vpop.f32.mrf.mxu0  ;;  %v2637_v21 = vpop.f32.mrf.mxu1 }
 0x18a   :  { %v3694_v11 = vmax.f32 %v1326_v29, 0.0  ;;  %v1042_v39 = vadd.f32 %v3458_v49, %v1041_v55  ;;  %v1673_v53 = vsel %vm774_vm0, %v1545_v57, 0.0 }
 0x18b   :  { %v1043_v41 = vpop.f32.mrf.mxu0  ;;  %v1338_v43 = vpop.f32.mrf.mxu1  ;;  %1671 = vadd.xlane.f32.xlu1 %v1670_v33  ;;  %1674 = vadd.xlane.f32.xlu0 %v1673_v53 }
 0x18c   :  { %4270 = vst [vmem:[#allocation12_spill] sm:$0xff] %v3694_v11  ;;  %v1331_v45 = vadd.f32 %v2633_v38, %v1042_v39  ;;  %v1546_v54 = vmul.f32 %v3694_v11, %v3694_v11 }
 0x18d   :  { %v1044_v37 = vpop.f32.mrf.mxu0  ;;  %v2638_v58 = vpop.f32.mrf.mxu1 }
 0x18e   :  { %v3701_v18 = vmax.f32 %v1331_v45, 0.0  ;;  %v1045_v29 = vadd.f32 %v3458_v49, %v1044_v37  ;;  %v1676_v55 = vsel %vm774_vm0, %v1546_v54, 0.0 }
 0x18f   :  { %v1046_v27 = vpop.f32.mrf.mxu0  ;;  %v1341_v3 = vpop.f32.mrf.mxu1  ;;  %1677 = vadd.xlane.f32.xlu1 %v1676_v55 }
 0x190   :  { %4271 = vst [vmem:[#allocation13_spill] sm:$0xff] %v3701_v18  ;;  %v1334_v57 = vadd.f32 %v2634_v23, %v1045_v29  ;;  %v1547_v41 = vmul.f32 %v3701_v18, %v3701_v18 }
 0x191   :  { %v1049_v33 = vpop.f32.mrf.mxu0  ;;  %v3707_v38 = vpop.f32.mrf.mxu1 }
 0x192   :  { %v3709_v39 = vmax.f32 %v1334_v57, 0.0  ;;  %v1050_v53 = vadd.f32 %v3458_v49, %v1049_v33  ;;  %v1679_v45 = vsel %vm774_vm0, %v1547_v41, 0.0 }
 0x193   :  { %v1051_v11 = vpop.f32.mrf.mxu0  ;;  %v1354_v37 = vpop.f32.mrf.mxu1  ;;  %1680 = vadd.xlane.f32.xlu0 %v1679_v45 }
 0x194   :  { %4272 = vst [vmem:[#allocation14_spill] sm:$0xff] %v3709_v39  ;;  %v1339_v54 = vadd.f32 %v1338_v43, %v1050_v53  ;;  %v1548_v27 = vmul.f32 %v3709_v39, %v3709_v39 }
 0x195   :  { %v1052_v23 = vpop.f32.mrf.mxu0  ;;  %v3715_v29 = vpop.f32.mrf.mxu1 }
 0x196   :  { %v3717_v55 = vmax.f32 %v1339_v54, 0.0  ;;  %v1053_v18 = vadd.f32 %v3458_v49, %v1052_v23  ;;  %v1682_v57 = vsel %vm774_vm0, %v1548_v27, 0.0 }
 0x197   :  { %v1054_v13 = vpop.f32.mrf.mxu0  ;;  %v1357_v33 = vpop.f32.mrf.mxu1  ;;  %1683 = vadd.xlane.f32.xlu1 %v1682_v57 }
 0x198   :  { %4273 = vst [vmem:[#allocation15_spill] sm:$0xff] %v3717_v55  ;;  %v1342_v41 = vadd.f32 %v1341_v3, %v1053_v18  ;;  %v1549_v11 = vmul.f32 %v3717_v55, %v3717_v55 }
 0x199   :  { %v1057_v43 = vpop.f32.mrf.mxu0  ;;  %v3723_v53 = vpop.f32.mrf.mxu1 }
 0x19a   :  { %v3725_v45 = vmax.f32 %v1342_v41, 0.0  ;;  %v1058_v39 = vadd.f32 %v3458_v49, %v1057_v43  ;;  %v1685_v54 = vsel %vm774_vm0, %v1549_v11, 0.0  ;;  %v1098_v11 = vadd.f32 %v3458_v49, %v3399_v52 }
 0x19b   :  { %v1059_v2 = vpop.f32.mrf.mxu0  ;;  %v3729_v23 = vpop.f32.mrf.mxu1  ;;  %1686 = vadd.xlane.f32.xlu0 %v1685_v54 }
 0x19c   :  { %4274 = vst [vmem:[#allocation16_spill] sm:$0xff] %v3725_v45  ;;  %v1347_v13 = vadd.f32 %v2637_v21, %v1058_v39  ;;  %v1550_v18 = vmul.f32 %v3725_v45, %v3725_v45  ;;  %v1106_v2 = vadd.f32 %v3458_v49, %v3405_v60 }
 0x19d   :  { %v1060_v3 = vpop.f32.mrf.mxu0  ;;  %v3733_v27 = vpop.f32.mrf.mxu1 }
 0x19e   :  { %v3735_v57 = vmax.f32 %v1347_v13, 0.0  ;;  %v1061_v41 = vadd.f32 %v3458_v49, %v1060_v3  ;;  %v1688_v55 = vsel %vm774_vm0, %v1550_v18, 0.0 }
 0x19f   :  { %v1062_v43 = vpop.f32.mrf.mxu0  ;;  %v3739_v9 = vpop.f32.mrf.mxu1  ;;  %1689 = vadd.xlane.f32.xlu1 %v1688_v55  ;;  %v1109_v55 = vadd.f32 %v3458_v49, %v3407_v0 }
 0x1a0   :  { %4275 = vst [vmem:[#allocation17_spill] sm:$0xff] %v3735_v57  ;;  %v1350_v21 = vadd.f32 %v2638_v58, %v1061_v41  ;;  %v1551_v39 = vmul.f32 %v3735_v57, %v3735_v57 }
 0x1a1   :  { %v1065_v54 = vpop.f32.mrf.mxu0  ;;  %v2649_v13 = vpop.f32.mrf.mxu1 }
 0x1a2   :  { %v3747_v45 = vmax.f32 %v1350_v21, 0.0  ;;  %v1066_v18 = vadd.f32 %v3458_v49, %v1065_v54  ;;  %v1395_v3 = vadd.f32 %v2649_v13, %v1106_v2  ;;  %v1691_v43 = vsel %vm774_vm0, %v1551_v39, 0.0 }
 0x1a3   :  { %v1067_v60 = vpop.f32.mrf.mxu0  ;;  %v1386_v58 = vpop.f32.mrf.mxu1  ;;  %1692 = vadd.xlane.f32.xlu0 %v1691_v43  ;;  %v1101_v2 = vadd.f32 %v3458_v49, %v3403_v56  ;;  %v1122_v13 = vadd.f32 %v3458_v49, %v3417_v12 }
 0x1a4   :  { %v1355_v41 = vadd.f32 %v1354_v37, %v1066_v18  ;;  %v3753_v57 = vmax.f32 %v1395_v3, 0.0  ;;  %v1387_v5 = vadd.f32 %v1386_v58, %v1098_v11  ;;  %v1552_v52 = vmul.f32 %v3747_v45, %v3747_v45 }
 0x1a5   :  { %v1068_v21 = vpop.f32.mrf.mxu0  ;;  %v2650_v25 = vpop.f32.mrf.mxu1 }
 0x1a6   :  { %v3759_v54 = vmax.f32 %v1355_v41, 0.0  ;;  %v1069_v39 = vadd.f32 %v3458_v49, %v1068_v21  ;;  %v1398_v0 = vadd.f32 %v2650_v25, %v1109_v55  ;;  %v1694_v11 = vsel %vm774_vm0, %v1552_v52, 0.0 }
 0x1a7   :  { %v1070_v37 = vpop.f32.mrf.mxu0  ;;  %v1389_v18 = vpop.f32.mrf.mxu1  ;;  %v1563_v3 = vmul.f32 %v3753_v57, %v3753_v57  ;;  %v3767_v43 = vmax.f32 %v1387_v5, 0.0  ;;  %1695 = vadd.xlane.f32.xlu1 %v1694_v11  ;;  %v1114_v5 = vadd.f32 %v3458_v49, %v3411_v4 }
 0x1a8   :  { %4276 = vst [vmem:[#allocation18_spill] sm:$0xff] %v3759_v54  ;;  %v1358_v60 = vadd.f32 %v1357_v33, %v1069_v39  ;;  %v3769_v58 = vmax.f32 %v1398_v0, 0.0  ;;  %v1390_v56 = vadd.f32 %v1389_v18, %v1101_v2  ;;  %v1553_v12 = vmul.f32 %v3759_v54, %v3759_v54 }
 0x1a9   :  { %4277 = vst [vmem:[#allocation19_spill] sm:$0xff] %v3767_v43  ;;  %v1073_v41 = vpop.f32.mrf.mxu0  ;;  %v2653_v21 = vpop.f32.mrf.mxu1  ;;  %v1727_v25 = vsel %vm774_vm0, %v1563_v3, 0.0  ;;  %v1125_v0 = vadd.f32 %v3458_v49, %v3421_v16  ;;  %v1561_v3 = vmul.f32 %v3767_v43, %v3767_v43 }
 0x1aa   :  { %4278 = vst [vmem:[#allocation20_spill] sm:$0xff] %v3769_v58  ;;  %v3774_v55 = vmax.f32 %v1358_v60, 0.0  ;;  %v1074_v52 = vadd.f32 %v3458_v49, %v1073_v41  ;;  %v1411_v37 = vadd.f32 %v2653_v21, %v1122_v13  ;;  %1728 = vadd.xlane.f32.xlu0 %v1727_v25  ;;  %v1564_v2 = vmul.f32 %v3769_v58, %v3769_v58 }
 0x1ab   :  { %v1075_v33 = vpop.f32.mrf.mxu0  ;;  %v1402_v39 = vpop.f32.mrf.mxu1  ;;  %v3783_v18 = vmax.f32 %v1390_v56, 0.0  ;;  %v1697_v21 = vsel %vm774_vm0, %v1553_v12, 0.0 }
 0x1ac   :  { %4279 = vst [vmem:[#allocation21_spill] sm:$0xff] %v3774_v55  ;;  %v1363_v11 = vadd.f32 %v3707_v38, %v1074_v52  ;;  %v3788_v13 = vmax.f32 %v1411_v37, 0.0  ;;  %v1730_v4 = vsel %vm774_vm0, %v1564_v2, 0.0  ;;  %v1554_v25 = vmul.f32 %v3774_v55, %v3774_v55 }
 0x1ad   :  { %v1076_v60 = vpop.f32.mrf.mxu0  ;;  %v2654_v41 = vpop.f32.mrf.mxu1  ;;  %1731 = vadd.xlane.f32.xlu1 %v1730_v4  ;;  %v1403_v38 = vadd.f32 %v1402_v39, %v1114_v5  ;;  %v1721_v37 = vsel %vm774_vm0, %v1561_v3, 0.0  ;;  %v1562_v2 = vmul.f32 %v3783_v18, %v3783_v18  ;;  %v1117_v39 = vadd.f32 %v3458_v49, %v3415_v8 }
 0x1ae   :  { %v1077_v16 = vadd.f32 %v3458_v49, %v1076_v60  ;;  %v1414_v56 = vadd.f32 %v2654_v41, %v1125_v0  ;;  %1698 = vadd.xlane.f32.xlu0 %v1697_v21  ;;  %v3795_v43 = vmax.f32 %v1363_v11, 0.0  ;;  %v1700_v0 = vsel %vm774_vm0, %v1554_v25, 0.0 }
 0x1af   :  { %v1078_v52 = vpop.f32.mrf.mxu0  ;;  %v1405_v33 = vpop.f32.mrf.mxu1  ;;  %v1567_v5 = vmul.f32 %v3788_v13, %v3788_v13  ;;  %v1138_v11 = vadd.f32 %v3458_v49, %v3433_v28  ;;  %v3810_v3 = vmax.f32 %v1403_v38, 0.0 }
 0x1b0   :  { %v1366_v12 = vadd.f32 %v3715_v29, %v1077_v16  ;;  %v3801_v54 = vmax.f32 %v1414_v56, 0.0  ;;  %v1406_v41 = vadd.f32 %v1405_v33, %v1117_v39  ;;  %v1555_v25 = vmul.f32 %v3795_v43, %v3795_v43 }
 0x1b1   :  { %v1081_v55 = vpop.f32.mrf.mxu0  ;;  %v2657_v58 = vpop.f32.mrf.mxu1  ;;  %1701 = vadd.xlane.f32.xlu1 %v1700_v0  ;;  %4280 = vst [vmem:[#allocation22_spill] sm:$0xff] %v3810_v3  ;;  %v1724_v52 = vsel %vm774_vm0, %v1562_v2, 0.0  ;;  %v1739_v28 = vsel %vm774_vm0, %v1567_v5, 0.0 }
 0x1b2   :  { %1722 = vadd.xlane.f32.xlu0 %v1721_v37  ;;  %v1082_v4 = vadd.f32 %v3458_v49, %v1081_v55  ;;  %v1427_v21 = vadd.f32 %v2657_v58, %v1138_v11  ;;  %v3815_v16 = vmax.f32 %v1366_v12, 0.0  ;;  %v1568_v38 = vmul.f32 %v3801_v54, %v3801_v54 }
 0x1b3   :  { %v1083_v29 = vpop.f32.mrf.mxu0  ;;  %v1418_v60 = vpop.f32.mrf.mxu1  ;;  %v1130_v55 = vadd.f32 %v3458_v49, %v3425_v20  ;;  %v1141_v58 = vadd.f32 %v3458_v49, %v3437_v32  ;;  %v1565_v12 = vmul.f32 %v3810_v3, %v3810_v3  ;;  %v3827_v0 = vmax.f32 %v1406_v41, 0.0 }
 0x1b4   :  { %v1371_v2 = vadd.f32 %v3729_v23, %v1082_v4  ;;  %v3830_v5 = vmax.f32 %v1427_v21, 0.0  ;;  %v1703_v39 = vsel %vm774_vm0, %v1555_v25, 0.0  ;;  %v1556_v32 = vmul.f32 %v3815_v16, %v3815_v16 }
 0x1b5   :  { %v1084_v56 = vpop.f32.mrf.mxu0  ;;  %v2658_v8 = vpop.f32.mrf.mxu1  ;;  %1725 = vadd.xlane.f32.xlu1 %v1724_v52  ;;  %v1742_v52 = vsel %vm774_vm0, %v1568_v38, 0.0  ;;  %v1419_v41 = vadd.f32 %v1418_v60, %v1130_v55  ;;  %v1733_v23 = vsel %vm774_vm0, %v1565_v12, 0.0  ;;  %v1566_v4 = vmul.f32 %v3827_v0, %v3827_v0 }
 0x1b6   :  { %1740 = vadd.xlane.f32.xlu0 %v1739_v28  ;;  %v1085_v11 = vadd.f32 %v3458_v49, %v1084_v56  ;;  %v1430_v29 = vadd.f32 %v2658_v8, %v1141_v58  ;;  %v3837_v3 = vmax.f32 %v1371_v2, 0.0  ;;  %v1571_v21 = vmul.f32 %v3830_v5, %v3830_v5 }
 0x1b7   :  { %v1086_v33 = vpop.f32.mrf.mxu0  ;;  %v1421_v37 = vpop.f32.mrf.mxu1  ;;  %v1706_v60 = vsel %vm774_vm0, %v1556_v32, 0.0  ;;  %v1133_v55 = vadd.f32 %v3458_v49, %v3429_v24  ;;  %v3851_v12 = vmax.f32 %v1419_v41, 0.0  ;;  %v1146_v41 = vadd.f32 %v3458_v49, %v3441_v36 }
 0x1b8   :  { %v1374_v25 = vadd.f32 %v3739_v9, %v1085_v11  ;;  %v3845_v56 = vmax.f32 %v1430_v29, 0.0  ;;  %v1751_v9 = vsel %vm774_vm0, %v1571_v21, 0.0  ;;  %v1557_v11 = vmul.f32 %v3837_v3, %v3837_v3 }
 0x1b9   :  { %v1089_v20 = vpop.f32.mrf.mxu0  ;;  %v2661_v28 = vpop.f32.mrf.mxu1  ;;  %1743 = vadd.xlane.f32.xlu1 %v1742_v52  ;;  %v1736_v52 = vsel %vm774_vm0, %v1566_v4, 0.0  ;;  %v1569_v21 = vmul.f32 %v3851_v12, %v3851_v12 }
 0x1ba   :  { %1704 = vadd.xlane.f32.xlu0 %v1703_v39  ;;  %v1090_v8 = vadd.f32 %v3458_v49, %v1089_v20  ;;  %v1422_v39 = vadd.f32 %v1421_v37, %v1133_v55  ;;  %v3857_v29 = vmax.f32 %v1374_v25, 0.0  ;;  %v1572_v32 = vmul.f32 %v3845_v56, %v3845_v56 }
 0x1bb   :  { %v1091_v33 = vpop.f32.mrf.mxu0  ;;  %v1434_v58 = vpop.f32.mrf.mxu1  ;;  %v1709_v4 = vsel %vm774_vm0, %v1557_v11, 0.0  ;;  %v1149_v55 = vadd.f32 %v3458_v49, %v3445_v40 }
 0x1bc   :  { %v1379_v20 = vadd.f32 %v3723_v53, %v1090_v8  ;;  %v3865_v33 = vmax.f32 %v1422_v39, 0.0  ;;  %v1754_v8 = vsel %vm774_vm0, %v1572_v32, 0.0  ;;  %v1558_v36 = vmul.f32 %v3857_v29, %v3857_v29 }
 0x1bd   :  { %v1092_v38 = vpop.f32.mrf.mxu0  ;;  %1707 = vadd.xlane.f32.xlu1 %v1706_v60  ;;  %v2662_v37 = vpop.f32.mrf.mxu1  ;;  %v1745_v39 = vsel %vm774_vm0, %v1569_v21, 0.0 }
 0x1be   :  { %1734 = vadd.xlane.f32.xlu0 %v1733_v23  ;;  %v1093_v24 = vadd.f32 %v3458_v49, %v1092_v38  ;;  %v1435_v23 = vadd.f32 %v1434_v58, %v1146_v41  ;;  %v3870_v53 = vmax.f32 %v1379_v20, 0.0  ;;  %v1154_v38 = vadd.f32 %v3458_v49, %v3449_v44 }
 0x1bf   :  { %v1094_v2 = vpop.f32.mrf.mxu0  ;;  %v1437_v60 = vpop.f32.mrf.mxu1  ;;  %v1712_v11 = vsel %vm774_vm0, %v1558_v36, 0.0  ;;  %v1157_v20 = vadd.f32 %v3458_v49, %v3453_v48 }
 0x1c0   :  { %v1382_v25 = vadd.f32 %v3733_v27, %v1093_v24  ;;  %v1443_v58 = vadd.f32 %v2661_v28, %v1154_v38  ;;  %v3880_v2 = vmax.f32 %v1435_v23, 0.0  ;;  %v1570_v27 = vmul.f32 %v3865_v33, %v3865_v33 }
 0x1c1   :  { %1737 = vadd.xlane.f32.xlu1 %v1736_v52  ;;  %v1559_v44 = vmul.f32 %v3870_v53, %v3870_v53  ;;  %v1446_v28 = vadd.f32 %v2662_v37, %v1157_v20 }
 0x1c2   :  { %1752 = vadd.xlane.f32.xlu0 %v1751_v9  ;;  %v3885_v52 = vmax.f32 %v1382_v25, 0.0  ;;  %v1438_v9 = vadd.f32 %v1437_v60, %v1149_v55  ;;  %v3892_v40 = vmax.f32 %v1443_v58, 0.0  ;;  %v1748_v24 = vsel %vm774_vm0, %v1570_v27, 0.0 }
 0x1c3   :  { %v1715_v41 = vsel %vm774_vm0, %v1559_v44, 0.0  ;;  %v3904_v49 = vmax.f32 %v1446_v28, 0.0 }
 0x1c4   :  { %v3895_v32 = vmax.f32 %v1438_v9, 0.0  ;;  %v1560_v23 = vmul.f32 %v3885_v52, %v3885_v52  ;;  %v1575_v48 = vmul.f32 %v3892_v40, %v3892_v40 }
 0x1c5   :  { %1755 = vadd.xlane.f32.xlu1 %v1754_v8 }
 0x1c6   :  { %1710 = vadd.xlane.f32.xlu0 %v1709_v4  ;;  %v1573_v4 = vmul.f32 %v3880_v2, %v3880_v2  ;;  %v1718_v37 = vsel %vm774_vm0, %v1560_v23, 0.0  ;;  %v1574_v25 = vmul.f32 %v3895_v32, %v3895_v32  ;;  %v1763_v60 = vsel %vm774_vm0, %v1575_v48, 0.0 }
 0x1c8   :  { %v1757_v21 = vsel %vm774_vm0, %v1573_v4, 0.0  ;;  %v1760_v58 = vsel %vm774_vm0, %v1574_v25, 0.0 }
 0x1c9   :  { %1713 = vadd.xlane.f32.xlu1 %v1712_v11 }
 0x1ca   :  { %1746 = vadd.xlane.f32.xlu0 %v1745_v39  ;;  %v1576_v39 = vmul.f32 %v3904_v49, %v3904_v49 }
 0x1cc   :  { %v1766_v20 = vsel %vm774_vm0, %v1576_v39, 0.0 }
 0x1cd   :  { %1749 = vadd.xlane.f32.xlu1 %v1748_v24 }
 0x1ce   :  { %1716 = vadd.xlane.f32.xlu0 %v1715_v41 }
 0x1d1   :  { %1719 = vadd.xlane.f32.xlu1 %v1718_v37 }
 0x1d2   :  { %1758 = vadd.xlane.f32.xlu0 %v1757_v21  ;;  %v1585_v8 = vpop.xlane.xlu1 %1584 }
 0x1d3   :  { %v1771_v36 = vmax.f32 %v1585_v8, 1e-24 }
 0x1d4   :  { %v1579_v38 = vpop.xlane.xlu0 %1578 }
 0x1d5   :  { %2842 = vrsqrt.f32 %v1771_v36  ;;  %v1769_v55 = vmax.f32 %v1579_v38, 1e-24  ;;  %1761 = vadd.xlane.f32.xlu1 %v1760_v58 }
 0x1d6   :  { %1764 = vadd.xlane.f32.xlu0 %v1763_v60  ;;  %v1588_v27 = vpop.xlane.xlu1 %1587 }
 0x1d7   :  { %2844 = vrsqrt.f32 %v1769_v55  ;;  %v1772_v9 = vmax.f32 %v1588_v27, 1e-24 }
 0x1d8   :  { %v1582_v11 = vpop.xlane.xlu0 %1581 }
 0x1d9   :  { %v1770_v44 = vmax.f32 %v1582_v11, 1e-24  ;;  %2846 = vrsqrt.f32 %v1772_v9  ;;  %1767 = vadd.xlane.f32.xlu1 %v1766_v20 }
 0x1db   :  { %2848 = vrsqrt.f32 %v1770_v44 }
 0x1dc   :  { %v1597_v28 = vpop.xlane.xlu0 %1596 }
 0x1dd   :  { %v1775_v24 = vmax.f32 %v1597_v28, 1e-24 }
 0x1de   :  { %v1600_v41 = vpop.xlane.xlu1 %1599 }
 0x1df   :  { %2850 = vrsqrt.f32 %v1775_v24  ;;  %v1776_v23 = vmax.f32 %v1600_v41, 1e-24 }
 0x1e0   :  { %v1591_v4 = vpop.xlane.xlu0 %1590 }
 0x1e1   :  { %2852 = vrsqrt.f32 %v1776_v23  ;;  %v1773_v48 = vmax.f32 %v1591_v4, 1e-24 }
 0x1e2   :  { %v2843_v37 = vpop.eup %2842  ;;  %v1594_v21 = vpop.xlane.xlu1 %1593 }
 0x1e3   :  { %v1899_v25 = vmul.f32 %v2843_v37, %v3466_v6  ;;  %2854 = vrsqrt.f32 %v1773_v48  ;;  %v1774_v8 = vmax.f32 %v1594_v21, 1e-24 }
 0x1e4   :  { %v2845_v36 = vpop.eup %2844  ;;  %v1609_v38 = vpop.xlane.xlu0 %1608 }
 0x1e5   :  { %v2499_v60 = vpack.c.bf16 %v1899_v25, %v1899_v25  ;;  %v1897_v55 = vmul.f32 %v2845_v36, %v3472_v14  ;;  %2856 = vrsqrt.f32 %v1774_v8  ;;  %v1779_v58 = vmax.f32 %v1609_v38, 1e-24 }
 0x1e6   :  { %v1612_v39 = vpop.xlane.xlu1 %1611  ;;  %v2847_v27 = vpop.eup %2846 }
 0x1e7   :  { %2220 = vst.msk [vmem:[%s4238_s3 + $0x8] sm:$0xf] %vm2217_vm1, %v2499_v60  ;;  %v2497_v9 = vpack.c.bf16 %v1897_v55, %v1897_v55  ;;  %2858 = vrsqrt.f32 %v1779_v58  ;;  %v1780_v6 = vmax.f32 %v1612_v39, 1e-24  ;;  %v1900_v44 = vmul.f32 %v2847_v27, %v3477_v63 }
 0x1e8   :  { %v2849_v11 = vpop.eup %2848  ;;  %v1603_v20 = vpop.xlane.xlu0 %1602 }
 0x1e9   :  { %2218 = vst.msk [vmem:[%s4238_s3] sm:$0xf] %vm2217_vm1, %v2497_v9  ;;  %v1898_v14 = vmul.f32 %v2849_v11, %v3486_v34  ;;  %2860 = vrsqrt.f32 %v1780_v6  ;;  %v1777_v28 = vmax.f32 %v1603_v20, 1e-24  ;;  %v2500_v24 = vpack.c.bf16 %v1900_v44, %v1900_v44 }
 0x1ea   :  { %v1606_v41 = vpop.xlane.xlu1 %1605 }
 0x1eb   :  { %v2498_v23 = vpack.c.bf16 %v1898_v14, %v1898_v14  ;;  %2862 = vrsqrt.f32 %v1777_v28  ;;  %v1778_v4 = vmax.f32 %v1606_v41, 1e-24  ;;  %2221 = vst.msk [vmem:[%s4238_s3 + $0xc] sm:$0xf] %vm2217_vm1, %v2500_v24 }
 0x1ec   :  { %v2851_v48 = vpop.eup %2850  ;;  %v1621_v63 = vpop.xlane.xlu0 %1620 }
 0x1ed   :  { %2219 = vst.msk [vmem:[%s4238_s3 + $0x4] sm:$0xf] %vm2217_vm1, %v2498_v23  ;;  %v1903_v34 = vmul.f32 %v2851_v48, %v3493_v46  ;;  %2864 = vrsqrt.f32 %v1778_v4  ;;  %v1783_v37 = vmax.f32 %v1621_v63, 1e-24 }
 0x1ee   :  { %v2853_v21 = vpop.eup %2852  ;;  %v1624_v25 = vpop.xlane.xlu1 %1623 }
 0x1ef   :  { %v2503_v8 = vpack.c.bf16 %v1903_v34, %v1903_v34  ;;  %v1904_v36 = vmul.f32 %v2853_v21, %v3509_v59  ;;  %2866 = vrsqrt.f32 %v1783_v37  ;;  %v1784_v38 = vmax.f32 %v1624_v25, 1e-24 }
 0x1f0   :  { %v2855_v60 = vpop.eup %2854  ;;  %v1615_v55 = vpop.xlane.xlu0 %1614 }
 0x1f1   :  { %2224 = vst.msk [vmem:[%s4238_s3 + $0x18] sm:$0xf] %vm2217_vm1, %v2503_v8  ;;  %v2504_v58 = vpack.c.bf16 %v1904_v36, %v1904_v36  ;;  %v1901_v39 = vmul.f32 %v2855_v60, %v3502_v62  ;;  %2868 = vrsqrt.f32 %v1784_v38  ;;  %v1781_v46 = vmax.f32 %v1615_v55, 1e-24 }
 0x1f2   :  { %v2857_v27 = vpop.eup %2856  ;;  %v1618_v9 = vpop.xlane.xlu1 %1617 }
 0x1f3   :  { %2225 = vst.msk [vmem:[%s4238_s3 + $0x1c] sm:$0xf] %vm2217_vm1, %v2504_v58  ;;  %v2501_v59 = vpack.c.bf16 %v1901_v39, %v1901_v39  ;;  %v1902_v6 = vmul.f32 %v2857_v27, %v3517_v22  ;;  %2870 = vrsqrt.f32 %v1781_v46  ;;  %v1782_v11 = vmax.f32 %v1618_v9, 1e-24 }
 0x1f4   :  { %v2859_v44 = vpop.eup %2858  ;;  %v1633_v20 = vpop.xlane.xlu0 %1632 }
 0x1f5   :  { %2222 = vst.msk [vmem:[%s4238_s3 + $0x10] sm:$0xf] %vm2217_vm1, %v2501_v59  ;;  %v2502_v62 = vpack.c.bf16 %v1902_v6, %v1902_v6  ;;  %v1907_v14 = vmul.f32 %v2859_v44, %v3524_v19  ;;  %2872 = vrsqrt.f32 %v1782_v11  ;;  %v1787_v28 = vmax.f32 %v1633_v20, 1e-24 }
 0x1f6   :  { %v2861_v24 = vpop.eup %2860  ;;  %v1636_v41 = vpop.xlane.xlu1 %1635 }
 0x1f7   :  { %2223 = vst.msk [vmem:[%s4238_s3 + $0x14] sm:$0xf] %vm2217_vm1, %v2502_v62  ;;  %v2507_v22 = vpack.c.bf16 %v1907_v14, %v1907_v14  ;;  %v1908_v23 = vmul.f32 %v2861_v24, %v3540_v15  ;;  %2874 = vrsqrt.f32 %v1787_v28  ;;  %v1788_v4 = vmax.f32 %v1636_v41, 1e-24 }
 0x1f8   :  { %v2863_v48 = vpop.eup %2862  ;;  %v1627_v63 = vpop.xlane.xlu0 %1626 }
 0x1f9   :  { %2228 = vst.msk [vmem:[%s4238_s3 + $0x28] sm:$0xf] %vm2217_vm1, %v2507_v22  ;;  %v2508_v19 = vpack.c.bf16 %v1908_v23, %v1908_v23  ;;  %v1905_v34 = vmul.f32 %v2863_v48, %v3533_v50  ;;  %2876 = vrsqrt.f32 %v1788_v4  ;;  %v1785_v37 = vmax.f32 %v1627_v63, 1e-24 }
 0x1fa   :  { %v2865_v21 = vpop.eup %2864  ;;  %v1630_v25 = vpop.xlane.xlu1 %1629 }
 0x1fb   :  { %2229 = vst.msk [vmem:[%s4238_s3 + $0x2c] sm:$0xf] %vm2217_vm1, %v2508_v19  ;;  %v2505_v15 = vpack.c.bf16 %v1905_v34, %v1905_v34  ;;  %v1906_v8 = vmul.f32 %v2865_v21, %v3547_v7  ;;  %2878 = vrsqrt.f32 %v1785_v37  ;;  %v1786_v36 = vmax.f32 %v1630_v25, 1e-24 }
 0x1fc   :  { %v2867_v38 = vpop.eup %2866  ;;  %v1645_v60 = vpop.xlane.xlu0 %1644 }
 0x1fd   :  { %2226 = vst.msk [vmem:[%s4238_s3 + $0x20] sm:$0xf] %vm2217_vm1, %v2505_v15  ;;  %v2506_v50 = vpack.c.bf16 %v1906_v8, %v1906_v8  ;;  %v1911_v55 = vmul.f32 %v2867_v38, %v3554_v35  ;;  %2880 = vrsqrt.f32 %v1786_v36  ;;  %v1791_v58 = vmax.f32 %v1645_v60, 1e-24 }
 0x1fe   :  { %v2869_v39 = vpop.eup %2868  ;;  %v1648_v46 = vpop.xlane.xlu1 %1647 }
 0x1ff   :  { %2227 = vst.msk [vmem:[%s4238_s3 + $0x24] sm:$0xf] %vm2217_vm1, %v2506_v50  ;;  %v2511_v7 = vpack.c.bf16 %v1911_v55, %v1911_v55  ;;  %v1912_v27 = vmul.f32 %v2869_v39, %v3568_v61  ;;  %2882 = vrsqrt.f32 %v1791_v58  ;;  %v1792_v9 = vmax.f32 %v1648_v46, 1e-24 }
 0x200   :  { %v2871_v59 = vpop.eup %2870  ;;  %v1639_v6 = vpop.xlane.xlu0 %1638 }
 0x201   :  { %2232 = vst.msk [vmem:[%s4238_s3 + $0x38] sm:$0xf] %vm2217_vm1, %v2511_v7  ;;  %v2512_v35 = vpack.c.bf16 %v1912_v27, %v1912_v27  ;;  %v1909_v11 = vmul.f32 %v2871_v59, %v3561_v42  ;;  %2884 = vrsqrt.f32 %v1792_v9  ;;  %v1789_v44 = vmax.f32 %v1639_v6, 1e-24 }
 0x202   :  { %v2873_v20 = vpop.eup %2872  ;;  %v1642_v62 = vpop.xlane.xlu1 %1641 }
 0x203   :  { %2233 = vst.msk [vmem:[%s4238_s3 + $0x3c] sm:$0xf] %vm2217_vm1, %v2512_v35  ;;  %v2509_v61 = vpack.c.bf16 %v1909_v11, %v1909_v11  ;;  %v1910_v14 = vmul.f32 %v2873_v20, %v3577_v17  ;;  %2886 = vrsqrt.f32 %v1789_v44  ;;  %v1790_v28 = vmax.f32 %v1642_v62, 1e-24  ;;  %v4281_v44 = vld [vmem:[#allocation2_spill] sm:$0xff] }
 0x204   :  { %v2875_v24 = vpop.eup %2874  ;;  %v1657_v41 = vpop.xlane.xlu0 %1656 }
 0x205   :  { %2230 = vst.msk [vmem:[%s4238_s3 + $0x30] sm:$0xf] %vm2217_vm1, %v2509_v61  ;;  %v2510_v42 = vpack.c.bf16 %v1910_v14, %v1910_v14  ;;  %v1915_v22 = vmul.f32 %v2875_v24, %v3584_v26  ;;  %2888 = vrsqrt.f32 %v1790_v28  ;;  %v1795_v23 = vmax.f32 %v1657_v41, 1e-24  ;;  %v4282_v28 = vld [vmem:[#allocation3_spill] sm:$0xff] }
 0x206   :  { %v2877_v4 = vpop.eup %2876  ;;  %v1660_v48 = vpop.xlane.xlu1 %1659 }
 0x207   :  { %2231 = vst.msk [vmem:[%s4238_s3 + $0x34] sm:$0xf] %vm2217_vm1, %v2510_v42  ;;  %v2515_v17 = vpack.c.bf16 %v1915_v22, %v1915_v22  ;;  %v1916_v63 = vmul.f32 %v2877_v4, %v3599_v1  ;;  %2890 = vrsqrt.f32 %v1795_v23  ;;  %v1796_v19 = vmax.f32 %v1660_v48, 1e-24  ;;  %v4283_v4 = vld [vmem:[#allocation5_spill] sm:$0xff] }
 0x208   :  { %v2879_v34 = vpop.eup %2878  ;;  %v1651_v37 = vpop.xlane.xlu0 %1650 }
 0x209   :  { %2236 = vst.msk [vmem:[%s4238_s3 + $0x48] sm:$0xf] %vm2217_vm1, %v2515_v17  ;;  %v2516_v26 = vpack.c.bf16 %v1916_v63, %v1916_v63  ;;  %v1913_v21 = vmul.f32 %v2879_v34, %v3593_v47  ;;  %2892 = vrsqrt.f32 %v1796_v19  ;;  %v1793_v25 = vmax.f32 %v1651_v37, 1e-24  ;;  %v4284_v34 = vld [vmem:[#allocation4_spill] sm:$0xff] }
 0x20a   :  { %v2881_v15 = vpop.eup %2880  ;;  %v1654_v8 = vpop.xlane.xlu1 %1653 }
 0x20b   :  { %2237 = vst.msk [vmem:[%s4238_s3 + $0x4c] sm:$0xf] %vm2217_vm1, %v2516_v26  ;;  %v2513_v1 = vpack.c.bf16 %v1913_v21, %v1913_v21  ;;  %v1914_v36 = vmul.f32 %v2881_v15, %v3606_v30  ;;  %2894 = vrsqrt.f32 %v1793_v25  ;;  %v1794_v38 = vmax.f32 %v1654_v8, 1e-24  ;;  %v4285_v15 = vld [vmem:[#allocation6_spill] sm:$0xff] }
 0x20c   :  { %v2883_v60 = vpop.eup %2882  ;;  %v1663_v50 = vpop.xlane.xlu0 %1662 }
 0x20d   :  { %2234 = vst.msk [vmem:[%s4238_s3 + $0x40] sm:$0xf] %vm2217_vm1, %v2513_v1  ;;  %v2514_v47 = vpack.c.bf16 %v1914_v36, %v1914_v36  ;;  %v1919_v55 = vmul.f32 %v2883_v60, %v3612_v51  ;;  %2896 = vrsqrt.f32 %v1794_v38  ;;  %v1797_v58 = vmax.f32 %v1663_v50, 1e-24  ;;  %v4286_v60 = vld [vmem:[#allocation8_spill] sm:$0xff] }
 0x20e   :  { %v2885_v39 = vpop.eup %2884 }
 0x20f   :  { %2235 = vst.msk [vmem:[%s4238_s3 + $0x44] sm:$0xf] %vm2217_vm1, %v2514_v47  ;;  %v2519_v30 = vpack.c.bf16 %v1919_v55, %v1919_v55  ;;  %v1920_v46 = vmul.f32 %v2885_v39, %v3625_v10  ;;  %2898 = vrsqrt.f32 %v1797_v58 }
 0x210   :  { %v2887_v7 = vpop.eup %2886  ;;  %v1666_v27 = vpop.xlane.xlu1 %1665 }
 0x211   :  { %v1669_v9 = vpop.xlane.xlu0 %1668  ;;  %2240 = vst.msk [vmem:[%s4238_s3 + $0x58] sm:$0xf] %vm2217_vm1, %v2519_v30  ;;  %v2520_v51 = vpack.c.bf16 %v1920_v46, %v1920_v46  ;;  %v1917_v59 = vmul.f32 %v2887_v7, %v3619_v31  ;;  %v1798_v6 = vmax.f32 %v1666_v27, 1e-24  ;;  %v4287_v46 = vld [vmem:[#allocation10_spill] sm:$0xff] }
 0x212   :  { %v1799_v35 = vmax.f32 %v1669_v9, 1e-24  ;;  %v2889_v11 = vpop.eup %2888  ;;  %v4288_v9 = vld [vmem:[#allocation7_spill] sm:$0xff] }
 0x213   :  { %2241 = vst.msk [vmem:[%s4238_s3 + $0x5c] sm:$0xf] %vm2217_vm1, %v2520_v51  ;;  %v2517_v10 = vpack.c.bf16 %v1917_v59, %v1917_v59  ;;  %v1918_v20 = vmul.f32 %v2889_v11, %v4281_v44  ;;  %2900 = vrsqrt.f32 %v1798_v6  ;;  %v4289_v44 = vld [vmem:[#allocation9_spill] sm:$0xff] }
 0x214   :  { %v2891_v62 = vpop.eup %2890  ;;  %2902 = vrsqrt.f32 %v1799_v35  ;;  %v1672_v61 = vpop.xlane.xlu1 %1671 }
 0x215   :  { %v1675_v14 = vpop.xlane.xlu0 %1674  ;;  %2238 = vst.msk [vmem:[%s4238_s3 + $0x50] sm:$0xf] %vm2217_vm1, %v2517_v10  ;;  %v2518_v31 = vpack.c.bf16 %v1918_v20, %v1918_v20  ;;  %v1923_v24 = vmul.f32 %v2891_v62, %v4282_v28  ;;  %v1800_v41 = vmax.f32 %v1672_v61, 1e-24  ;;  %v4290_v61 = vld [vmem:[#allocation11_spill] sm:$0xff] }
 0x216   :  { %v1801_v42 = vmax.f32 %v1675_v14, 1e-24  ;;  %v2893_v22 = vpop.eup %2892 }
 0x217   :  { %2239 = vst.msk [vmem:[%s4238_s3 + $0x54] sm:$0xf] %vm2217_vm1, %v2518_v31  ;;  %v2523_v23 = vpack.c.bf16 %v1923_v24, %v1923_v24  ;;  %v1924_v48 = vmul.f32 %v2893_v22, %v4283_v4  ;;  %2904 = vrsqrt.f32 %v1800_v41 }
 0x218   :  { %v2895_v17 = vpop.eup %2894  ;;  %2906 = vrsqrt.f32 %v1801_v42  ;;  %v1678_v63 = vpop.xlane.xlu1 %1677  ;;  %v4291_v42 = vld [vmem:[#allocation12_spill] sm:$0xff] }
 0x219   :  { %2244 = vst.msk [vmem:[%s4238_s3 + $0x68] sm:$0xf] %vm2217_vm1, %v2523_v23  ;;  %v2524_v19 = vpack.c.bf16 %v1924_v48, %v1924_v48  ;;  %v1921_v37 = vmul.f32 %v2895_v17, %v4284_v34  ;;  %v1802_v26 = vmax.f32 %v1678_v63, 1e-24  ;;  %v4292_v63 = vld [vmem:[#allocation13_spill] sm:$0xff] }
 0x21a   :  { %v2897_v21 = vpop.eup %2896 }
 0x21b   :  { %2245 = vst.msk [vmem:[%s4238_s3 + $0x6c] sm:$0xf] %vm2217_vm1, %v2524_v19  ;;  %v2521_v25 = vpack.c.bf16 %v1921_v37, %v1921_v37  ;;  %v1922_v8 = vmul.f32 %v2897_v21, %v4285_v15  ;;  %2908 = vrsqrt.f32 %v1802_v26  ;;  %v4293_v21 = vld [vmem:[#allocation14_spill] sm:$0xff] }
 0x21c   :  { %v2899_v1 = vpop.eup %2898  ;;  %v1681_v36 = vpop.xlane.xlu0 %1680 }
 0x21d   :  { %2242 = vst.msk [vmem:[%s4238_s3 + $0x60] sm:$0xf] %vm2217_vm1, %v2521_v25  ;;  %v2522_v38 = vpack.c.bf16 %v1922_v8, %v1922_v8  ;;  %v1925_v50 = vmul.f32 %v2899_v1, %v4286_v60  ;;  %v1803_v47 = vmax.f32 %v1681_v36, 1e-24 }
 0x21f   :  { %2243 = vst.msk [vmem:[%s4238_s3 + $0x64] sm:$0xf] %vm2217_vm1, %v2522_v38  ;;  %v2525_v55 = vpack.c.bf16 %v1925_v50, %v1925_v50  ;;  %2910 = vrsqrt.f32 %v1803_v47  ;;  %v4294_v50 = vld [vmem:[#allocation15_spill] sm:$0xff] }
 0x220   :  { %v2901_v58 = vpop.eup %2900  ;;  %v1684_v39 = vpop.xlane.xlu1 %1683 }
 0x221   :  { %v2903_v30 = vpop.eup %2902  ;;  %2246 = vst.msk [vmem:[%s4238_s3 + $0x70] sm:$0xf] %vm2217_vm1, %v2525_v55  ;;  %v1926_v7 = vmul.f32 %v2901_v58, %v4287_v46  ;;  %v1804_v27 = vmax.f32 %v1684_v39, 1e-24 }
 0x222   :  { %v1927_v51 = vmul.f32 %v2903_v30, %v4288_v9 }
 0x223   :  { %v2526_v59 = vpack.c.bf16 %v1926_v7, %v1926_v7  ;;  %2912 = vrsqrt.f32 %v1804_v27  ;;  %v4295_v27 = vld [vmem:[#allocation16_spill] sm:$0xff] }
 0x224   :  { %v2905_v6 = vpop.eup %2904  ;;  %v2527_v35 = vpack.c.bf16 %v1927_v51, %v1927_v51  ;;  %v1687_v11 = vpop.xlane.xlu0 %1686 }
 0x225   :  { %v2907_v10 = vpop.eup %2906  ;;  %2247 = vst.msk [vmem:[%s4238_s3 + $0x74] sm:$0xf] %vm2217_vm1, %v2526_v59  ;;  %v1928_v20 = vmul.f32 %v2905_v6, %v4289_v44  ;;  %v1805_v62 = vmax.f32 %v1687_v11, 1e-24  ;;  %v4296_v44 = vld [vmem:[#allocation17_spill] sm:$0xff] }
 0x226   :  { %2248 = vst.msk [vmem:[%s4238_s3 + $0x78] sm:$0xf] %vm2217_vm1, %v2527_v35  ;;  %v1929_v14 = vmul.f32 %v2907_v10, %v4290_v61 }
 0x227   :  { %v2528_v31 = vpack.c.bf16 %v1928_v20, %v1928_v20  ;;  %2914 = vrsqrt.f32 %v1805_v62 }
 0x228   :  { %v2909_v28 = vpop.eup %2908  ;;  %v2529_v24 = vpack.c.bf16 %v1929_v14, %v1929_v14  ;;  %v1690_v41 = vpop.xlane.xlu1 %1689 }
 0x229   :  { %2249 = vst.msk [vmem:[%s4238_s3 + $0x7c] sm:$0xf] %vm2217_vm1, %v2528_v31  ;;  %v1930_v22 = vmul.f32 %v2909_v28, %v4291_v42  ;;  %v1806_v23 = vmax.f32 %v1690_v41, 1e-24 }
 0x22a   :  { %2250 = vst.msk [vmem:[%s4238_s3 + $0x80] sm:$0xf] %vm2217_vm1, %v2529_v24 }
 0x22b   :  { %v2530_v4 = vpack.c.bf16 %v1930_v22, %v1930_v22  ;;  %2916 = vrsqrt.f32 %v1806_v23 }
 0x22c   :  { %v2911_v48 = vpop.eup %2910  ;;  %v1693_v17 = vpop.xlane.xlu0 %1692 }
 0x22d   :  { %2251 = vst.msk [vmem:[%s4238_s3 + $0x84] sm:$0xf] %vm2217_vm1, %v2530_v4  ;;  %v1931_v19 = vmul.f32 %v2911_v48, %v4292_v63  ;;  %v1807_v34 = vmax.f32 %v1693_v17, 1e-24 }
 0x22f   :  { %v2531_v37 = vpack.c.bf16 %v1931_v19, %v1931_v19  ;;  %2918 = vrsqrt.f32 %v1807_v34 }
 0x230   :  { %v2913_v26 = vpop.eup %2912  ;;  %v1696_v15 = vpop.xlane.xlu1 %1695 }
 0x231   :  { %2252 = vst.msk [vmem:[%s4238_s3 + $0x88] sm:$0xf] %vm2217_vm1, %v2531_v37  ;;  %v1932_v25 = vmul.f32 %v2913_v26, %v4293_v21  ;;  %v1808_v8 = vmax.f32 %v1696_v15, 1e-24 }
 0x233   :  { %v2532_v1 = vpack.c.bf16 %v1932_v25, %v1932_v25  ;;  %v1729_v36 = vpop.xlane.xlu0 %1728  ;;  %2920 = vrsqrt.f32 %v1808_v8  ;;  %v4298_v8 = vld [vmem:[#allocation18_spill] sm:$0xff] }
 0x234   :  { %v2915_v38 = vpop.eup %2914  ;;  %v1819_v60 = vmax.f32 %v1729_v36, 1e-24 }
 0x235   :  { %2253 = vst.msk [vmem:[%s4238_s3 + $0x8c] sm:$0xf] %vm2217_vm1, %v2532_v1  ;;  %v1933_v47 = vmul.f32 %v2915_v38, %v4294_v50 }
 0x236   :  { %2922 = vrsqrt.f32 %v1819_v60  ;;  %v1732_v58 = vpop.xlane.xlu1 %1731 }
 0x237   :  { %v2533_v55 = vpack.c.bf16 %v1933_v47, %v1933_v47  ;;  %v1699_v39 = vpop.xlane.xlu0 %1698  ;;  %v1820_v46 = vmax.f32 %v1732_v58, 1e-24  ;;  %v4299_v58 = vld [vmem:[#allocation21_spill] sm:$0xff] }
 0x238   :  { %v2917_v30 = vpop.eup %2916  ;;  %v1809_v7 = vmax.f32 %v1699_v39, 1e-24 }
 0x239   :  { %2254 = vst.msk [vmem:[%s4238_s3 + $0x90] sm:$0xf] %vm2217_vm1, %v2533_v55  ;;  %v1934_v9 = vmul.f32 %v2917_v30, %v4295_v27  ;;  %2924 = vrsqrt.f32 %v1820_v46 }
 0x23a   :  { %2926 = vrsqrt.f32 %v1809_v7  ;;  %v1702_v59 = vpop.xlane.xlu1 %1701  ;;  %v4300_v7 = vld [vmem:[#allocation19_spill] sm:$0xff] }
 0x23b   :  { %v2534_v51 = vpack.c.bf16 %v1934_v9, %v1934_v9  ;;  %v1723_v6 = vpop.xlane.xlu0 %1722  ;;  %v1810_v11 = vmax.f32 %v1702_v59, 1e-24 }
 0x23c   :  { %v2919_v35 = vpop.eup %2918  ;;  %v1817_v10 = vmax.f32 %v1723_v6, 1e-24 }
 0x23d   :  { %2255 = vst.msk [vmem:[%s4238_s3 + $0x94] sm:$0xf] %vm2217_vm1, %v2534_v51  ;;  %v1935_v20 = vmul.f32 %v2919_v35, %v4296_v44  ;;  %2928 = vrsqrt.f32 %v1810_v11 }
 0x23e   :  { %2930 = vrsqrt.f32 %v1817_v10  ;;  %v1726_v61 = vpop.xlane.xlu1 %1725 }
 0x23f   :  { %v2535_v62 = vpack.c.bf16 %v1935_v20, %v1935_v20  ;;  %v1741_v14 = vpop.xlane.xlu0 %1740  ;;  %v1818_v31 = vmax.f32 %v1726_v61, 1e-24 }
 0x240   :  { %v1823_v28 = vmax.f32 %v1741_v14, 1e-24  ;;  %v2921_v24 = vpop.eup %2920 }
 0x241   :  { %2256 = vst.msk [vmem:[%s4238_s3 + $0x98] sm:$0xf] %vm2217_vm1, %v2535_v62  ;;  %v1936_v41 = vmul.f32 %v2921_v24, %v3747_v45  ;;  %2932 = vrsqrt.f32 %v1818_v31 }
 0x242   :  { %2934 = vrsqrt.f32 %v1823_v28  ;;  %v1744_v22 = vpop.xlane.xlu1 %1743 }
 0x243   :  { %v2923_v42 = vpop.eup %2922  ;;  %v1705_v23 = vpop.xlane.xlu0 %1704  ;;  %v2536_v4 = vpack.c.bf16 %v1936_v41, %v1936_v41  ;;  %v1824_v17 = vmax.f32 %v1744_v22, 1e-24 }
 0x244   :  { %v1947_v48 = vmul.f32 %v2923_v42, %v3753_v57  ;;  %v1811_v63 = vmax.f32 %v1705_v23, 1e-24  ;;  %v4297_v57 = vld [vmem:[#allocation20_spill] sm:$0xff] }
 0x245   :  { %2257 = vst.msk [vmem:[%s4238_s3 + $0x9c] sm:$0xf] %vm2217_vm1, %v2536_v4  ;;  %2936 = vrsqrt.f32 %v1824_v17 }
 0x246   :  { %v2547_v19 = vpack.c.bf16 %v1947_v48, %v1947_v48  ;;  %v2925_v34 = vpop.eup %2924  ;;  %2938 = vrsqrt.f32 %v1811_v63  ;;  %v1708_v45 = vpop.xlane.xlu1 %1707 }
 0x247   :  { %v1735_v37 = vpop.xlane.xlu0 %1734  ;;  %v2927_v26 = vpop.eup %2926  ;;  %v1948_v21 = vmul.f32 %v2925_v34, %v4297_v57  ;;  %v1812_v25 = vmax.f32 %v1708_v45, 1e-24 }
 0x248   :  { %2268 = vst.msk [vmem:[%s4238_s3 + $0xc8] sm:$0xf] %vm2217_vm1, %v2547_v19  ;;  %v1821_v15 = vmax.f32 %v1735_v37, 1e-24  ;;  %v1937_v1 = vmul.f32 %v2927_v26, %v4298_v8 }
 0x249   :  { %v2548_v36 = vpack.c.bf16 %v1948_v21, %v1948_v21  ;;  %2940 = vrsqrt.f32 %v1812_v25 }
 0x24a   :  { %v2929_v38 = vpop.eup %2928  ;;  %v2537_v60 = vpack.c.bf16 %v1937_v1, %v1937_v1  ;;  %2942 = vrsqrt.f32 %v1821_v15  ;;  %v1738_v50 = vpop.xlane.xlu1 %1737 }
 0x24b   :  { %v1753_v47 = vpop.xlane.xlu0 %1752  ;;  %v2931_v55 = vpop.eup %2930  ;;  %2269 = vst.msk [vmem:[%s4238_s3 + $0xcc] sm:$0xf] %vm2217_vm1, %v2548_v36  ;;  %v1938_v39 = vmul.f32 %v2929_v38, %v4299_v58  ;;  %v1822_v30 = vmax.f32 %v1738_v50, 1e-24 }
 0x24c   :  { %v1827_v46 = vmax.f32 %v1753_v47, 1e-24  ;;  %2258 = vst.msk [vmem:[%s4238_s3 + $0xa0] sm:$0xf] %vm2217_vm1, %v2537_v60  ;;  %v1945_v27 = vmul.f32 %v2931_v55, %v4300_v7 }
 0x24d   :  { %v2538_v9 = vpack.c.bf16 %v1938_v39, %v1938_v39  ;;  %2944 = vrsqrt.f32 %v1822_v30 }
 0x24e   :  { %v2933_v51 = vpop.eup %2932  ;;  %v2545_v59 = vpack.c.bf16 %v1945_v27, %v1945_v27  ;;  %2946 = vrsqrt.f32 %v1827_v46  ;;  %v1756_v6 = vpop.xlane.xlu1 %1755 }
 0x24f   :  { %v1711_v35 = vpop.xlane.xlu0 %1710  ;;  %v2935_v11 = vpop.eup %2934  ;;  %2259 = vst.msk [vmem:[%s4238_s3 + $0xa4] sm:$0xf] %vm2217_vm1, %v2538_v9  ;;  %v1946_v10 = vmul.f32 %v2933_v51, %v3783_v18  ;;  %v1828_v44 = vmax.f32 %v1756_v6, 1e-24 }
 0x250   :  { %v1813_v20 = vmax.f32 %v1711_v35, 1e-24  ;;  %2266 = vst.msk [vmem:[%s4238_s3 + $0xc0] sm:$0xf] %vm2217_vm1, %v2545_v59  ;;  %v1951_v62 = vmul.f32 %v2935_v11, %v3788_v13 }
 0x251   :  { %v2546_v61 = vpack.c.bf16 %v1946_v10, %v1946_v10  ;;  %2948 = vrsqrt.f32 %v1828_v44 }
 0x252   :  { %v2937_v14 = vpop.eup %2936  ;;  %v2551_v31 = vpack.c.bf16 %v1951_v62, %v1951_v62  ;;  %2950 = vrsqrt.f32 %v1813_v20  ;;  %v1714_v28 = vpop.xlane.xlu1 %1713 }
 0x253   :  { %v1747_v24 = vpop.xlane.xlu0 %1746  ;;  %v2939_v41 = vpop.eup %2938  ;;  %2267 = vst.msk [vmem:[%s4238_s3 + $0xc4] sm:$0xf] %vm2217_vm1, %v2546_v61  ;;  %v1952_v18 = vmul.f32 %v2937_v14, %v3801_v54  ;;  %v1814_v42 = vmax.f32 %v1714_v28, 1e-24 }
 0x254   :  { %v1825_v22 = vmax.f32 %v1747_v24, 1e-24  ;;  %2272 = vst.msk [vmem:[%s4238_s3 + $0xd8] sm:$0xf] %vm2217_vm1, %v2551_v31  ;;  %v1939_v13 = vmul.f32 %v2939_v41, %v3795_v43  ;;  %v4301_v43 = vld [vmem:[#allocation22_spill] sm:$0xff] }
 0x255   :  { %v2552_v23 = vpack.c.bf16 %v1952_v18, %v1952_v18  ;;  %2952 = vrsqrt.f32 %v1814_v42 }
 0x256   :  { %v2941_v4 = vpop.eup %2940  ;;  %v2539_v48 = vpack.c.bf16 %v1939_v13, %v1939_v13  ;;  %2954 = vrsqrt.f32 %v1825_v22  ;;  %v1750_v17 = vpop.xlane.xlu1 %1749 }
 0x257   :  { %v1717_v63 = vpop.xlane.xlu0 %1716  ;;  %v2943_v19 = vpop.eup %2942  ;;  %2273 = vst.msk [vmem:[%s4238_s3 + $0xdc] sm:$0xf] %vm2217_vm1, %v2552_v23  ;;  %v1940_v54 = vmul.f32 %v2941_v4, %v3815_v16  ;;  %v1826_v34 = vmax.f32 %v1750_v17, 1e-24 }
 0x258   :  { %v1815_v45 = vmax.f32 %v1717_v63, 1e-24  ;;  %2260 = vst.msk [vmem:[%s4238_s3 + $0xa8] sm:$0xf] %vm2217_vm1, %v2539_v48  ;;  %v1949_v37 = vmul.f32 %v2943_v19, %v4301_v43 }
 0x259   :  { %v2540_v26 = vpack.c.bf16 %v1940_v54, %v1940_v54  ;;  %2956 = vrsqrt.f32 %v1826_v34 }
 0x25a   :  { %v2945_v57 = vpop.eup %2944  ;;  %v2549_v21 = vpack.c.bf16 %v1949_v37, %v1949_v37  ;;  %2958 = vrsqrt.f32 %v1815_v45  ;;  %v1720_v25 = vpop.xlane.xlu1 %1719 }
 0x25b   :  { %v1759_v15 = vpop.xlane.xlu0 %1758  ;;  %v2947_v8 = vpop.eup %2946  ;;  %2261 = vst.msk [vmem:[%s4238_s3 + $0xac] sm:$0xf] %vm2217_vm1, %v2540_v26  ;;  %v1950_v16 = vmul.f32 %v2945_v57, %v3827_v0  ;;  %v1816_v1 = vmax.f32 %v1720_v25, 1e-24 }
 0x25c   :  { %v1829_v36 = vmax.f32 %v1759_v15, 1e-24  ;;  %2270 = vst.msk [vmem:[%s4238_s3 + $0xd0] sm:$0xf] %vm2217_vm1, %v2549_v21  ;;  %v1955_v38 = vmul.f32 %v2947_v8, %v3830_v5 }
 0x25d   :  { %v2550_v60 = vpack.c.bf16 %v1950_v16, %v1950_v16  ;;  %2960 = vrsqrt.f32 %v1816_v1 }
 0x25e   :  { %v2949_v50 = vpop.eup %2948  ;;  %v2555_v47 = vpack.c.bf16 %v1955_v38, %v1955_v38  ;;  %2962 = vrsqrt.f32 %v1829_v36  ;;  %v1762_v55 = vpop.xlane.xlu1 %1761 }
 0x25f   :  { %v1765_v58 = vpop.xlane.xlu0 %1764  ;;  %v2951_v39 = vpop.eup %2950  ;;  %2271 = vst.msk [vmem:[%s4238_s3 + $0xd4] sm:$0xf] %vm2217_vm1, %v2550_v60  ;;  %v1956_v0 = vmul.f32 %v2949_v50, %v3845_v56  ;;  %v1830_v30 = vmax.f32 %v1762_v55, 1e-24 }
 0x260   :  { %v1831_v46 = vmax.f32 %v1765_v58, 1e-24  ;;  %2276 = vst.msk [vmem:[%s4238_s3 + $0xe8] sm:$0xf] %vm2217_vm1, %v2555_v47  ;;  %v1941_v5 = vmul.f32 %v2951_v39, %v3837_v3 }
 0x261   :  { %v2556_v7 = vpack.c.bf16 %v1956_v0, %v1956_v0  ;;  %2964 = vrsqrt.f32 %v1830_v30 }
 0x262   :  { %v2953_v27 = vpop.eup %2952  ;;  %v2541_v9 = vpack.c.bf16 %v1941_v5, %v1941_v5  ;;  %2966 = vrsqrt.f32 %v1831_v46  ;;  %v1768_v51 = vpop.xlane.xlu1 %1767 }
 0x263   :  { %v2955_v59 = vpop.eup %2954  ;;  %2277 = vst.msk [vmem:[%s4238_s3 + $0xec] sm:$0xf] %vm2217_vm1, %v2556_v7  ;;  %v1942_v56 = vmul.f32 %v2953_v27, %v3857_v29  ;;  %v1832_v6 = vmax.f32 %v1768_v51, 1e-24 }
 0x264   :  { %2262 = vst.msk [vmem:[%s4238_s3 + $0xb0] sm:$0xf] %vm2217_vm1, %v2541_v9  ;;  %v1953_v3 = vmul.f32 %v2955_v59, %v3851_v12 }
 0x265   :  { %v2542_v35 = vpack.c.bf16 %v1942_v56, %v1942_v56  ;;  %2968 = vrsqrt.f32 %v1832_v6 }
 0x266   :  { %v2957_v11 = vpop.eup %2956  ;;  %v2553_v10 = vpack.c.bf16 %v1953_v3, %v1953_v3 }
 0x267   :  { %v2959_v44 = vpop.eup %2958  ;;  %2263 = vst.msk [vmem:[%s4238_s3 + $0xb4] sm:$0xf] %vm2217_vm1, %v2542_v35  ;;  %v1954_v29 = vmul.f32 %v2957_v11, %v3865_v33 }
 0x268   :  { %2274 = vst.msk [vmem:[%s4238_s3 + $0xe0] sm:$0xf] %vm2217_vm1, %v2553_v10  ;;  %v1943_v20 = vmul.f32 %v2959_v44, %v3870_v53 }
 0x269   :  { %v2554_v12 = vpack.c.bf16 %v1954_v29, %v1954_v29 }
 0x26a   :  { %v2961_v62 = vpop.eup %2960  ;;  %v2543_v61 = vpack.c.bf16 %v1943_v20, %v1943_v20 }
 0x26b   :  { %v2963_v14 = vpop.eup %2962  ;;  %2275 = vst.msk [vmem:[%s4238_s3 + $0xe4] sm:$0xf] %vm2217_vm1, %v2554_v12  ;;  %v1944_v31 = vmul.f32 %v2961_v62, %v3885_v52 }
 0x26c   :  { %2264 = vst.msk [vmem:[%s4238_s3 + $0xb8] sm:$0xf] %vm2217_vm1, %v2543_v61  ;;  %v1957_v33 = vmul.f32 %v2963_v14, %v3880_v2 }
 0x26d   :  { %v2544_v28 = vpack.c.bf16 %v1944_v31, %v1944_v31 }
 0x26e   :  { %v2965_v53 = vpop.eup %2964  ;;  %v2557_v24 = vpack.c.bf16 %v1957_v33, %v1957_v33 }
 0x26f   :  { %v2967_v41 = vpop.eup %2966  ;;  %2265 = vst.msk [vmem:[%s4238_s3 + $0xbc] sm:$0xf] %vm2217_vm1, %v2544_v28  ;;  %v1958_v18 = vmul.f32 %v2965_v53, %v3895_v32 }
 0x270   :  { %2278 = vst.msk [vmem:[%s4238_s3 + $0xf0] sm:$0xf] %vm2217_vm1, %v2557_v24  ;;  %v1959_v52 = vmul.f32 %v2967_v41, %v3892_v40 }
 0x271   :  { %v2558_v42 = vpack.c.bf16 %v1958_v18, %v1958_v18 }
 0x272   :  { %v2969_v2 = vpop.eup %2968  ;;  %v2559_v22 = vpack.c.bf16 %v1959_v52, %v1959_v52 }
 0x273   :  { %2279 = vst.msk [vmem:[%s4238_s3 + $0xf4] sm:$0xf] %vm2217_vm1, %v2558_v42  ;;  %v1960_v13 = vmul.f32 %v2969_v2, %v3904_v49 }
 0x274   :  { %2280 = vst.msk [vmem:[%s4238_s3 + $0xf8] sm:$0xf] %vm2217_vm1, %v2559_v22 }
 0x275   :  { %v2560_v32 = vpack.c.bf16 %v1960_v13, %v1960_v13 }
 0x277   :  { %2281 = vst.msk [vmem:[%s4238_s3 + $0xfc] sm:$0xf] %vm2217_vm1, %v2560_v32 }

// kernel: stfc3net_forward.5
= control target key start
LH: loop header
LB: loop body
LE: loop exit
PB: predicated region body
PF: predicated region fallthrough
CT: control target
= control target key end

     0   :  { %8 = vsyncpa [#allocation3], 0  ;;  %s1539_s0 = inlined_call_operand.vmem [shape: bf16[2,6,16,32], index: 0, kind: input, shape index: {}]   ;;  %s1540_s1 = inlined_call_operand.vmem [shape: s32[2,1,4,16], index: 1, kind: input, shape index: {}]   ;;  %s1541_s2 = inlined_call_operand.vmem [shape: f32[2,1,4,16], index: 2, kind: input, shape index: {}]   ;;  %s1542_s3 = inlined_call_operand.hbm [shape: f32[2,1,16,16], index: 3, kind: output, shape index: {}]  }
   0x1   :  { %10 = vsyncpa [#allocation3 + $0x1], 0  ;;  %s1322_s12 = smov 0   ;;  %s1324_s13 = smov 0  }
   0x2   :  { %s1326_s14 = smov 0   ;;  %s1328_s15 = smov 0  }
   0x3 LB: > { %s1343_s16 = sadd.s32 4294967295, %s1295_s15   ;;  %s1020_s17 = sadd.s32 4294967294, %s1295_s15   ;;  %s1295_s15 = sphi %s1328_s15, %s1548_s15   ;;  %s1291_s14 = sphi %s1326_s14, %s1547_s14   ;;  %s1287_s13 = sphi %s1324_s13, %s1546_s13   ;;  %s1283_s12 = sphi %s1322_s12, %s1545_s12  }
   0x4   : > { %s1347_s18 = sadd.s32 1, %s1295_s15   ;;  %s101_s19 = sadd.s32 1, %s1291_s14 }
   0x5   : > { %s98_s20 = ssub.s32 %s1295_s15, %s1347_s18  ;;  %p111_p0 = scmp.ne.s32.totalorder %s1291_s14, %s1287_s13 }
   0x6   : > { %p99_p1 = scmp.eq.s32.totalorder %s98_s20, 0  ;;  %p112_p2 = scmp.eq.s32.totalorder %s1343_s16, 1 }
   0x7   : > { %p117_p3 = scmp.ne.s32.totalorder %s1287_s13, %s1283_s12  ;;  %p118_p4 = scmp.eq.s32.totalorder %s1020_s17, 1 }
   0x8   : > { %s1358_s21 = scalar_select %p99_p1, %s1291_s14, %s101_s19  }
   0x9   : > { %p1360_p5 = por %p112_p2, %p111_p0  ;;  %p1364_p6 = por %p118_p4, %p117_p3 }
   0xa   : > { %p1023_p7 = scmp.ge.s32.totalorder %s1295_s15, 1  ;;  %p158_p8 = scmp.lt.s32.totalorder %s1295_s15, 3 }
   0xc   : > { %p159_p9 = pnand %p1023_p7, %p158_p8 }
   0xd   : > { %p190_p10 = scmp.lt.s32.totalorder (!%p159_p9), %s1343_s16, 1  ;;  %s187_s9 = sand.u32 (!%p159_p9), 1, %s1287_s13  }
   0xe   : > { %162 = sbr.rel (%p159_p9) target bundleno = 1684 (0x694), region = 32  ;;  %s1024_s10 = sshll.u32 (!%p159_p9), %s187_s9, 4 }
   0xf   : > { %s189_s11 = scalar_lea.vmem (!%p159_p9), [#allocation2], %s1024_s10  ;;  %s1059_s19 = sshll.u32 (!%p159_p9), %s1343_s16, 8 }
  0x10   : > { %s934_s17 = sshll.u32 (!%p159_p9), %s189_s11, 4  ;;  %s1499_s26 = scalar_lea.sflag (!%p159_p9), [#allocation3], %s187_s9  ;;  %s1491_s17 = int_to_ptr.vmem [resolvable:$true] %s934_s17 }
  0x11   : > { %s1299_s27 = smov (!%p159_p9), [#allocation2]  }
  0x13   : > { %v1297_v0 = vmov 0.0   ;;  %s1374_s24 = scalar_select %p190_p10, %s1343_s16, 1  ;;  %vm1298_vm0 = vmmov 0   ;;  %vm223_vm1 = vcmask 261120   ;;  %vm273_vm2 = vcmask 130048  }
  0x14   : > { %1080 = vmatprep.subr.bf16.mxu0 %v1297_v0  ;;  %1086 = vmatprep.subr.bf16.mxu1 %v1297_v0  ;;  %v204_v54 = vlaneseq  ;;  %s1235_s16 = scalar_lea.vmem %s1491_s17, 256 }
  0x15   : > { %1082 = vmatprep.mubr.msk.bf16.mxu0 %vm1298_vm0, %v1297_v0  ;;  %1088 = vmatprep.mubr.msk.bf16.mxu1 %vm1298_vm0, %v1297_v0  ;;  %s1140_s25 = smul.u32 48, %s1374_s24  ;;  %s1026_s29 = sshll.u32 %s1374_s24, 2 }
  0x16   : > { %v205_v55 = vshrl.u32 %v204_v54, 7  ;;  %s198_s5 = scalar_lea.vmem %s1540_s1, %s1026_s29  ;;  %s202_s8 = scalar_lea.vmem %s1541_s2, %s1026_s29 }
  0x17   : > { %s1384_s28 = scalar_lea.vmem %s1539_s0, %s1140_s25  ;;  %v663_v59 = vld [vmem:[%s198_s5] sm:$0xf]  ;;  %s1496_s25 = scalar_lea.hbm %s1542_s3, %s1059_s19 }
  0x18   : > { %v1185_v1 = vld [vmem:[%s1384_s28 + $0x18] sm:$0xff]   ;;  %v1186_v2 = vld [vmem:[%s1384_s28 + $0x20] sm:$0xff]   ;;  %v1187_v5 = vld [vmem:[%s1384_s28 + $0x10] sm:$0xff]   ;;  %v667_v57 = vsub.s32 0, %v205_v55  ;;  %v681_v58 = vsub.s32 1, %v205_v55  ;;  %v695_v60 = vsub.s32 2, %v205_v55  ;;  %p1236_p11 = scmp.ne.s32.totalorder %s1491_s17, %s1235_s16 }
  0x19   : > { %v228_v3 = vsel %vm223_vm1, %v1185_v1, 0  ;;  %v306_v4 = vsel %vm223_vm1, %v1186_v2, 0  ;;  %v225_v6 = vsel %vm223_vm1, %v1187_v5, 0  ;;  %v1402_v7 = vld [vmem:[%s1384_s28 + $0x8] sm:$0xff]   ;;  %v1190_v56 = vld [vmem:[%s1384_s28] sm:$0xff]   ;;  %v206_v61 = vadd.s32 8, %v205_v55 }
  0x1a   : > { %1081 = vmatpush3.bf16.xpose.msra.mxu0 %v228_v3  ;;  %1087 = vmatpush3.bf16.xpose.msra.mxu1 %v306_v4  ;;  %v1189_v8 = vld [vmem:[%s1384_s28 + $0x28] sm:$0xff]   ;;  %v664_v62 = vld [vmem:[%s202_s8] sm:$0xf]  ;;  %v668_v63 = vrot.slane %v663_v59, %v667_v57  ;;  %v696_v4 = vrot.slane %v663_v59, %v695_v60  ;;  %p1237_p12 = pnand %p1236_p11, %p1360_p5  ;;  %s1239_s28 = sshll.u32 %s1299_s27, 4  ;;  %s1240_s28 = int_to_ptr.vmem [resolvable:$false] %s1239_s28 }
  0x1b   : > { %1092 = vmatprep.subr.bf16.mxu0 %v1297_v0  ;;  %1098 = vmatprep.subr.bf16.mxu1 %v1297_v0  ;;  %v550_v9 = vsel %vm223_vm1, %v1189_v8, 0  ;;  %v688_v3 = vrot.slane %v664_v62, %v681_v58  ;;  %s1241_s29 = scalar_lea.vmem %s1240_s28, 512  ;;  %p1242_p0 = scmp.lt.s32.totalorder %s1491_s17, %s1240_s28 }
  0x1c   : > { %vm669_vm3 = vcmp.eq.s32.totalorder %v205_v55, %v668_v63  ;;  %vm670_vm4 = vcmp.eq.s32.totalorder %v206_v61, %v668_v63  ;;  %vm697_vm7 = vcmp.eq.s32.totalorder %v205_v55, %v696_v4  ;;  %vm698_vm8 = vcmp.eq.s32.totalorder %v206_v61, %v696_v4  ;;  %p1238_p13 = pneg %p1237_p12  ;;  %p1243_p1 = scmp.lt.s32.totalorder %s1241_s29, %s1235_s16 }
  0x1e   : > { %p1244_p2 = por %p1243_p1, %p1242_p0 }
  0x20   : > { %p1245_p3 = pnand %p1244_p2, %p1238_p13 }
  0x21   : > { %1083 = vmatmul.mubr.msk.bf16.vlgmr.msra.gmra.mxu0 %vm223_vm1, %v1187_v5  ;;  %1089 = vmatmul.mubr.msk.bf16.vlgmr.msra.gmra.mxu1 %vm223_vm1, %v1185_v1  ;;  %v682_v1 = vrot.slane %v663_v59, %v681_v58  ;;  %v709_v5 = vsub.s32 3, %v205_v55 }
  0x22   : > { %1094 = vmatprep.mubr.msk.bf16.mxu0 %vm1298_vm0, %v1297_v0  ;;  %1099 = vmatpush3.bf16.xpose.msra.mxu1 %v225_v6  ;;  %v702_v6 = vrot.slane %v664_v62, %v695_v60 }
  0x23   : > { %1100 = vmatprep.mubr.msk.bf16.mxu1 %vm1298_vm0, %v1297_v0  ;;  %1110 = vmatprep.subr.bf16.mxu1 %v1297_v0  ;;  %vm683_vm5 = vcmp.eq.s32.totalorder %v205_v55, %v682_v1  ;;  %vm684_vm6 = vcmp.eq.s32.totalorder %v206_v61, %v682_v1 }
  0x29   : > { %1101 = vmatmul.mubr.msk.bf16.vlgmr.msra.gmra.mxu1 %vm223_vm1, %v1402_v7 }
  0x2a   : > { %1112 = vmatprep.mubr.msk.bf16.mxu1 %vm1298_vm0, %v1297_v0  ;;  %1111 = vmatpush3.bf16.xpose.msra.mxu1 %v550_v9 }
  0x2b   : > { %1122 = vmatprep.subr.bf16.mxu1 %v1297_v0 }
  0x31   : > { %1113 = vmatmul.mubr.msk.bf16.vlgmr.msra.gmra.mxu1 %vm223_vm1, %v1186_v2  ;;  %v674_v2 = vrot.slane %v664_v62, %v667_v57 }
  0x32   : > { %1124 = vmatprep.mubr.msk.bf16.mxu1 %vm1298_vm0, %v1297_v0  ;;  %1123 = vmatpush3.bf16.msra.mxu1 %v1190_v56 }
  0x33   : > { %1134 = vmatprep.subr.bf16.mxu1 %v1297_v0  ;;  %v675_v8 = vsel %vm669_vm3, %v674_v2, 0.0  ;;  %v676_v9 = vsel %vm670_vm4, %v674_v2, 0.0 }
  0xe1   : > { %v264_v10 = vpop.f32.mrf.mxu0  ;;  %v342_v12 = vpop.f32.mrf.mxu1 }
  0xe2   : > { %v271_v11 = vmul.f32 14.285714, %v264_v10  ;;  %v349_v13 = vmul.f32 14.285714, %v342_v12  ;;  %v689_v10 = vsel %vm683_vm5, %v688_v3, 0.0  ;;  %v710_v12 = vrot.slane %v663_v59, %v709_v5 }
  0xe3   : > { %v1084_v14 = vpop.f32.mrf.mxu0  ;;  %v1090_v15 = vpop.f32.mrf.mxu1 }
  0xe4   : > { %v274_v16 = vsel %vm273_vm2, %v271_v11, -inf  ;;  %v351_v17 = vsel %vm273_vm2, %v349_v13, -inf  ;;  %v703_v15 = vsel %vm697_vm7, %v702_v6, 0.0  ;;  %vm711_vm9 = vcmp.eq.s32.totalorder %v205_v55, %v710_v12 }
  0xe5   : > { %275 = vmax.xlane.f32.xlu1 %v274_v16  ;;  %v267_v18 = vpop.f32.mrf.mxu0  ;;  %352 = vmax.xlane.f32.xlu0 %v351_v17  ;;  %v345_v19 = vpop.f32.mrf.mxu1  ;;  %v704_v16 = vsel %vm698_vm8, %v702_v6, 0.0  ;;  %v716_v17 = vrot.slane %v664_v62, %v709_v5  ;;  %vm712_vm10 = vcmp.eq.s32.totalorder %v206_v61, %v710_v12 }
  0xe6   : > { %v272_v20 = vmul.f32 14.285714, %v267_v18  ;;  %v350_v21 = vmul.f32 14.285714, %v345_v19 }
  0xe7   : > { %v1085_v22 = vpop.f32.mrf.mxu0  ;;  %v1091_v23 = vpop.f32.mrf.mxu1 }
  0xe8   : > { %v277_v24 = vsel %vm273_vm2, %v272_v20, -inf  ;;  %v354_v25 = vsel %vm273_vm2, %v350_v21, -inf  ;;  %v718_v22 = vsel %vm712_vm10, %v716_v17, 0.0 }
  0xe9   : > { %278 = vmax.xlane.f32.xlu1 %v277_v24  ;;  %355 = vmax.xlane.f32.xlu0 %v354_v25  ;;  %v464_v26 = vpop.f32.mrf.mxu1 }
  0xea   : > { %v1424_v45 = vmul.f32 14.285714, %v464_v26 }
  0xeb   : > { %v1102_v27 = vpop.f32.mrf.mxu1 }
  0xec   : > { %v473_v50 = vsel %vm273_vm2, %v1424_v45, -inf }
  0xed   : > { %v467_v28 = vpop.f32.mrf.mxu1 }
  0xee   : > { %v1436_v51 = vmul.f32 14.285714, %v467_v28 }
  0xef   : > { %v1103_v29 = vpop.f32.mrf.mxu1 }
  0xf0   : > { %v476_v53 = vsel %vm273_vm2, %v1436_v51, -inf }
 0x16e   : > { %v276_v30 = vpop.xlane.xlu1 %275  ;;  %v353_v31 = vpop.xlane.xlu0 %352 }
 0x16f   : > { %v280_v32 = vsub.f32 %v271_v11, %v276_v30  ;;  %v357_v33 = vsub.f32 %v349_v13, %v353_v31  ;;  %v690_v11 = vsel %vm684_vm6, %v688_v3, 0.0  ;;  %v691_v13 = vadd.f32 %v689_v10, %v675_v8 }
 0x170   : > { %v692_v14 = vadd.f32 %v690_v11, %v676_v9 }
 0x171   : > { %v359_v34 = vmul.f32 1.442695, %v357_v33  ;;  %v282_v35 = vmul.f32 1.442695, %v280_v32  ;;  %v705_v18 = vadd.f32 %v703_v15, %v691_v13 }
 0x172   : > { %v279_v36 = vpop.xlane.xlu1 %278  ;;  %v356_v37 = vpop.xlane.xlu0 %355  ;;  %v706_v19 = vadd.f32 %v704_v16, %v692_v14 }
 0x173   : > { %v281_v38 = vsub.f32 %v272_v20, %v279_v36  ;;  %1191 = vpow2.f32 %v359_v34  ;;  %v358_v39 = vsub.f32 %v350_v21, %v356_v37  ;;  %v586_v20 = vpop.f32.mrf.mxu1  ;;  %v717_v21 = vsel %vm711_vm9, %v716_v17, 0.0 }
 0x174   : > { %1193 = vpow2.f32 %v282_v35  ;;  %v719_v24 = vadd.f32 %v717_v21, %v705_v18  ;;  %v720_v25 = vadd.f32 %v718_v22, %v706_v19 }
 0x175   : > { %v361_v40 = vmul.f32 1.442695, %v358_v39  ;;  %v284_v41 = vmul.f32 1.442695, %v281_v38  ;;  %v1114_v23 = vpop.f32.mrf.mxu1 }
 0x176   : > { %v721_v28 = vpack.c.bf16 %v720_v25, %v719_v24 }
 0x177   : > { %1195 = vpow2.f32 %v361_v40  ;;  %v589_v26 = vpop.f32.mrf.mxu1 }
 0x178   : > { %1197 = vpow2.f32 %v284_v41 }
 0x179   : > { %v1115_v27 = vpop.f32.mrf.mxu1 }
 0x180   : > { %v1418_v42 = vpop.eup %1191 }
 0x181   : > { %v363_v43 = vsel %vm273_vm2, %v1418_v42, 0.0  ;;  %v1422_v44 = vpop.eup %1193 }
 0x182   : > { %364 = vadd.xlane.f32.xlu0 %v363_v43  ;;  %v286_v47 = vsel %vm273_vm2, %v1422_v44, 0.0 }
 0x184   : > { %v1426_v46 = vpop.eup %1195 }
 0x185   : > { %v366_v48 = vsel %vm273_vm2, %v1426_v46, 0.0  ;;  %v1432_v49 = vpop.eup %1197 }
 0x186   : > { %287 = vadd.xlane.f32.xlu0 %v286_v47  ;;  %367 = vadd.xlane.f32.xlu1 %v366_v48  ;;  %v289_v52 = vsel %vm273_vm2, %v1432_v49, 0.0 }
 0x18a   : > { %290 = vadd.xlane.f32.xlu1 %v289_v52  ;;  %474 = vmax.xlane.f32.xlu0 %v473_v50 }
 0x18e   : > { %477 = vmax.xlane.f32.xlu1 %v476_v53 }
 0x1b7   : > { %724 = vxpose.xlu0.c.b16.start.end [1/1] (short) (narrow) %v721_v28, 16 }
 0x20b   : > { %v365_v29 = vpop.xlane.xlu0 %364 }
 0x20c   : > { %1199 = vrcp.f32 %v365_v29 }
 0x20f   : > { %v288_v30 = vpop.xlane.xlu0 %287  ;;  %v368_v31 = vpop.xlane.xlu1 %367 }
 0x210   : > { %1201 = vrcp.f32 %v368_v31 }
 0x211   : > { %1203 = vrcp.f32 %v288_v30 }
 0x213   : > { %v291_v32 = vpop.xlane.xlu1 %290  ;;  %v475_v33 = vpop.xlane.xlu0 %474 }
 0x214   : > { %1205 = vrcp.f32 %v291_v32  ;;  %v479_v34 = vsub.f32 %v1424_v45, %v475_v33 }
 0x216   : > { %v481_v35 = vmul.f32 1.442695, %v479_v34 }
 0x217   : > { %v478_v36 = vpop.xlane.xlu1 %477 }
 0x218   : > { %1207 = vpow2.f32 %v481_v35  ;;  %v480_v37 = vsub.f32 %v1436_v51, %v478_v36 }
 0x219   : > { %v732_v38 = vpop.trf.xlu0  ;;  %v1200_v40 = vpop.eup %1199 }
 0x21a   : > { %v483_v39 = vmul.f32 1.442695, %v480_v37  ;;  %1125 = vmatmul.mubr.msk.bf16.vlgmr.msra.gmra.mxu1 %vm273_vm2, %v732_v38  ;;  %v371_v47 = vmul.f32 %v1200_v40, %v1418_v42  ;;  %v593_v42 = vmul.f32 14.285714, %v586_v20 }
 0x21b   : > { %1136 = vmatprep.mubr.msk.bf16.mxu1 %vm1298_vm0, %v1297_v0 }
 0x21c   : > { %1209 = vpow2.f32 %v483_v39 }
 0x21d   : > { %v1202_v41 = vpop.eup %1201 }
 0x21e   : > { %v1204_v43 = vpop.eup %1203  ;;  %v372_v45 = vmul.f32 %v1202_v41, %v1426_v46  ;;  %v428_v41 = vsel %vm223_vm1, %v1402_v7, 0 }
 0x21f   : > { %v294_v52 = vmul.f32 %v1204_v43, %v1422_v44  ;;  %v595_v44 = vsel %vm273_vm2, %v593_v42, -inf }
 0x220   : > { %v373_v50 = vpack.c.bf16 %v372_v45, %v371_v47 }
 0x221   : > { %v1206_v48 = vpop.eup %1205 }
 0x222   : > { %v295_v51 = vmul.f32 %v1206_v48, %v1432_v49  ;;  %1093 = vmatpush3.bf16.msra.mxu0 %v373_v50  ;;  %v594_v49 = vmul.f32 14.285714, %v589_v26 }
 0x223   : > { %1104 = vmatprep.subr.bf16.mxu0 %v1297_v0 }
 0x224   : > { %v296_v53 = vpack.c.bf16 %v295_v51, %v294_v52  ;;  %v598_v57 = vsel %vm273_vm2, %v594_v49, -inf }
 0x225   : > { %v1208_v54 = vpop.eup %1207 }
 0x226   : > { %1095 = vmatmul.mubr.msk.bf16.vlgmr.msra.gmra.mxu0 %vm273_vm2, %v296_v53  ;;  %v485_v55 = vsel %vm273_vm2, %v1208_v54, 0.0 }
 0x227   : > { %486 = vadd.xlane.f32.xlu1 %v485_v55  ;;  %1106 = vmatprep.mubr.msk.bf16.mxu0 %vm1298_vm0, %v1297_v0 }
 0x229   : > { %v1210_v46 = vpop.eup %1209 }
 0x22a   : > { %v488_v56 = vsel %vm273_vm2, %v1210_v46, 0.0 }
 0x22b   : > { %489 = vadd.xlane.f32.xlu1 %v488_v56 }
 0x22f   : > { %596 = vmax.xlane.f32.xlu1 %v595_v44 }
 0x233   : > { %599 = vmax.xlane.f32.xlu1 %v598_v57 }
 0x2b0   : > { %v487_v58 = vpop.xlane.xlu1 %486 }
 0x2b4   : > { %v490_v59 = vpop.xlane.xlu1 %489 }
 0x2b8   : > { %v597_v60 = vpop.xlane.xlu1 %596 }
 0x2b9   : > { %v601_v61 = vsub.f32 %v593_v42, %v597_v60 }
 0x2bb   : > { %v603_v62 = vmul.f32 1.442695, %v601_v61 }
 0x2bc   : > { %v600_v63 = vpop.xlane.xlu1 %599 }
 0x2bd   : > { %1211 = vpow2.f32 %v603_v62  ;;  %v602_v1 = vsub.f32 %v594_v49, %v600_v63 }
 0x2bf   : > { %v605_v2 = vmul.f32 1.442695, %v602_v1 }
 0x2c1   : > { %1213 = vpow2.f32 %v605_v2 }
 0x2c2   : > { %1215 = vrcp.f32 %v490_v59 }
 0x2c3   : > { %1217 = vrcp.f32 %v487_v58 }
 0x2ca   : > { %v1212_v3 = vpop.eup %1211 }
 0x2cb   : > { %v607_v4 = vsel %vm273_vm2, %v1212_v3, 0.0 }
 0x2cc   : > { %608 = vadd.xlane.f32.xlu1 %v607_v4 }
 0x2ce   : > { %v1214_v5 = vpop.eup %1213 }
 0x2cf   : > { %v610_v6 = vsel %vm273_vm2, %v1214_v5, 0.0  ;;  %v1216_v17 = vpop.eup %1215 }
 0x2d0   : > { %611 = vadd.xlane.f32.xlu1 %v610_v6  ;;  %v1218_v19 = vpop.eup %1217  ;;  %v494_v21 = vmul.f32 %v1216_v17, %v1210_v46 }
 0x2d1   : > { %v493_v24 = vmul.f32 %v1218_v19, %v1208_v54 }
 0x2d3   : > { %v495_v25 = vpack.c.bf16 %v494_v21, %v493_v24 }
 0x2da   : > { %v783_v8 = vpop.f32.mrf.mxu1 }
 0x2db   : > { %v790_v9 = vmul.f32 %v783_v8, %v783_v8 }
 0x2dc   : > { %v1126_v10 = vpop.f32.mrf.mxu1 }
 0x2dd   : > { %v792_v11 = vsel %vm223_vm1, %v790_v9, 0.0 }
 0x2de   : > { %793 = vadd.xlane.f32.xlu1 %v792_v11  ;;  %v786_v12 = vpop.f32.mrf.mxu1 }
 0x2df   : > { %v791_v13 = vmul.f32 %v786_v12, %v786_v12 }
 0x2e0   : > { %v1127_v14 = vpop.f32.mrf.mxu1 }
 0x2e1   : > { %v795_v15 = vsel %vm223_vm1, %v791_v13, 0.0 }
 0x2e2   : > { %796 = vadd.xlane.f32.xlu1 %v795_v15 }
 0x2e6   : > { %v411_v16 = vpop.f32.mrf.mxu0 }
 0x2e8   : > { %v1096_v18 = vpop.f32.mrf.mxu0 }
 0x2ea   : > { %v414_v20 = vpop.f32.mrf.mxu0 }
 0x2eb   : > { %v418_v22 = vpack.c.bf16 %v414_v20, %v411_v16 }
 0x2ec   : > { %v1097_v23 = vpop.f32.mrf.mxu0 }
 0x2ed   : > { %1105 = vmatpush3.bf16.msra.mxu0 %v418_v22 }
 0x2ee   : > { %1116 = vmatprep.subr.bf16.mxu0 %v1297_v0 }
 0x2f0   : > { %1107 = vmatmul.mubr.msk.bf16.vlgmr.msra.gmra.mxu0 %vm273_vm2, %v495_v25 }
 0x2f1   : > { %1118 = vmatprep.mubr.msk.bf16.mxu0 %vm1298_vm0, %v1297_v0 }
 0x355   : > { %v609_v26 = vpop.xlane.xlu1 %608 }
 0x356   : > { %1219 = vrcp.f32 %v609_v26 }
 0x359   : > { %v612_v27 = vpop.xlane.xlu1 %611 }
 0x35a   : > { %1221 = vrcp.f32 %v612_v27 }
 0x363   : > { %v1220_v28 = vpop.eup %1219 }
 0x364   : > { %v615_v30 = vmul.f32 %v1220_v28, %v1212_v3 }
 0x367   : > { %v1222_v29 = vpop.eup %1221  ;;  %v794_v33 = vpop.xlane.xlu1 %793 }
 0x368   : > { %v616_v31 = vmul.f32 %v1222_v29, %v1214_v5  ;;  %v798_v36 = vmax.f32 %v794_v33, 1e-24 }
 0x36a   : > { %v617_v32 = vpack.c.bf16 %v616_v31, %v615_v30 }
 0x36b   : > { %v797_v34 = vpop.xlane.xlu1 %796 }
 0x36c   : > { %1117 = vmatpush3.bf16.msra.mxu0 %v617_v32  ;;  %v799_v35 = vmax.f32 %v797_v34, 1e-24 }
 0x36d   : > { %1128 = vmatprep.subr.bf16.mxu0 %v1297_v0 }
 0x36e   : > { %1223 = vrsqrt.f32 %v799_v35 }
 0x36f   : > { %1225 = vrsqrt.f32 %v798_v36 }
 0x37b   : > { %v1224_v43 = vpop.eup %1223 }
 0x37c   : > { %v1226_v45 = vpop.eup %1225  ;;  %v803_v48 = vmul.f32 %v1224_v43, %v786_v12 }
 0x37d   : > { %v802_v50 = vmul.f32 %v1226_v45, %v783_v8 }
 0x37f   : > { %v804_v52 = vpack.c.bf16 %v803_v48, %v802_v50 }
 0x3b0   : > { %v533_v37 = vpop.f32.mrf.mxu0 }
 0x3b2   : > { %v1108_v38 = vpop.f32.mrf.mxu0 }
 0x3b4   : > { %v536_v39 = vpop.f32.mrf.mxu0 }
 0x3b5   : > { %v540_v40 = vpack.c.bf16 %v536_v39, %v533_v37 }
 0x3b6   : > { %v1109_v47 = vpop.f32.mrf.mxu0 }
 0x3b7   : > { %1119 = vmatmul.mubr.msk.bf16.vlgmr.msra.gmra.mxu0 %vm273_vm2, %v540_v40 }
 0x3b8   : > { %1129 = vmatpush3.bf16.xpose.msra.mxu0 %v428_v41  ;;  %1130 = vmatprep.mubr.msk.bf16.mxu0 %vm1298_vm0, %v1297_v0 }
 0x3bf   : > { %1131 = vmatmul.mubr.msk.bf16.vlgmr.msra.gmra.mxu0 %vm223_vm1, %v804_v52 }
 0x477   : > { %v655_v51 = vpop.f32.mrf.mxu0 }
 0x479   : > { %v1120_v53 = vpop.f32.mrf.mxu0 }
 0x47b   : > { %v658_v54 = vpop.f32.mrf.mxu0 }
 0x47c   : > { %v662_v55 = vpack.c.bf16 %v658_v54, %v655_v51 }
 0x47d   : > { %v1121_v42 = vpop.f32.mrf.mxu0 }
 0x47e   : > { %1135 = vmatpush3.bf16.msra.mxu1 %v662_v55 }
 0x47f   : > { %v842_v7 = vpop.f32.mrf.mxu0 }
 0x480   : > { %v849_v46 = vmul.f32 14.285714, %v842_v7 }
 0x481   : > { %v1132_v56 = vpop.f32.mrf.mxu0 }
 0x482   : > { %v851_v44 = vsel %vm273_vm2, %v849_v46, -inf }
 0x483   : > { %852 = vmax.xlane.f32.xlu1 %v851_v44  ;;  %v845_v49 = vpop.f32.mrf.mxu0 }
 0x484   : > { %v850_v57 = vmul.f32 14.285714, %v845_v49 }
 0x485   : > { %v1133_v0 = vpop.f32.mrf.mxu0 }
 0x486   : > { %v854_v58 = vsel %vm273_vm2, %v850_v57, -inf }
 0x487   : > { %855 = vmax.xlane.f32.xlu1 %v854_v58 }
 0x50c   : > { %v853_v59 = vpop.xlane.xlu1 %852 }
 0x50d   : > { %v857_v60 = vsub.f32 %v849_v46, %v853_v59 }
 0x50f   : > { %v859_v61 = vmul.f32 1.442695, %v857_v60 }
 0x510   : > { %v856_v62 = vpop.xlane.xlu1 %855 }
 0x511   : > { %1227 = vpow2.f32 %v859_v61  ;;  %v858_v63 = vsub.f32 %v850_v57, %v856_v62 }
 0x513   : > { %v861_v1 = vmul.f32 1.442695, %v858_v63 }
 0x515   : > { %1229 = vpow2.f32 %v861_v1 }
 0x51e   : > { %v1228_v2 = vpop.eup %1227 }
 0x51f   : > { %v863_v3 = vsel %vm273_vm2, %v1228_v2, 0.0 }
 0x520   : > { %864 = vadd.xlane.f32.xlu1 %v863_v3 }
 0x522   : > { %v1230_v4 = vpop.eup %1229 }
 0x523   : > { %v866_v5 = vsel %vm273_vm2, %v1230_v4, 0.0 }
 0x524   : > { %867 = vadd.xlane.f32.xlu1 %v866_v5 }
 0x5a9   : > { %v865_v6 = vpop.xlane.xlu1 %864 }
 0x5aa   : > { %1231 = vrcp.f32 %v865_v6 }
 0x5ad   : > { %v868_v8 = vpop.xlane.xlu1 %867 }
 0x5ae   : > { %1233 = vrcp.f32 %v868_v8 }
 0x5b7   : > { %v1232_v9 = vpop.eup %1231 }
 0x5b8   : > { %v871_v12 = vmul.f32 %v1232_v9, %v1228_v2 }
 0x5bb   : > { %v1234_v10 = vpop.eup %1233 }
 0x5bc   : > { %v872_v11 = vmul.f32 %v1234_v10, %v1230_v4 }
 0x5be   : > { %v873_v13 = vpack.c.bf16 %v872_v11, %v871_v12 }
 0x5c0   : > { %1137 = vmatmul.mubr.msk.bf16.vlgmr.msra.gmra.mxu1 %vm273_vm2, %v873_v13 }
 0x680   : > { %v911_v14 = vpop.f32.mrf.mxu1 }
 0x681   : > { %918 = vst.msk [vmem:[%s189_s11] sm:$0xff] %vm273_vm2, %v911_v14 }
 0x682   : > { %v1138_v15 = vpop.f32.mrf.mxu1 }
 0x684   : > { %v914_v16 = vpop.f32.mrf.mxu1 }
 0x685   : > { %919 = vst.msk [vmem:[%s189_s11 + $0x8] sm:$0xff] %vm273_vm2, %v914_v16 }
 0x686   : > { %v1139_v17 = vpop.f32.mrf.mxu1 }
 0x687   : > { %1248 = shalt.err (!%p1245_p3)
}
 0x688   : > { %s1249_s30 = scalar_lea.hbm %s1496_s25, 256  ;;  %s1253_s6 = scalar_lea.hbm %s1542_s3, 512 }
 0x689   : > { %p1250_p4 = scmp.ne.s32.totalorder %s1496_s25, %s1249_s30  ;;  %p1254_p9 = scmp.lt.s32.totalorder %s1496_s25, %s1542_s3 }
 0x68a   : > { %p1255_p10 = scmp.lt.s32.totalorder %s1253_s6, %s1249_s30 }
 0x68b   : > { %p1251_p7 = pnand %p1250_p4, %p1360_p5 }
 0x68c   : > { %p1256_p11 = por %p1255_p10, %p1254_p9 }
 0x68d   : > { %p1252_p8 = pneg %p1251_p7 }
 0x68f   : > { %p1257_p12 = pnand %p1256_p11, %p1252_p8 }
 0x691   : > { %1260 = shalt.err (!%p1257_p12)
}
 0x692   : > { %s1300_s9 = smov 128   ;;  %s1301_s10 = smov 8  }
 0x693   : > { %1141 = dma.vmem_to_hbm [thread:$0]  (%p1360_p5), %s1491_s17, 256, %s1496_s25, %s1499_s26, %s1300_s9, %s1300_s9, %s1301_s10  }
 0x694 PF: > { %p1147_p13 = scmp.ge.s32.totalorder %s1295_s15, 2  ;;  %s949_s11 = sand.u32 1, %s1283_s12  }
 0x695   : > { %s950_s19 = scalar_lea.sflag [#allocation3], %s949_s11 }
 0x696   : > { %p1144_p0 = pnand %p1147_p13, %p1364_p6 }
 0x698   : > { %p1145_p1 = pneg %p1144_p0 }
 0x69a   : > { %1278 = dma.done.wait (%p1145_p1), %s950_s19, 256  }
 0x69b   : > { %1280 = vsyncadd (%p1145_p1), %s950_s19, 4294967040  ;;  %p13_p2 = scmp.ge.s32.totalorder %s1347_s18, 4   ;;  %s1545_s12 = smov %s1287_s13 }
 0x69c   : > { %s1546_s13 = smov %s1291_s14  ;;  %s1547_s14 = smov %s1358_s21 }
 0x69d   : > { %s1548_s15 = smov %s1347_s18  ;;  %15 = sbr.rel (!%p13_p2) target bundleno = 3 (0x3), region = 78 }
 0x6a2   :  { %955 = vsyncpa [#allocation3], 1 }
 0x6a3   :  { %957 = vsyncpa [#allocation3 + $0x1], 1 }

</bundles_post_ra>
